<compile_context>
chip_gen: v6e
topology: v6e:2x2x1
jax: 0.10.0
libtpu: 0.0.40
codegen_flags: <defaults>
</compile_context>

<pallas_src>
import functools

import jax
import jax.numpy as jnp
from jax import lax
from jax.experimental import pallas as pl
from jax.experimental.pallas import tpu as pltpu

# ----------------------------- config (small) -----------------------------
HIDDEN = 128
NUM_HEADS = 4
NUM_KV_HEADS = 2
HEAD_SIZE = HIDDEN // NUM_HEADS          # 32
T = 16                                   # total tokens (single prefill sequence)
NUM_SLOTS = 64
ROPE_THETA = 10000.0
LN_EPS = 1e-5
SOFTMAX_SCALE = HEAD_SIZE ** -0.5
USE_QK_NORM = True


# --------------------------- fused attention kernel ------------------------
def _fused_attn_kernel(
    hidden_ref,   # [T, HIDDEN]                VMEM
    wqkv_ref,     # [H + 2*KV, HIDDEN, D]      VMEM  (per-head weight slabs)
    wo_ref,       # [H*D, HIDDEN]              VMEM
    qw_ref,       # [H, D]                     VMEM
    kw_ref,       # [KV, D]                    VMEM
    cos_ref,      # [T, D]                     VMEM  (interleaved-expanded)
    sin_ref,      # [T, D]                     VMEM
    slots_ref,    # [T] int32                  SMEM
    kc_in_ref,    # [NUM_SLOTS, KV*D]          VMEM
    vc_in_ref,    # [NUM_SLOTS, KV*D]          VMEM
    out_ref,      # [T, HIDDEN]                VMEM
    kc_out_ref,   # [NUM_SLOTS, KV*D]          VMEM (aliased with kc_in)
    vc_out_ref,   # [NUM_SLOTS, KV*D]          VMEM (aliased with vc_in)
    *,
    eps, scale, use_qk_norm, num_heads, num_kv_heads, head_size,
):
    groups = num_heads // num_kv_heads
    t = hidden_ref.shape[0]
    d = head_size

    # activations in bf16 for the MXU; all statistics stay f32.
    x_bf = hidden_ref[...].astype(jnp.bfloat16)           # [T, HIDDEN]
    cos = cos_ref[...].astype(jnp.float32)                 # [T, D]
    sin = sin_ref[...].astype(jnp.float32)

    d_idx = lax.broadcasted_iota(jnp.int32, (t, d), 1)
    is_even = (d_idx % 2) == 0

    def rope(v):
        # interleaved ("non-neox") rotary:
        #   out[2i]   = v[2i]*cos[i] - v[2i+1]*sin[i]
        #   out[2i+1] = v[2i]*sin[i] + v[2i+1]*cos[i]
        nxt = pltpu.roll(v, shift=d - 1, axis=1)   # v[(j+1) % d]
        prv = pltpu.roll(v, shift=1, axis=1)       # v[(j-1) % d]
        rot = jnp.where(is_even, -nxt, prv)
        return v * cos + rot * sin

    def layer_norm(v, w_row):                       # per-head Cohere layernorm (f32)
        mu = jnp.mean(v, axis=-1, keepdims=True)
        vm = v - mu
        var = jnp.mean(vm * vm, axis=-1, keepdims=True)
        return vm * lax.rsqrt(var + eps) * w_row

    def proj_head(j):                               # [T, D] f32 (bf16 MXU, f32 acc)
        w = wqkv_ref[j].astype(jnp.bfloat16)        # [HIDDEN, D]
        return jnp.dot(x_bf, w, preferred_element_type=jnp.float32)

    # ---- Q heads: proj + qk-norm + rotary; fold softmax scale into q ----
    q_heads = []
    for h in range(num_heads):
        qh = proj_head(h)
        if use_qk_norm:
            qh = layer_norm(qh, qw_ref[h:h + 1, :].astype(jnp.float32))
        q_heads.append(rope(qh) * scale)

    # ---- K heads: proj + qk-norm + rotary (no scale) ----
    k_heads = []
    for g in range(num_kv_heads):
        kh = proj_head(num_heads + g)
        if use_qk_norm:
            kh = layer_norm(kh, kw_ref[g:g + 1, :].astype(jnp.float32))
        k_heads.append(rope(kh))

    # ---- V heads ----
    v_heads = [proj_head(num_heads + num_kv_heads + g) for g in range(num_kv_heads)]

    # ---- KV-cache writeback (reshape_and_cache), caches aliased in/out ----
    kc_out_ref[...] = kc_in_ref[...]
    vc_out_ref[...] = vc_in_ref[...]
    k_rows = jnp.concatenate(k_heads, axis=-1)      # [T, KV*D]
    v_rows = jnp.concatenate(v_heads, axis=-1)      # [T, KV*D]
    for i in range(t):
        s_i = slots_ref[i]
        kc_out_ref[pl.ds(s_i, 1), :] = k_rows[i:i + 1, :]
        vc_out_ref[pl.ds(s_i, 1), :] = v_rows[i:i + 1, :]

    # ---- causal attention (GQA) + output projection, lane-dense output ----
    qi = lax.broadcasted_iota(jnp.int32, (t, t), 0)
    kj = lax.broadcasted_iota(jnp.int32, (t, t), 1)
    causal = kj <= qi

    out_acc = jnp.zeros((t, wo_ref.shape[1]), jnp.float32)
    for h in range(num_heads):
        g = h // groups
        q_bf = q_heads[h].astype(jnp.bfloat16)
        k_bf = k_heads[g].astype(jnp.bfloat16)
        v_bf = v_heads[g].astype(jnp.bfloat16)

        scores = lax.dot_general(                           # [T, T] f32
            q_bf, k_bf, (((1,), (1,)), ((), ())),
            preferred_element_type=jnp.float32)
        scores = jnp.where(causal, scores, -1e30)
        m = jnp.max(scores, axis=-1, keepdims=True)
        p = jnp.exp(scores - m)
        l = jnp.sum(p, axis=-1, keepdims=True)
        o = jnp.dot(p.astype(jnp.bfloat16), v_bf,
                    preferred_element_type=jnp.float32)      # [T, D]
        o = o * pl.reciprocal(l, approx=True)

        w_o = wo_ref[h * d:(h + 1) * d, :].astype(jnp.bfloat16)   # [D, HIDDEN]
        out_acc = out_acc + jnp.dot(o.astype(jnp.bfloat16), w_o,
                                    preferred_element_type=jnp.float32)

    out_ref[...] = out_acc.astype(out_ref.dtype)


# ------------------------------ full forward -------------------------------
def flash_cohere_attention(hidden_states, cos, sin, params, slots, kv_cache):
    t, hidden = hidden_states.shape
    h, kv, d = NUM_HEADS, NUM_KV_HEADS, HEAD_SIZE

    # rope tables expanded once to [T, D] (interleaved): cheap, done in wrapper.
    cos_full = jnp.repeat(cos, 2, axis=-1)
    sin_full = jnp.repeat(sin, 2, axis=-1)

    # per-head weight slabs [H + 2*KV, HIDDEN, D] (weight pre-layout, trace time)
    wqkv_heads = params["wqkv_t"].reshape(hidden, h + 2 * kv, d).transpose(1, 0, 2)

    key_cache, value_cache = kv_cache
    num_slots = key_cache.shape[0]
    kc = key_cache.reshape(num_slots, kv * d)
    vc = value_cache.reshape(num_slots, kv * d)

    kernel = functools.partial(
        _fused_attn_kernel,
        eps=LN_EPS, scale=SOFTMAX_SCALE, use_qk_norm=USE_QK_NORM,
        num_heads=h, num_kv_heads=kv, head_size=d,
    )

    def full(shape):
        return pl.BlockSpec(shape, lambda i: (0,) * len(shape))

    out, kc_new, vc_new = pl.pallas_call(
        kernel,
        grid=(1,),
        in_specs=[
            full((t, hidden)),                                   # hidden
            full((h + 2 * kv, hidden, d)),                       # wqkv (per-head)
            full((h * d, hidden)),                               # wo_t
            full((h, d)),                                        # q_norm_w
            full((kv, d)),                                       # k_norm_w
            full((t, d)),                                        # cos
            full((t, d)),                                        # sin
            pl.BlockSpec(memory_space=pltpu.MemorySpace.SMEM),   # slots
            full((num_slots, kv * d)),                           # key cache (in)
            full((num_slots, kv * d)),                           # value cache (in)
        ],
        out_specs=[
            full((t, hidden)),
            full((num_slots, kv * d)),
            full((num_slots, kv * d)),
        ],
        out_shape=[
            jax.ShapeDtypeStruct((t, hidden), hidden_states.dtype),
            jax.ShapeDtypeStruct((num_slots, kv * d), key_cache.dtype),
            jax.ShapeDtypeStruct((num_slots, kv * d), value_cache.dtype),
        ],
        input_output_aliases={8: 1, 9: 2},
        compiler_params=pltpu.CompilerParams(
            dimension_semantics=("arbitrary",)),
    )(hidden_states, wqkv_heads, params["wo_t"], params["q_norm_w"],
      params["k_norm_w"], cos_full, sin_full, slots, kc, vc)

    return out, (kc_new.reshape(num_slots, kv, d),
                 vc_new.reshape(num_slots, kv, d))


# ------------------------------ pure-JAX ref --------------------------------
def reference_forward(hidden_states, cos, sin, params):
    H, KV, D = NUM_HEADS, NUM_KV_HEADS, HEAD_SIZE
    Tn = hidden_states.shape[0]
    qkv = hidden_states @ params["wqkv_t"]
    q, k, v = jnp.split(qkv, [H * D, H * D + KV * D], axis=1)

    def ln(x):
        x32 = x.astype(jnp.float32)
        mu = x32.mean(-1, keepdims=True)
        xm = x32 - mu
        var = (xm * xm).mean(-1, keepdims=True)
        return xm * lax.rsqrt(var + LN_EPS)

    if USE_QK_NORM:
        q = (ln(q.reshape(-1, D)).reshape(Tn, H, D) * params["q_norm_w"][None]).reshape(Tn, H * D)
        k = (ln(k.reshape(-1, D)).reshape(Tn, KV, D) * params["k_norm_w"][None]).reshape(Tn, KV * D)

    q = q.reshape(Tn, H, D)
    k = k.reshape(Tn, KV, D)
    v = v.reshape(Tn, KV, D)

    def rope(x):
        x1 = x[..., 0::2]
        x2 = x[..., 1::2]
        c = cos[:, None, :]
        s = sin[:, None, :]
        o1 = x1 * c - x2 * s
        o2 = x1 * s + x2 * c
        return jnp.stack([o1, o2], axis=-1).reshape(x.shape)

    q = rope(q)
    k = rope(k)
    groups = H // KV
    kx = jnp.repeat(k, groups, axis=1)
    vx = jnp.repeat(v, groups, axis=1)
    s = jnp.einsum("qhd,khd->hqk", q, kx) * SOFTMAX_SCALE
    qi = jnp.arange(Tn)[:, None]
    kj = jnp.arange(Tn)[None, :]
    s = jnp.where((kj <= qi)[None], s, -1e30)
    p = jax.nn.softmax(s, axis=-1)
    o = jnp.einsum("hqk,khd->qhd", p, vx)
    out = o.reshape(Tn, H * D) @ params["wo_t"]
    return out, k, v


# ----------------------------------- main -----------------------------------
if __name__ == "__main__":
    dtype = jnp.float32
    key = jax.random.PRNGKey(0)
    k1, k2, k3, k4, k5 = jax.random.split(key, 5)

    hidden_states = jax.random.normal(k1, (T, HIDDEN), dtype)

    # deterministic synthetic weights (attention_bias = False)
    wqkv = 0.02 * jax.random.normal(
        k2, ((NUM_HEADS + 2 * NUM_KV_HEADS) * HEAD_SIZE, HIDDEN), dtype
    )
    wo = 0.02 * jax.random.normal(k3, (HIDDEN, NUM_HEADS * HEAD_SIZE), dtype)
    q_norm_w = 1.0 + 0.1 * jax.random.normal(k4, (NUM_HEADS, HEAD_SIZE), dtype)
    k_norm_w = 1.0 + 0.1 * jax.random.normal(k5, (NUM_KV_HEADS, HEAD_SIZE), dtype)
    params = dict(wqkv_t=wqkv.T, wo_t=wo.T, q_norm_w=q_norm_w, k_norm_w=k_norm_w)

    # rotary tables (CohereRotary / PositionRotaryEmbedding)
    positions = jnp.arange(T, dtype=jnp.float32)
    inv_freq = 1.0 / (
        ROPE_THETA ** (jnp.arange(0, HEAD_SIZE, 2, dtype=jnp.float32) / HEAD_SIZE)
    )
    freqs = positions[:, None] * inv_freq[None, :]
    cos = jnp.cos(freqs).astype(dtype)   # [T, HEAD_SIZE // 2]
    sin = jnp.sin(freqs).astype(dtype)

    # simplified kv cache: flat slot-indexed cache [num_slots, num_kv_heads, head_size]
    slots = jnp.arange(T, dtype=jnp.int32)
    key_cache = jnp.zeros((NUM_SLOTS, NUM_KV_HEADS, HEAD_SIZE), dtype)
    value_cache = jnp.zeros((NUM_SLOTS, NUM_KV_HEADS, HEAD_SIZE), dtype)

    fwd = jax.jit(flash_cohere_attention)
    out, (key_cache, value_cache) = fwd(
        hidden_states, cos, sin, params, slots, (key_cache, value_cache)
    )
    out = jax.block_until_ready(out)

    ref_out, ref_k, ref_v = reference_forward(hidden_states, cos, sin, params)

    assert out.shape == (T, HIDDEN)
    assert bool(jnp.all(jnp.isfinite(out)))
    err = float(jnp.max(jnp.abs(out - ref_out)))
    assert err < 5e-2, f"max abs err {err}"
    kerr = float(jnp.max(jnp.abs(key_cache[slots] - ref_k)))
    verr = float(jnp.max(jnp.abs(value_cache[slots] - ref_v)))
    assert kerr < 5e-2, f"key cache err {kerr}"
    assert verr < 5e-2, f"value cache err {verr}"
    assert bool(jnp.all(key_cache[T:] == 0.0)) and bool(jnp.all(value_cache[T:] == 0.0))
    print("KERNEL_OK")
</pallas_src>

<mosaic_0001>
module attributes {stable_mosaic.version = 11 : i64} {
  func.func @_fused_attn_kernel(%arg0: i32, %arg1: memref<16x128xf32, #tpu.memory_space<vmem>>, %arg2: memref<8x128x32xf32, #tpu.memory_space<vmem>>, %arg3: memref<128x128xf32, #tpu.memory_space<vmem>>, %arg4: memref<4x32xf32, #tpu.memory_space<vmem>>, %arg5: memref<2x32xf32, #tpu.memory_space<vmem>>, %arg6: memref<16x32xf32, #tpu.memory_space<vmem>>, %arg7: memref<16x32xf32, #tpu.memory_space<vmem>>, %arg8: memref<16xi32, #tpu.memory_space<smem>>, %arg9: memref<64x64xf32, #tpu.memory_space<vmem>>, %arg10: memref<64x64xf32, #tpu.memory_space<vmem>>, %arg11: memref<16x128xf32, #tpu.memory_space<vmem>>, %arg12: memref<64x64xf32, #tpu.memory_space<vmem>>, %arg13: memref<64x64xf32, #tpu.memory_space<vmem>>) attributes {dimension_semantics = [#tpu.dimension_semantics<arbitrary>], iteration_bounds = array<i64: 1>, scalar_prefetch = 0 : i64, scratch_operands = 0 : i64, tpu.core_type = #tpu.core_type<tc>, window_params = [{pipeline_mode = #tpu.pipeline_mode<synchronous>, transform_indices = @transform_0, window_bounds = array<i64: 16, 128>}, {pipeline_mode = #tpu.pipeline_mode<synchronous>, transform_indices = @transform_1, window_bounds = array<i64: 8, 128, 32>}, {pipeline_mode = #tpu.pipeline_mode<synchronous>, transform_indices = @transform_2, window_bounds = array<i64: 128, 128>}, {pipeline_mode = #tpu.pipeline_mode<synchronous>, transform_indices = @transform_3, window_bounds = array<i64: 4, 32>}, {pipeline_mode = #tpu.pipeline_mode<synchronous>, transform_indices = @transform_4, window_bounds = array<i64: 2, 32>}, {pipeline_mode = #tpu.pipeline_mode<synchronous>, transform_indices = @transform_5, window_bounds = array<i64: 16, 32>}, {pipeline_mode = #tpu.pipeline_mode<synchronous>, transform_indices = @transform_6, window_bounds = array<i64: 16, 32>}, {transform_indices = @transform_7, window_bounds = array<i64: 16>}, {pipeline_mode = #tpu.pipeline_mode<synchronous>, transform_indices = @transform_8, window_bounds = array<i64: 64, 64>}, {pipeline_mode = #tpu.pipeline_mode<synchronous>, transform_indices = @transform_9, window_bounds = array<i64: 64, 64>}, {pipeline_mode = #tpu.pipeline_mode<synchronous>, transform_indices = @transform_10, window_bounds = array<i64: 16, 128>}, {pipeline_mode = #tpu.pipeline_mode<synchronous>, transform_indices = @transform_11, window_bounds = array<i64: 64, 64>}, {pipeline_mode = #tpu.pipeline_mode<synchronous>, transform_indices = @transform_12, window_bounds = array<i64: 64, 64>}]} {
    %c0 = arith.constant 0 : index
    %c0_0 = arith.constant 0 : index
    %0 = vector.load %arg1[%c0, %c0_0] : memref<16x128xf32, #tpu.memory_space<vmem>>, vector<16x128xf32>
    %1 = arith.truncf %0 : vector<16x128xf32> to vector<16x128xbf16>
    %c0_1 = arith.constant 0 : index
    %c0_2 = arith.constant 0 : index
    %2 = vector.load %arg6[%c0_1, %c0_2] : memref<16x32xf32, #tpu.memory_space<vmem>>, vector<16x32xf32>
    %c0_3 = arith.constant 0 : index
    %c0_4 = arith.constant 0 : index
    %3 = vector.load %arg7[%c0_3, %c0_4] : memref<16x32xf32, #tpu.memory_space<vmem>>, vector<16x32xf32>
    %4 = tpu.iota {dimensions = array<i32: 1>} : vector<16x32xi32>
    %c2_i32 = arith.constant 2 : i32
    %c0_i32 = arith.constant 0 : i32
    %5 = arith.cmpi eq, %c2_i32, %c0_i32 : i32
    %c1_i32 = arith.constant 1 : i32
    %6 = arith.select %5, %c1_i32, %c2_i32 : i32
    %7 = vector.broadcast %6 : i32 to vector<16x32xi32>
    %8 = arith.remsi %4, %7 : vector<16x32xi32>
    %c0_i32_5 = arith.constant 0 : i32
    %9 = vector.broadcast %c0_i32_5 : i32 to vector<16x32xi32>
    %10 = arith.cmpi ne, %8, %9 : vector<16x32xi32>
    %c0_i32_6 = arith.constant 0 : i32
    %11 = vector.broadcast %c0_i32_6 : i32 to vector<16x32xi32>
    %12 = arith.cmpi slt, %8, %11 : vector<16x32xi32>
    %c0_i32_7 = arith.constant 0 : i32
    %13 = arith.cmpi slt, %6, %c0_i32_7 : i32
    %14 = vector.broadcast %13 : i1 to vector<16x32xi1>
    %15 = vector.broadcast %14 : vector<16x32xi1> to vector<16x32xi1>
    %16 = arith.xori %12, %15 : vector<16x32xi1>
    %17 = arith.andi %16, %10 : vector<16x32xi1>
    %18 = vector.broadcast %6 : i32 to vector<16x32xi32>
    %19 = arith.addi %8, %18 : vector<16x32xi32>
    %20 = arith.select %17, %19, %8 : vector<16x32xi1>, vector<16x32xi32>
    %c0_i32_8 = arith.constant 0 : i32
    %21 = vector.broadcast %c0_i32_8 : i32 to vector<16x32xi32>
    %22 = arith.cmpi eq, %20, %21 : vector<16x32xi32>
    %c0_9 = arith.constant 0 : index
    %c0_10 = arith.constant 0 : index
    %c0_11 = arith.constant 0 : index
    %23 = vector.load %arg2[%c0_9, %c0_10, %c0_11] : memref<8x128x32xf32, #tpu.memory_space<vmem>>, vector<1x128x32xf32>
    %24 = vector.shape_cast %23 : vector<1x128x32xf32> to vector<128x32xf32>
    %25 = arith.truncf %24 : vector<128x32xf32> to vector<128x32xbf16>
    %cst = arith.constant dense<0.000000e+00> : vector<16x32xf32>
    %26 = tpu.matmul %1, %25, %cst {dimension_numbers = #tpu.dot_dimension_numbers<[1], [0], [0], [1], [0, 0, 1, 1], [], []>} : vector<16x128xbf16>, vector<128x32xbf16>, vector<16x32xf32> -> vector<16x32xf32>
    %c0_12 = arith.constant 0 : index
    %c0_13 = arith.constant 0 : index
    %27 = vector.load %arg4[%c0_12, %c0_13] : memref<4x32xf32, #tpu.memory_space<vmem>>, vector<1x32xf32>
    %cst_14 = arith.constant dense<0.000000e+00> : vector<16xf32>
    %28 = vector.multi_reduction <add>, %26, %cst_14 [1] : vector<16x32xf32> to vector<16xf32>
    %29 = vector.shape_cast %28 : vector<16xf32> to vector<16x1xf32>
    %cst_15 = arith.constant 3.200000e+01 : f32
    %30 = vector.broadcast %cst_15 : f32 to vector<16x1xf32>
    %31 = arith.divf %29, %30 : vector<16x1xf32>
    %32 = vector.broadcast %31 : vector<16x1xf32> to vector<16x32xf32>
    %33 = arith.subf %26, %32 : vector<16x32xf32>
    %34 = arith.mulf %33, %33 : vector<16x32xf32>
    %cst_16 = arith.constant dense<0.000000e+00> : vector<16xf32>
    %35 = vector.multi_reduction <add>, %34, %cst_16 [1] : vector<16x32xf32> to vector<16xf32>
    %36 = vector.shape_cast %35 : vector<16xf32> to vector<16x1xf32>
    %cst_17 = arith.constant 3.200000e+01 : f32
    %37 = vector.broadcast %cst_17 : f32 to vector<16x1xf32>
    %38 = arith.divf %36, %37 : vector<16x1xf32>
    %cst_18 = arith.constant 9.99999974E-6 : f32
    %39 = vector.broadcast %cst_18 : f32 to vector<16x1xf32>
    %40 = arith.addf %38, %39 : vector<16x1xf32>
    %41 = math.rsqrt %40 : vector<16x1xf32>
    %42 = vector.broadcast %41 : vector<16x1xf32> to vector<16x32xf32>
    %43 = arith.mulf %33, %42 : vector<16x32xf32>
    %44 = vector.broadcast %27 : vector<1x32xf32> to vector<16x32xf32>
    %45 = arith.mulf %43, %44 : vector<16x32xf32>
    %c31_i32 = arith.constant 31 : i32
    %46 = tpu.dynamic_rotate %45 by %c31_i32 dim 1 : vector<16x32xf32>, i32 -> vector<16x32xf32>
    %c1_i32_19 = arith.constant 1 : i32
    %47 = tpu.dynamic_rotate %45 by %c1_i32_19 dim 1 : vector<16x32xf32>, i32 -> vector<16x32xf32>
    %cst_20 = arith.constant 0.000000e+00 : f32
    %48 = vector.broadcast %cst_20 : f32 to vector<16x32xf32>
    %49 = arith.subf %48, %46 : vector<16x32xf32>
    %50 = arith.select %22, %49, %47 : vector<16x32xi1>, vector<16x32xf32>
    %51 = arith.mulf %45, %2 : vector<16x32xf32>
    %52 = arith.mulf %50, %3 : vector<16x32xf32>
    %53 = arith.addf %51, %52 : vector<16x32xf32>
    %cst_21 = arith.constant 0.176776692 : f32
    %54 = vector.broadcast %cst_21 : f32 to vector<16x32xf32>
    %55 = arith.mulf %53, %54 : vector<16x32xf32>
    %c1 = arith.constant 1 : index
    %c0_22 = arith.constant 0 : index
    %c0_23 = arith.constant 0 : index
    %56 = vector.load %arg2[%c1, %c0_22, %c0_23] : memref<8x128x32xf32, #tpu.memory_space<vmem>>, vector<1x128x32xf32>
    %57 = vector.shape_cast %56 : vector<1x128x32xf32> to vector<128x32xf32>
    %58 = arith.truncf %57 : vector<128x32xf32> to vector<128x32xbf16>
    %cst_24 = arith.constant dense<0.000000e+00> : vector<16x32xf32>
    %59 = tpu.matmul %1, %58, %cst_24 {dimension_numbers = #tpu.dot_dimension_numbers<[1], [0], [0], [1], [0, 0, 1, 1], [], []>} : vector<16x128xbf16>, vector<128x32xbf16>, vector<16x32xf32> -> vector<16x32xf32>
    %c1_25 = arith.constant 1 : index
    %c0_26 = arith.constant 0 : index
    %60 = vector.load %arg4[%c1_25, %c0_26] : memref<4x32xf32, #tpu.memory_space<vmem>>, vector<1x32xf32>
    %cst_27 = arith.constant dense<0.000000e+00> : vector<16xf32>
    %61 = vector.multi_reduction <add>, %59, %cst_27 [1] : vector<16x32xf32> to vector<16xf32>
    %62 = vector.shape_cast %61 : vector<16xf32> to vector<16x1xf32>
    %cst_28 = arith.constant 3.200000e+01 : f32
    %63 = vector.broadcast %cst_28 : f32 to vector<16x1xf32>
    %64 = arith.divf %62, %63 : vector<16x1xf32>
    %65 = vector.broadcast %64 : vector<16x1xf32> to vector<16x32xf32>
    %66 = arith.subf %59, %65 : vector<16x32xf32>
    %67 = arith.mulf %66, %66 : vector<16x32xf32>
    %cst_29 = arith.constant dense<0.000000e+00> : vector<16xf32>
    %68 = vector.multi_reduction <add>, %67, %cst_29 [1] : vector<16x32xf32> to vector<16xf32>
    %69 = vector.shape_cast %68 : vector<16xf32> to vector<16x1xf32>
    %cst_30 = arith.constant 3.200000e+01 : f32
    %70 = vector.broadcast %cst_30 : f32 to vector<16x1xf32>
    %71 = arith.divf %69, %70 : vector<16x1xf32>
    %cst_31 = arith.constant 9.99999974E-6 : f32
    %72 = vector.broadcast %cst_31 : f32 to vector<16x1xf32>
    %73 = arith.addf %71, %72 : vector<16x1xf32>
    %74 = math.rsqrt %73 : vector<16x1xf32>
    %75 = vector.broadcast %74 : vector<16x1xf32> to vector<16x32xf32>
    %76 = arith.mulf %66, %75 : vector<16x32xf32>
    %77 = vector.broadcast %60 : vector<1x32xf32> to vector<16x32xf32>
    %78 = arith.mulf %76, %77 : vector<16x32xf32>
    %c31_i32_32 = arith.constant 31 : i32
    %79 = tpu.dynamic_rotate %78 by %c31_i32_32 dim 1 : vector<16x32xf32>, i32 -> vector<16x32xf32>
    %c1_i32_33 = arith.constant 1 : i32
    %80 = tpu.dynamic_rotate %78 by %c1_i32_33 dim 1 : vector<16x32xf32>, i32 -> vector<16x32xf32>
    %cst_34 = arith.constant 0.000000e+00 : f32
    %81 = vector.broadcast %cst_34 : f32 to vector<16x32xf32>
    %82 = arith.subf %81, %79 : vector<16x32xf32>
    %83 = arith.select %22, %82, %80 : vector<16x32xi1>, vector<16x32xf32>
    %84 = arith.mulf %78, %2 : vector<16x32xf32>
    %85 = arith.mulf %83, %3 : vector<16x32xf32>
    %86 = arith.addf %84, %85 : vector<16x32xf32>
    %cst_35 = arith.constant 0.176776692 : f32
    %87 = vector.broadcast %cst_35 : f32 to vector<16x32xf32>
    %88 = arith.mulf %86, %87 : vector<16x32xf32>
    %c2 = arith.constant 2 : index
    %c0_36 = arith.constant 0 : index
    %c0_37 = arith.constant 0 : index
    %89 = vector.load %arg2[%c2, %c0_36, %c0_37] : memref<8x128x32xf32, #tpu.memory_space<vmem>>, vector<1x128x32xf32>
    %90 = vector.shape_cast %89 : vector<1x128x32xf32> to vector<128x32xf32>
    %91 = arith.truncf %90 : vector<128x32xf32> to vector<128x32xbf16>
    %cst_38 = arith.constant dense<0.000000e+00> : vector<16x32xf32>
    %92 = tpu.matmul %1, %91, %cst_38 {dimension_numbers = #tpu.dot_dimension_numbers<[1], [0], [0], [1], [0, 0, 1, 1], [], []>} : vector<16x128xbf16>, vector<128x32xbf16>, vector<16x32xf32> -> vector<16x32xf32>
    %c2_39 = arith.constant 2 : index
    %c0_40 = arith.constant 0 : index
    %93 = vector.load %arg4[%c2_39, %c0_40] : memref<4x32xf32, #tpu.memory_space<vmem>>, vector<1x32xf32>
    %cst_41 = arith.constant dense<0.000000e+00> : vector<16xf32>
    %94 = vector.multi_reduction <add>, %92, %cst_41 [1] : vector<16x32xf32> to vector<16xf32>
    %95 = vector.shape_cast %94 : vector<16xf32> to vector<16x1xf32>
    %cst_42 = arith.constant 3.200000e+01 : f32
    %96 = vector.broadcast %cst_42 : f32 to vector<16x1xf32>
    %97 = arith.divf %95, %96 : vector<16x1xf32>
    %98 = vector.broadcast %97 : vector<16x1xf32> to vector<16x32xf32>
    %99 = arith.subf %92, %98 : vector<16x32xf32>
    %100 = arith.mulf %99, %99 : vector<16x32xf32>
    %cst_43 = arith.constant dense<0.000000e+00> : vector<16xf32>
    %101 = vector.multi_reduction <add>, %100, %cst_43 [1] : vector<16x32xf32> to vector<16xf32>
    %102 = vector.shape_cast %101 : vector<16xf32> to vector<16x1xf32>
    %cst_44 = arith.constant 3.200000e+01 : f32
    %103 = vector.broadcast %cst_44 : f32 to vector<16x1xf32>
    %104 = arith.divf %102, %103 : vector<16x1xf32>
    %cst_45 = arith.constant 9.99999974E-6 : f32
    %105 = vector.broadcast %cst_45 : f32 to vector<16x1xf32>
    %106 = arith.addf %104, %105 : vector<16x1xf32>
    %107 = math.rsqrt %106 : vector<16x1xf32>
    %108 = vector.broadcast %107 : vector<16x1xf32> to vector<16x32xf32>
    %109 = arith.mulf %99, %108 : vector<16x32xf32>
    %110 = vector.broadcast %93 : vector<1x32xf32> to vector<16x32xf32>
    %111 = arith.mulf %109, %110 : vector<16x32xf32>
    %c31_i32_46 = arith.constant 31 : i32
    %112 = tpu.dynamic_rotate %111 by %c31_i32_46 dim 1 : vector<16x32xf32>, i32 -> vector<16x32xf32>
    %c1_i32_47 = arith.constant 1 : i32
    %113 = tpu.dynamic_rotate %111 by %c1_i32_47 dim 1 : vector<16x32xf32>, i32 -> vector<16x32xf32>
    %cst_48 = arith.constant 0.000000e+00 : f32
    %114 = vector.broadcast %cst_48 : f32 to vector<16x32xf32>
    %115 = arith.subf %114, %112 : vector<16x32xf32>
    %116 = arith.select %22, %115, %113 : vector<16x32xi1>, vector<16x32xf32>
    %117 = arith.mulf %111, %2 : vector<16x32xf32>
    %118 = arith.mulf %116, %3 : vector<16x32xf32>
    %119 = arith.addf %117, %118 : vector<16x32xf32>
    %cst_49 = arith.constant 0.176776692 : f32
    %120 = vector.broadcast %cst_49 : f32 to vector<16x32xf32>
    %121 = arith.mulf %119, %120 : vector<16x32xf32>
    %c3 = arith.constant 3 : index
    %c0_50 = arith.constant 0 : index
    %c0_51 = arith.constant 0 : index
    %122 = vector.load %arg2[%c3, %c0_50, %c0_51] : memref<8x128x32xf32, #tpu.memory_space<vmem>>, vector<1x128x32xf32>
    %123 = vector.shape_cast %122 : vector<1x128x32xf32> to vector<128x32xf32>
    %124 = arith.truncf %123 : vector<128x32xf32> to vector<128x32xbf16>
    %cst_52 = arith.constant dense<0.000000e+00> : vector<16x32xf32>
    %125 = tpu.matmul %1, %124, %cst_52 {dimension_numbers = #tpu.dot_dimension_numbers<[1], [0], [0], [1], [0, 0, 1, 1], [], []>} : vector<16x128xbf16>, vector<128x32xbf16>, vector<16x32xf32> -> vector<16x32xf32>
    %c3_53 = arith.constant 3 : index
    %c0_54 = arith.constant 0 : index
    %126 = vector.load %arg4[%c3_53, %c0_54] : memref<4x32xf32, #tpu.memory_space<vmem>>, vector<1x32xf32>
    %cst_55 = arith.constant dense<0.000000e+00> : vector<16xf32>
    %127 = vector.multi_reduction <add>, %125, %cst_55 [1] : vector<16x32xf32> to vector<16xf32>
    %128 = vector.shape_cast %127 : vector<16xf32> to vector<16x1xf32>
    %cst_56 = arith.constant 3.200000e+01 : f32
    %129 = vector.broadcast %cst_56 : f32 to vector<16x1xf32>
    %130 = arith.divf %128, %129 : vector<16x1xf32>
    %131 = vector.broadcast %130 : vector<16x1xf32> to vector<16x32xf32>
    %132 = arith.subf %125, %131 : vector<16x32xf32>
    %133 = arith.mulf %132, %132 : vector<16x32xf32>
    %cst_57 = arith.constant dense<0.000000e+00> : vector<16xf32>
    %134 = vector.multi_reduction <add>, %133, %cst_57 [1] : vector<16x32xf32> to vector<16xf32>
    %135 = vector.shape_cast %134 : vector<16xf32> to vector<16x1xf32>
    %cst_58 = arith.constant 3.200000e+01 : f32
    %136 = vector.broadcast %cst_58 : f32 to vector<16x1xf32>
    %137 = arith.divf %135, %136 : vector<16x1xf32>
    %cst_59 = arith.constant 9.99999974E-6 : f32
    %138 = vector.broadcast %cst_59 : f32 to vector<16x1xf32>
    %139 = arith.addf %137, %138 : vector<16x1xf32>
    %140 = math.rsqrt %139 : vector<16x1xf32>
    %141 = vector.broadcast %140 : vector<16x1xf32> to vector<16x32xf32>
    %142 = arith.mulf %132, %141 : vector<16x32xf32>
    %143 = vector.broadcast %126 : vector<1x32xf32> to vector<16x32xf32>
    %144 = arith.mulf %142, %143 : vector<16x32xf32>
    %c31_i32_60 = arith.constant 31 : i32
    %145 = tpu.dynamic_rotate %144 by %c31_i32_60 dim 1 : vector<16x32xf32>, i32 -> vector<16x32xf32>
    %c1_i32_61 = arith.constant 1 : i32
    %146 = tpu.dynamic_rotate %144 by %c1_i32_61 dim 1 : vector<16x32xf32>, i32 -> vector<16x32xf32>
    %cst_62 = arith.constant 0.000000e+00 : f32
    %147 = vector.broadcast %cst_62 : f32 to vector<16x32xf32>
    %148 = arith.subf %147, %145 : vector<16x32xf32>
    %149 = arith.select %22, %148, %146 : vector<16x32xi1>, vector<16x32xf32>
    %150 = arith.mulf %144, %2 : vector<16x32xf32>
    %151 = arith.mulf %149, %3 : vector<16x32xf32>
    %152 = arith.addf %150, %151 : vector<16x32xf32>
    %cst_63 = arith.constant 0.176776692 : f32
    %153 = vector.broadcast %cst_63 : f32 to vector<16x32xf32>
    %154 = arith.mulf %152, %153 : vector<16x32xf32>
    %c4 = arith.constant 4 : index
    %c0_64 = arith.constant 0 : index
    %c0_65 = arith.constant 0 : index
    %155 = vector.load %arg2[%c4, %c0_64, %c0_65] : memref<8x128x32xf32, #tpu.memory_space<vmem>>, vector<1x128x32xf32>
    %156 = vector.shape_cast %155 : vector<1x128x32xf32> to vector<128x32xf32>
    %157 = arith.truncf %156 : vector<128x32xf32> to vector<128x32xbf16>
    %cst_66 = arith.constant dense<0.000000e+00> : vector<16x32xf32>
    %158 = tpu.matmul %1, %157, %cst_66 {dimension_numbers = #tpu.dot_dimension_numbers<[1], [0], [0], [1], [0, 0, 1, 1], [], []>} : vector<16x128xbf16>, vector<128x32xbf16>, vector<16x32xf32> -> vector<16x32xf32>
    %c0_67 = arith.constant 0 : index
    %c0_68 = arith.constant 0 : index
    %159 = vector.load %arg5[%c0_67, %c0_68] : memref<2x32xf32, #tpu.memory_space<vmem>>, vector<1x32xf32>
    %cst_69 = arith.constant dense<0.000000e+00> : vector<16xf32>
    %160 = vector.multi_reduction <add>, %158, %cst_69 [1] : vector<16x32xf32> to vector<16xf32>
    %161 = vector.shape_cast %160 : vector<16xf32> to vector<16x1xf32>
    %cst_70 = arith.constant 3.200000e+01 : f32
    %162 = vector.broadcast %cst_70 : f32 to vector<16x1xf32>
    %163 = arith.divf %161, %162 : vector<16x1xf32>
    %164 = vector.broadcast %163 : vector<16x1xf32> to vector<16x32xf32>
    %165 = arith.subf %158, %164 : vector<16x32xf32>
    %166 = arith.mulf %165, %165 : vector<16x32xf32>
    %cst_71 = arith.constant dense<0.000000e+00> : vector<16xf32>
    %167 = vector.multi_reduction <add>, %166, %cst_71 [1] : vector<16x32xf32> to vector<16xf32>
    %168 = vector.shape_cast %167 : vector<16xf32> to vector<16x1xf32>
    %cst_72 = arith.constant 3.200000e+01 : f32
    %169 = vector.broadcast %cst_72 : f32 to vector<16x1xf32>
    %170 = arith.divf %168, %169 : vector<16x1xf32>
    %cst_73 = arith.constant 9.99999974E-6 : f32
    %171 = vector.broadcast %cst_73 : f32 to vector<16x1xf32>
    %172 = arith.addf %170, %171 : vector<16x1xf32>
    %173 = math.rsqrt %172 : vector<16x1xf32>
    %174 = vector.broadcast %173 : vector<16x1xf32> to vector<16x32xf32>
    %175 = arith.mulf %165, %174 : vector<16x32xf32>
    %176 = vector.broadcast %159 : vector<1x32xf32> to vector<16x32xf32>
    %177 = arith.mulf %175, %176 : vector<16x32xf32>
    %c31_i32_74 = arith.constant 31 : i32
    %178 = tpu.dynamic_rotate %177 by %c31_i32_74 dim 1 : vector<16x32xf32>, i32 -> vector<16x32xf32>
    %c1_i32_75 = arith.constant 1 : i32
    %179 = tpu.dynamic_rotate %177 by %c1_i32_75 dim 1 : vector<16x32xf32>, i32 -> vector<16x32xf32>
    %cst_76 = arith.constant 0.000000e+00 : f32
    %180 = vector.broadcast %cst_76 : f32 to vector<16x32xf32>
    %181 = arith.subf %180, %178 : vector<16x32xf32>
    %182 = arith.select %22, %181, %179 : vector<16x32xi1>, vector<16x32xf32>
    %183 = arith.mulf %177, %2 : vector<16x32xf32>
    %184 = arith.mulf %182, %3 : vector<16x32xf32>
    %185 = arith.addf %183, %184 : vector<16x32xf32>
    %c5 = arith.constant 5 : index
    %c0_77 = arith.constant 0 : index
    %c0_78 = arith.constant 0 : index
    %186 = vector.load %arg2[%c5, %c0_77, %c0_78] : memref<8x128x32xf32, #tpu.memory_space<vmem>>, vector<1x128x32xf32>
    %187 = vector.shape_cast %186 : vector<1x128x32xf32> to vector<128x32xf32>
    %188 = arith.truncf %187 : vector<128x32xf32> to vector<128x32xbf16>
    %cst_79 = arith.constant dense<0.000000e+00> : vector<16x32xf32>
    %189 = tpu.matmul %1, %188, %cst_79 {dimension_numbers = #tpu.dot_dimension_numbers<[1], [0], [0], [1], [0, 0, 1, 1], [], []>} : vector<16x128xbf16>, vector<128x32xbf16>, vector<16x32xf32> -> vector<16x32xf32>
    %c1_80 = arith.constant 1 : index
    %c0_81 = arith.constant 0 : index
    %190 = vector.load %arg5[%c1_80, %c0_81] : memref<2x32xf32, #tpu.memory_space<vmem>>, vector<1x32xf32>
    %cst_82 = arith.constant dense<0.000000e+00> : vector<16xf32>
    %191 = vector.multi_reduction <add>, %189, %cst_82 [1] : vector<16x32xf32> to vector<16xf32>
    %192 = vector.shape_cast %191 : vector<16xf32> to vector<16x1xf32>
    %cst_83 = arith.constant 3.200000e+01 : f32
    %193 = vector.broadcast %cst_83 : f32 to vector<16x1xf32>
    %194 = arith.divf %192, %193 : vector<16x1xf32>
    %195 = vector.broadcast %194 : vector<16x1xf32> to vector<16x32xf32>
    %196 = arith.subf %189, %195 : vector<16x32xf32>
    %197 = arith.mulf %196, %196 : vector<16x32xf32>
    %cst_84 = arith.constant dense<0.000000e+00> : vector<16xf32>
    %198 = vector.multi_reduction <add>, %197, %cst_84 [1] : vector<16x32xf32> to vector<16xf32>
    %199 = vector.shape_cast %198 : vector<16xf32> to vector<16x1xf32>
    %cst_85 = arith.constant 3.200000e+01 : f32
    %200 = vector.broadcast %cst_85 : f32 to vector<16x1xf32>
    %201 = arith.divf %199, %200 : vector<16x1xf32>
    %cst_86 = arith.constant 9.99999974E-6 : f32
    %202 = vector.broadcast %cst_86 : f32 to vector<16x1xf32>
    %203 = arith.addf %201, %202 : vector<16x1xf32>
    %204 = math.rsqrt %203 : vector<16x1xf32>
    %205 = vector.broadcast %204 : vector<16x1xf32> to vector<16x32xf32>
    %206 = arith.mulf %196, %205 : vector<16x32xf32>
    %207 = vector.broadcast %190 : vector<1x32xf32> to vector<16x32xf32>
    %208 = arith.mulf %206, %207 : vector<16x32xf32>
    %c31_i32_87 = arith.constant 31 : i32
    %209 = tpu.dynamic_rotate %208 by %c31_i32_87 dim 1 : vector<16x32xf32>, i32 -> vector<16x32xf32>
    %c1_i32_88 = arith.constant 1 : i32
    %210 = tpu.dynamic_rotate %208 by %c1_i32_88 dim 1 : vector<16x32xf32>, i32 -> vector<16x32xf32>
    %cst_89 = arith.constant 0.000000e+00 : f32
    %211 = vector.broadcast %cst_89 : f32 to vector<16x32xf32>
    %212 = arith.subf %211, %209 : vector<16x32xf32>
    %213 = arith.select %22, %212, %210 : vector<16x32xi1>, vector<16x32xf32>
    %214 = arith.mulf %208, %2 : vector<16x32xf32>
    %215 = arith.mulf %213, %3 : vector<16x32xf32>
    %216 = arith.addf %214, %215 : vector<16x32xf32>
    %c6 = arith.constant 6 : index
    %c0_90 = arith.constant 0 : index
    %c0_91 = arith.constant 0 : index
    %217 = vector.load %arg2[%c6, %c0_90, %c0_91] : memref<8x128x32xf32, #tpu.memory_space<vmem>>, vector<1x128x32xf32>
    %218 = vector.shape_cast %217 : vector<1x128x32xf32> to vector<128x32xf32>
    %219 = arith.truncf %218 : vector<128x32xf32> to vector<128x32xbf16>
    %cst_92 = arith.constant dense<0.000000e+00> : vector<16x32xf32>
    %220 = tpu.matmul %1, %219, %cst_92 {dimension_numbers = #tpu.dot_dimension_numbers<[1], [0], [0], [1], [0, 0, 1, 1], [], []>} : vector<16x128xbf16>, vector<128x32xbf16>, vector<16x32xf32> -> vector<16x32xf32>
    %c7 = arith.constant 7 : index
    %c0_93 = arith.constant 0 : index
    %c0_94 = arith.constant 0 : index
    %221 = vector.load %arg2[%c7, %c0_93, %c0_94] : memref<8x128x32xf32, #tpu.memory_space<vmem>>, vector<1x128x32xf32>
    %222 = vector.shape_cast %221 : vector<1x128x32xf32> to vector<128x32xf32>
    %223 = arith.truncf %222 : vector<128x32xf32> to vector<128x32xbf16>
    %cst_95 = arith.constant dense<0.000000e+00> : vector<16x32xf32>
    %224 = tpu.matmul %1, %223, %cst_95 {dimension_numbers = #tpu.dot_dimension_numbers<[1], [0], [0], [1], [0, 0, 1, 1], [], []>} : vector<16x128xbf16>, vector<128x32xbf16>, vector<16x32xf32> -> vector<16x32xf32>
    %c0_96 = arith.constant 0 : index
    %c0_97 = arith.constant 0 : index
    %225 = vector.load %arg9[%c0_96, %c0_97] : memref<64x64xf32, #tpu.memory_space<vmem>>, vector<64x64xf32>
    %c0_98 = arith.constant 0 : index
    %c0_99 = arith.constant 0 : index
    %226 = vector.load %arg12[%c0_98, %c0_99] : memref<64x64xf32, #tpu.memory_space<vmem>>, vector<64x64xf32>
    tpu.vector_store %arg12[%c0_98, %c0_99], %225 {strides = array<i32>} : memref<64x64xf32, #tpu.memory_space<vmem>>, vector<64x64xf32>,
    %c0_100 = arith.constant 0 : index
    %c0_101 = arith.constant 0 : index
    %227 = vector.load %arg10[%c0_100, %c0_101] : memref<64x64xf32, #tpu.memory_space<vmem>>, vector<64x64xf32>
    %c0_102 = arith.constant 0 : index
    %c0_103 = arith.constant 0 : index
    %228 = vector.load %arg13[%c0_102, %c0_103] : memref<64x64xf32, #tpu.memory_space<vmem>>, vector<64x64xf32>
    tpu.vector_store %arg13[%c0_102, %c0_103], %227 {strides = array<i32>} : memref<64x64xf32, #tpu.memory_space<vmem>>, vector<64x64xf32>,
    %229 = tpu.concatenate %185, %216 in 1 : vector<16x32xf32>, vector<16x32xf32> -> vector<16x64xf32>
    %230 = tpu.concatenate %220, %224 in 1 : vector<16x32xf32>, vector<16x32xf32> -> vector<16x64xf32>
    %c0_104 = arith.constant 0 : index
    %231 = memref.load %arg8[%c0_104] : memref<16xi32, #tpu.memory_space<smem>>
    %232 = vector.extract_strided_slice %229 {offsets = [0, 0], sizes = [1, 64], strides = [1, 1]} : vector<16x64xf32> to vector<1x64xf32>
    %233 = arith.index_cast %231 : i32 to index
    %c0_105 = arith.constant 0 : index
    %234 = vector.load %arg12[%233, %c0_105] : memref<64x64xf32, #tpu.memory_space<vmem>>, vector<1x64xf32>
    tpu.vector_store %arg12[%233, %c0_105], %232 {strides = array<i32>} : memref<64x64xf32, #tpu.memory_space<vmem>>, vector<1x64xf32>,
    %235 = vector.extract_strided_slice %230 {offsets = [0, 0], sizes = [1, 64], strides = [1, 1]} : vector<16x64xf32> to vector<1x64xf32>
    %236 = arith.index_cast %231 : i32 to index
    %c0_106 = arith.constant 0 : index
    %237 = vector.load %arg13[%236, %c0_106] : memref<64x64xf32, #tpu.memory_space<vmem>>, vector<1x64xf32>
    tpu.vector_store %arg13[%236, %c0_106], %235 {strides = array<i32>} : memref<64x64xf32, #tpu.memory_space<vmem>>, vector<1x64xf32>,
    %c1_107 = arith.constant 1 : index
    %238 = memref.load %arg8[%c1_107] : memref<16xi32, #tpu.memory_space<smem>>
    %239 = vector.extract_strided_slice %229 {offsets = [1, 0], sizes = [1, 64], strides = [1, 1]} : vector<16x64xf32> to vector<1x64xf32>
    %240 = arith.index_cast %238 : i32 to index
    %c0_108 = arith.constant 0 : index
    %241 = vector.load %arg12[%240, %c0_108] : memref<64x64xf32, #tpu.memory_space<vmem>>, vector<1x64xf32>
    tpu.vector_store %arg12[%240, %c0_108], %239 {strides = array<i32>} : memref<64x64xf32, #tpu.memory_space<vmem>>, vector<1x64xf32>,
    %242 = vector.extract_strided_slice %230 {offsets = [1, 0], sizes = [1, 64], strides = [1, 1]} : vector<16x64xf32> to vector<1x64xf32>
    %243 = arith.index_cast %238 : i32 to index
    %c0_109 = arith.constant 0 : index
    %244 = vector.load %arg13[%243, %c0_109] : memref<64x64xf32, #tpu.memory_space<vmem>>, vector<1x64xf32>
    tpu.vector_store %arg13[%243, %c0_109], %242 {strides = array<i32>} : memref<64x64xf32, #tpu.memory_space<vmem>>, vector<1x64xf32>,
    %c2_110 = arith.constant 2 : index
    %245 = memref.load %arg8[%c2_110] : memref<16xi32, #tpu.memory_space<smem>>
    %246 = vector.extract_strided_slice %229 {offsets = [2, 0], sizes = [1, 64], strides = [1, 1]} : vector<16x64xf32> to vector<1x64xf32>
    %247 = arith.index_cast %245 : i32 to index
    %c0_111 = arith.constant 0 : index
    %248 = vector.load %arg12[%247, %c0_111] : memref<64x64xf32, #tpu.memory_space<vmem>>, vector<1x64xf32>
    tpu.vector_store %arg12[%247, %c0_111], %246 {strides = array<i32>} : memref<64x64xf32, #tpu.memory_space<vmem>>, vector<1x64xf32>,
    %249 = vector.extract_strided_slice %230 {offsets = [2, 0], sizes = [1, 64], strides = [1, 1]} : vector<16x64xf32> to vector<1x64xf32>
    %250 = arith.index_cast %245 : i32 to index
    %c0_112 = arith.constant 0 : index
    %251 = vector.load %arg13[%250, %c0_112] : memref<64x64xf32, #tpu.memory_space<vmem>>, vector<1x64xf32>
    tpu.vector_store %arg13[%250, %c0_112], %249 {strides = array<i32>} : memref<64x64xf32, #tpu.memory_space<vmem>>, vector<1x64xf32>,
    %c3_113 = arith.constant 3 : index
    %252 = memref.load %arg8[%c3_113] : memref<16xi32, #tpu.memory_space<smem>>
    %253 = vector.extract_strided_slice %229 {offsets = [3, 0], sizes = [1, 64], strides = [1, 1]} : vector<16x64xf32> to vector<1x64xf32>
    %254 = arith.index_cast %252 : i32 to index
    %c0_114 = arith.constant 0 : index
    %255 = vector.load %arg12[%254, %c0_114] : memref<64x64xf32, #tpu.memory_space<vmem>>, vector<1x64xf32>
    tpu.vector_store %arg12[%254, %c0_114], %253 {strides = array<i32>} : memref<64x64xf32, #tpu.memory_space<vmem>>, vector<1x64xf32>,
    %256 = vector.extract_strided_slice %230 {offsets = [3, 0], sizes = [1, 64], strides = [1, 1]} : vector<16x64xf32> to vector<1x64xf32>
    %257 = arith.index_cast %252 : i32 to index
    %c0_115 = arith.constant 0 : index
    %258 = vector.load %arg13[%257, %c0_115] : memref<64x64xf32, #tpu.memory_space<vmem>>, vector<1x64xf32>
    tpu.vector_store %arg13[%257, %c0_115], %256 {strides = array<i32>} : memref<64x64xf32, #tpu.memory_space<vmem>>, vector<1x64xf32>,
    %c4_116 = arith.constant 4 : index
    %259 = memref.load %arg8[%c4_116] : memref<16xi32, #tpu.memory_space<smem>>
    %260 = vector.extract_strided_slice %229 {offsets = [4, 0], sizes = [1, 64], strides = [1, 1]} : vector<16x64xf32> to vector<1x64xf32>
    %261 = arith.index_cast %259 : i32 to index
    %c0_117 = arith.constant 0 : index
    %262 = vector.load %arg12[%261, %c0_117] : memref<64x64xf32, #tpu.memory_space<vmem>>, vector<1x64xf32>
    tpu.vector_store %arg12[%261, %c0_117], %260 {strides = array<i32>} : memref<64x64xf32, #tpu.memory_space<vmem>>, vector<1x64xf32>,
    %263 = vector.extract_strided_slice %230 {offsets = [4, 0], sizes = [1, 64], strides = [1, 1]} : vector<16x64xf32> to vector<1x64xf32>
    %264 = arith.index_cast %259 : i32 to index
    %c0_118 = arith.constant 0 : index
    %265 = vector.load %arg13[%264, %c0_118] : memref<64x64xf32, #tpu.memory_space<vmem>>, vector<1x64xf32>
    tpu.vector_store %arg13[%264, %c0_118], %263 {strides = array<i32>} : memref<64x64xf32, #tpu.memory_space<vmem>>, vector<1x64xf32>,
    %c5_119 = arith.constant 5 : index
    %266 = memref.load %arg8[%c5_119] : memref<16xi32, #tpu.memory_space<smem>>
    %267 = vector.extract_strided_slice %229 {offsets = [5, 0], sizes = [1, 64], strides = [1, 1]} : vector<16x64xf32> to vector<1x64xf32>
    %268 = arith.index_cast %266 : i32 to index
    %c0_120 = arith.constant 0 : index
    %269 = vector.load %arg12[%268, %c0_120] : memref<64x64xf32, #tpu.memory_space<vmem>>, vector<1x64xf32>
    tpu.vector_store %arg12[%268, %c0_120], %267 {strides = array<i32>} : memref<64x64xf32, #tpu.memory_space<vmem>>, vector<1x64xf32>,
    %270 = vector.extract_strided_slice %230 {offsets = [5, 0], sizes = [1, 64], strides = [1, 1]} : vector<16x64xf32> to vector<1x64xf32>
    %271 = arith.index_cast %266 : i32 to index
    %c0_121 = arith.constant 0 : index
    %272 = vector.load %arg13[%271, %c0_121] : memref<64x64xf32, #tpu.memory_space<vmem>>, vector<1x64xf32>
    tpu.vector_store %arg13[%271, %c0_121], %270 {strides = array<i32>} : memref<64x64xf32, #tpu.memory_space<vmem>>, vector<1x64xf32>,
    %c6_122 = arith.constant 6 : index
    %273 = memref.load %arg8[%c6_122] : memref<16xi32, #tpu.memory_space<smem>>
    %274 = vector.extract_strided_slice %229 {offsets = [6, 0], sizes = [1, 64], strides = [1, 1]} : vector<16x64xf32> to vector<1x64xf32>
    %275 = arith.index_cast %273 : i32 to index
    %c0_123 = arith.constant 0 : index
    %276 = vector.load %arg12[%275, %c0_123] : memref<64x64xf32, #tpu.memory_space<vmem>>, vector<1x64xf32>
    tpu.vector_store %arg12[%275, %c0_123], %274 {strides = array<i32>} : memref<64x64xf32, #tpu.memory_space<vmem>>, vector<1x64xf32>,
    %277 = vector.extract_strided_slice %230 {offsets = [6, 0], sizes = [1, 64], strides = [1, 1]} : vector<16x64xf32> to vector<1x64xf32>
    %278 = arith.index_cast %273 : i32 to index
    %c0_124 = arith.constant 0 : index
    %279 = vector.load %arg13[%278, %c0_124] : memref<64x64xf32, #tpu.memory_space<vmem>>, vector<1x64xf32>
    tpu.vector_store %arg13[%278, %c0_124], %277 {strides = array<i32>} : memref<64x64xf32, #tpu.memory_space<vmem>>, vector<1x64xf32>,
    %c7_125 = arith.constant 7 : index
    %280 = memref.load %arg8[%c7_125] : memref<16xi32, #tpu.memory_space<smem>>
    %281 = vector.extract_strided_slice %229 {offsets = [7, 0], sizes = [1, 64], strides = [1, 1]} : vector<16x64xf32> to vector<1x64xf32>
    %282 = arith.index_cast %280 : i32 to index
    %c0_126 = arith.constant 0 : index
    %283 = vector.load %arg12[%282, %c0_126] : memref<64x64xf32, #tpu.memory_space<vmem>>, vector<1x64xf32>
    tpu.vector_store %arg12[%282, %c0_126], %281 {strides = array<i32>} : memref<64x64xf32, #tpu.memory_space<vmem>>, vector<1x64xf32>,
    %284 = vector.extract_strided_slice %230 {offsets = [7, 0], sizes = [1, 64], strides = [1, 1]} : vector<16x64xf32> to vector<1x64xf32>
    %285 = arith.index_cast %280 : i32 to index
    %c0_127 = arith.constant 0 : index
    %286 = vector.load %arg13[%285, %c0_127] : memref<64x64xf32, #tpu.memory_space<vmem>>, vector<1x64xf32>
    tpu.vector_store %arg13[%285, %c0_127], %284 {strides = array<i32>} : memref<64x64xf32, #tpu.memory_space<vmem>>, vector<1x64xf32>,
    %c8 = arith.constant 8 : index
    %287 = memref.load %arg8[%c8] : memref<16xi32, #tpu.memory_space<smem>>
    %288 = vector.extract_strided_slice %229 {offsets = [8, 0], sizes = [1, 64], strides = [1, 1]} : vector<16x64xf32> to vector<1x64xf32>
    %289 = arith.index_cast %287 : i32 to index
    %c0_128 = arith.constant 0 : index
    %290 = vector.load %arg12[%289, %c0_128] : memref<64x64xf32, #tpu.memory_space<vmem>>, vector<1x64xf32>
    tpu.vector_store %arg12[%289, %c0_128], %288 {strides = array<i32>} : memref<64x64xf32, #tpu.memory_space<vmem>>, vector<1x64xf32>,
    %291 = vector.extract_strided_slice %230 {offsets = [8, 0], sizes = [1, 64], strides = [1, 1]} : vector<16x64xf32> to vector<1x64xf32>
    %292 = arith.index_cast %287 : i32 to index
    %c0_129 = arith.constant 0 : index
    %293 = vector.load %arg13[%292, %c0_129] : memref<64x64xf32, #tpu.memory_space<vmem>>, vector<1x64xf32>
    tpu.vector_store %arg13[%292, %c0_129], %291 {strides = array<i32>} : memref<64x64xf32, #tpu.memory_space<vmem>>, vector<1x64xf32>,
    %c9 = arith.constant 9 : index
    %294 = memref.load %arg8[%c9] : memref<16xi32, #tpu.memory_space<smem>>
    %295 = vector.extract_strided_slice %229 {offsets = [9, 0], sizes = [1, 64], strides = [1, 1]} : vector<16x64xf32> to vector<1x64xf32>
    %296 = arith.index_cast %294 : i32 to index
    %c0_130 = arith.constant 0 : index
    %297 = vector.load %arg12[%296, %c0_130] : memref<64x64xf32, #tpu.memory_space<vmem>>, vector<1x64xf32>
    tpu.vector_store %arg12[%296, %c0_130], %295 {strides = array<i32>} : memref<64x64xf32, #tpu.memory_space<vmem>>, vector<1x64xf32>,
    %298 = vector.extract_strided_slice %230 {offsets = [9, 0], sizes = [1, 64], strides = [1, 1]} : vector<16x64xf32> to vector<1x64xf32>
    %299 = arith.index_cast %294 : i32 to index
    %c0_131 = arith.constant 0 : index
    %300 = vector.load %arg13[%299, %c0_131] : memref<64x64xf32, #tpu.memory_space<vmem>>, vector<1x64xf32>
    tpu.vector_store %arg13[%299, %c0_131], %298 {strides = array<i32>} : memref<64x64xf32, #tpu.memory_space<vmem>>, vector<1x64xf32>,
    %c10 = arith.constant 10 : index
    %301 = memref.load %arg8[%c10] : memref<16xi32, #tpu.memory_space<smem>>
    %302 = vector.extract_strided_slice %229 {offsets = [10, 0], sizes = [1, 64], strides = [1, 1]} : vector<16x64xf32> to vector<1x64xf32>
    %303 = arith.index_cast %301 : i32 to index
    %c0_132 = arith.constant 0 : index
    %304 = vector.load %arg12[%303, %c0_132] : memref<64x64xf32, #tpu.memory_space<vmem>>, vector<1x64xf32>
    tpu.vector_store %arg12[%303, %c0_132], %302 {strides = array<i32>} : memref<64x64xf32, #tpu.memory_space<vmem>>, vector<1x64xf32>,
    %305 = vector.extract_strided_slice %230 {offsets = [10, 0], sizes = [1, 64], strides = [1, 1]} : vector<16x64xf32> to vector<1x64xf32>
    %306 = arith.index_cast %301 : i32 to index
    %c0_133 = arith.constant 0 : index
    %307 = vector.load %arg13[%306, %c0_133] : memref<64x64xf32, #tpu.memory_space<vmem>>, vector<1x64xf32>
    tpu.vector_store %arg13[%306, %c0_133], %305 {strides = array<i32>} : memref<64x64xf32, #tpu.memory_space<vmem>>, vector<1x64xf32>,
    %c11 = arith.constant 11 : index
    %308 = memref.load %arg8[%c11] : memref<16xi32, #tpu.memory_space<smem>>
    %309 = vector.extract_strided_slice %229 {offsets = [11, 0], sizes = [1, 64], strides = [1, 1]} : vector<16x64xf32> to vector<1x64xf32>
    %310 = arith.index_cast %308 : i32 to index
    %c0_134 = arith.constant 0 : index
    %311 = vector.load %arg12[%310, %c0_134] : memref<64x64xf32, #tpu.memory_space<vmem>>, vector<1x64xf32>
    tpu.vector_store %arg12[%310, %c0_134], %309 {strides = array<i32>} : memref<64x64xf32, #tpu.memory_space<vmem>>, vector<1x64xf32>,
    %312 = vector.extract_strided_slice %230 {offsets = [11, 0], sizes = [1, 64], strides = [1, 1]} : vector<16x64xf32> to vector<1x64xf32>
    %313 = arith.index_cast %308 : i32 to index
    %c0_135 = arith.constant 0 : index
    %314 = vector.load %arg13[%313, %c0_135] : memref<64x64xf32, #tpu.memory_space<vmem>>, vector<1x64xf32>
    tpu.vector_store %arg13[%313, %c0_135], %312 {strides = array<i32>} : memref<64x64xf32, #tpu.memory_space<vmem>>, vector<1x64xf32>,
    %c12 = arith.constant 12 : index
    %315 = memref.load %arg8[%c12] : memref<16xi32, #tpu.memory_space<smem>>
    %316 = vector.extract_strided_slice %229 {offsets = [12, 0], sizes = [1, 64], strides = [1, 1]} : vector<16x64xf32> to vector<1x64xf32>
    %317 = arith.index_cast %315 : i32 to index
    %c0_136 = arith.constant 0 : index
    %318 = vector.load %arg12[%317, %c0_136] : memref<64x64xf32, #tpu.memory_space<vmem>>, vector<1x64xf32>
    tpu.vector_store %arg12[%317, %c0_136], %316 {strides = array<i32>} : memref<64x64xf32, #tpu.memory_space<vmem>>, vector<1x64xf32>,
    %319 = vector.extract_strided_slice %230 {offsets = [12, 0], sizes = [1, 64], strides = [1, 1]} : vector<16x64xf32> to vector<1x64xf32>
    %320 = arith.index_cast %315 : i32 to index
    %c0_137 = arith.constant 0 : index
    %321 = vector.load %arg13[%320, %c0_137] : memref<64x64xf32, #tpu.memory_space<vmem>>, vector<1x64xf32>
    tpu.vector_store %arg13[%320, %c0_137], %319 {strides = array<i32>} : memref<64x64xf32, #tpu.memory_space<vmem>>, vector<1x64xf32>,
    %c13 = arith.constant 13 : index
    %322 = memref.load %arg8[%c13] : memref<16xi32, #tpu.memory_space<smem>>
    %323 = vector.extract_strided_slice %229 {offsets = [13, 0], sizes = [1, 64], strides = [1, 1]} : vector<16x64xf32> to vector<1x64xf32>
    %324 = arith.index_cast %322 : i32 to index
    %c0_138 = arith.constant 0 : index
    %325 = vector.load %arg12[%324, %c0_138] : memref<64x64xf32, #tpu.memory_space<vmem>>, vector<1x64xf32>
    tpu.vector_store %arg12[%324, %c0_138], %323 {strides = array<i32>} : memref<64x64xf32, #tpu.memory_space<vmem>>, vector<1x64xf32>,
    %326 = vector.extract_strided_slice %230 {offsets = [13, 0], sizes = [1, 64], strides = [1, 1]} : vector<16x64xf32> to vector<1x64xf32>
    %327 = arith.index_cast %322 : i32 to index
    %c0_139 = arith.constant 0 : index
    %328 = vector.load %arg13[%327, %c0_139] : memref<64x64xf32, #tpu.memory_space<vmem>>, vector<1x64xf32>
    tpu.vector_store %arg13[%327, %c0_139], %326 {strides = array<i32>} : memref<64x64xf32, #tpu.memory_space<vmem>>, vector<1x64xf32>,
    %c14 = arith.constant 14 : index
    %329 = memref.load %arg8[%c14] : memref<16xi32, #tpu.memory_space<smem>>
    %330 = vector.extract_strided_slice %229 {offsets = [14, 0], sizes = [1, 64], strides = [1, 1]} : vector<16x64xf32> to vector<1x64xf32>
    %331 = arith.index_cast %329 : i32 to index
    %c0_140 = arith.constant 0 : index
    %332 = vector.load %arg12[%331, %c0_140] : memref<64x64xf32, #tpu.memory_space<vmem>>, vector<1x64xf32>
    tpu.vector_store %arg12[%331, %c0_140], %330 {strides = array<i32>} : memref<64x64xf32, #tpu.memory_space<vmem>>, vector<1x64xf32>,
    %333 = vector.extract_strided_slice %230 {offsets = [14, 0], sizes = [1, 64], strides = [1, 1]} : vector<16x64xf32> to vector<1x64xf32>
    %334 = arith.index_cast %329 : i32 to index
    %c0_141 = arith.constant 0 : index
    %335 = vector.load %arg13[%334, %c0_141] : memref<64x64xf32, #tpu.memory_space<vmem>>, vector<1x64xf32>
    tpu.vector_store %arg13[%334, %c0_141], %333 {strides = array<i32>} : memref<64x64xf32, #tpu.memory_space<vmem>>, vector<1x64xf32>,
    %c15 = arith.constant 15 : index
    %336 = memref.load %arg8[%c15] : memref<16xi32, #tpu.memory_space<smem>>
    %337 = vector.extract_strided_slice %229 {offsets = [15, 0], sizes = [1, 64], strides = [1, 1]} : vector<16x64xf32> to vector<1x64xf32>
    %338 = arith.index_cast %336 : i32 to index
    %c0_142 = arith.constant 0 : index
    %339 = vector.load %arg12[%338, %c0_142] : memref<64x64xf32, #tpu.memory_space<vmem>>, vector<1x64xf32>
    tpu.vector_store %arg12[%338, %c0_142], %337 {strides = array<i32>} : memref<64x64xf32, #tpu.memory_space<vmem>>, vector<1x64xf32>,
    %340 = vector.extract_strided_slice %230 {offsets = [15, 0], sizes = [1, 64], strides = [1, 1]} : vector<16x64xf32> to vector<1x64xf32>
    %341 = arith.index_cast %336 : i32 to index
    %c0_143 = arith.constant 0 : index
    %342 = vector.load %arg13[%341, %c0_143] : memref<64x64xf32, #tpu.memory_space<vmem>>, vector<1x64xf32>
    tpu.vector_store %arg13[%341, %c0_143], %340 {strides = array<i32>} : memref<64x64xf32, #tpu.memory_space<vmem>>, vector<1x64xf32>,
    %343 = tpu.iota {dimensions = array<i32: 0>} : vector<16x16xi32>
    %344 = tpu.iota {dimensions = array<i32: 1>} : vector<16x16xi32>
    %345 = arith.cmpi sle, %344, %343 : vector<16x16xi32>
    %cst_144 = arith.constant 0.000000e+00 : f32
    %346 = vector.broadcast %cst_144 : f32 to vector<16x128xf32>
    %347 = arith.truncf %55 : vector<16x32xf32> to vector<16x32xbf16>
    %348 = arith.truncf %185 : vector<16x32xf32> to vector<16x32xbf16>
    %349 = arith.truncf %220 : vector<16x32xf32> to vector<16x32xbf16>
    %cst_145 = arith.constant dense<0.000000e+00> : vector<16x16xf32>
    %350 = tpu.matmul %347, %348, %cst_145 {dimension_numbers = #tpu.dot_dimension_numbers<[1], [1], [0], [0], [0, 0, 1, 0], [], []>} : vector<16x32xbf16>, vector<16x32xbf16>, vector<16x16xf32> -> vector<16x16xf32>
    %cst_146 = arith.constant -1.000000e+30 : f32
    %351 = vector.broadcast %cst_146 : f32 to vector<16x16xf32>
    %352 = arith.select %345, %350, %351 : vector<16x16xi1>, vector<16x16xf32>
    %cst_147 = arith.constant dense<0xFF800000> : vector<16xf32>
    %353 = vector.multi_reduction <maximumf>, %352, %cst_147 [1] : vector<16x16xf32> to vector<16xf32>
    %354 = vector.shape_cast %353 : vector<16xf32> to vector<16x1xf32>
    %355 = vector.broadcast %354 : vector<16x1xf32> to vector<16x16xf32>
    %356 = arith.subf %352, %355 : vector<16x16xf32>
    %357 = math.exp %356 : vector<16x16xf32>
    %cst_148 = arith.constant dense<0.000000e+00> : vector<16xf32>
    %358 = vector.multi_reduction <add>, %357, %cst_148 [1] : vector<16x16xf32> to vector<16xf32>
    %359 = vector.shape_cast %358 : vector<16xf32> to vector<16x1xf32>
    %360 = arith.truncf %357 : vector<16x16xf32> to vector<16x16xbf16>
    %cst_149 = arith.constant dense<0.000000e+00> : vector<16x32xf32>
    %361 = tpu.matmul %360, %349, %cst_149 {dimension_numbers = #tpu.dot_dimension_numbers<[1], [0], [0], [1], [0, 0, 1, 1], [], []>} : vector<16x16xbf16>, vector<16x32xbf16>, vector<16x32xf32> -> vector<16x32xf32>
    %362 = tpu.reciprocal %359 {approx = true} : vector<16x1xf32> -> vector<16x1xf32>
    %363 = vector.broadcast %362 : vector<16x1xf32> to vector<16x32xf32>
    %364 = arith.mulf %361, %363 : vector<16x32xf32>
    %c0_150 = arith.constant 0 : index
    %c0_151 = arith.constant 0 : index
    %365 = vector.load %arg3[%c0_150, %c0_151] : memref<128x128xf32, #tpu.memory_space<vmem>>, vector<32x128xf32>
    %366 = arith.truncf %365 : vector<32x128xf32> to vector<32x128xbf16>
    %367 = arith.truncf %364 : vector<16x32xf32> to vector<16x32xbf16>
    %cst_152 = arith.constant dense<0.000000e+00> : vector<16x128xf32>
    %368 = tpu.matmul %367, %366, %cst_152 {dimension_numbers = #tpu.dot_dimension_numbers<[1], [0], [0], [1], [0, 0, 1, 1], [], []>} : vector<16x32xbf16>, vector<32x128xbf16>, vector<16x128xf32> -> vector<16x128xf32>
    %369 = arith.addf %346, %368 : vector<16x128xf32>
    %370 = arith.truncf %88 : vector<16x32xf32> to vector<16x32xbf16>
    %371 = arith.truncf %185 : vector<16x32xf32> to vector<16x32xbf16>
    %372 = arith.truncf %220 : vector<16x32xf32> to vector<16x32xbf16>
    %cst_153 = arith.constant dense<0.000000e+00> : vector<16x16xf32>
    %373 = tpu.matmul %370, %371, %cst_153 {dimension_numbers = #tpu.dot_dimension_numbers<[1], [1], [0], [0], [0, 0, 1, 0], [], []>} : vector<16x32xbf16>, vector<16x32xbf16>, vector<16x16xf32> -> vector<16x16xf32>
    %cst_154 = arith.constant -1.000000e+30 : f32
    %374 = vector.broadcast %cst_154 : f32 to vector<16x16xf32>
    %375 = arith.select %345, %373, %374 : vector<16x16xi1>, vector<16x16xf32>
    %cst_155 = arith.constant dense<0xFF800000> : vector<16xf32>
    %376 = vector.multi_reduction <maximumf>, %375, %cst_155 [1] : vector<16x16xf32> to vector<16xf32>
    %377 = vector.shape_cast %376 : vector<16xf32> to vector<16x1xf32>
    %378 = vector.broadcast %377 : vector<16x1xf32> to vector<16x16xf32>
    %379 = arith.subf %375, %378 : vector<16x16xf32>
    %380 = math.exp %379 : vector<16x16xf32>
    %cst_156 = arith.constant dense<0.000000e+00> : vector<16xf32>
    %381 = vector.multi_reduction <add>, %380, %cst_156 [1] : vector<16x16xf32> to vector<16xf32>
    %382 = vector.shape_cast %381 : vector<16xf32> to vector<16x1xf32>
    %383 = arith.truncf %380 : vector<16x16xf32> to vector<16x16xbf16>
    %cst_157 = arith.constant dense<0.000000e+00> : vector<16x32xf32>
    %384 = tpu.matmul %383, %372, %cst_157 {dimension_numbers = #tpu.dot_dimension_numbers<[1], [0], [0], [1], [0, 0, 1, 1], [], []>} : vector<16x16xbf16>, vector<16x32xbf16>, vector<16x32xf32> -> vector<16x32xf32>
    %385 = tpu.reciprocal %382 {approx = true} : vector<16x1xf32> -> vector<16x1xf32>
    %386 = vector.broadcast %385 : vector<16x1xf32> to vector<16x32xf32>
    %387 = arith.mulf %384, %386 : vector<16x32xf32>
    %c32 = arith.constant 32 : index
    %c0_158 = arith.constant 0 : index
    %388 = vector.load %arg3[%c32, %c0_158] : memref<128x128xf32, #tpu.memory_space<vmem>>, vector<32x128xf32>
    %389 = arith.truncf %388 : vector<32x128xf32> to vector<32x128xbf16>
    %390 = arith.truncf %387 : vector<16x32xf32> to vector<16x32xbf16>
    %cst_159 = arith.constant dense<0.000000e+00> : vector<16x128xf32>
    %391 = tpu.matmul %390, %389, %cst_159 {dimension_numbers = #tpu.dot_dimension_numbers<[1], [0], [0], [1], [0, 0, 1, 1], [], []>} : vector<16x32xbf16>, vector<32x128xbf16>, vector<16x128xf32> -> vector<16x128xf32>
    %392 = arith.addf %369, %391 : vector<16x128xf32>
    %393 = arith.truncf %121 : vector<16x32xf32> to vector<16x32xbf16>
    %394 = arith.truncf %216 : vector<16x32xf32> to vector<16x32xbf16>
    %395 = arith.truncf %224 : vector<16x32xf32> to vector<16x32xbf16>
    %cst_160 = arith.constant dense<0.000000e+00> : vector<16x16xf32>
    %396 = tpu.matmul %393, %394, %cst_160 {dimension_numbers = #tpu.dot_dimension_numbers<[1], [1], [0], [0], [0, 0, 1, 0], [], []>} : vector<16x32xbf16>, vector<16x32xbf16>, vector<16x16xf32> -> vector<16x16xf32>
    %cst_161 = arith.constant -1.000000e+30 : f32
    %397 = vector.broadcast %cst_161 : f32 to vector<16x16xf32>
    %398 = arith.select %345, %396, %397 : vector<16x16xi1>, vector<16x16xf32>
    %cst_162 = arith.constant dense<0xFF800000> : vector<16xf32>
    %399 = vector.multi_reduction <maximumf>, %398, %cst_162 [1] : vector<16x16xf32> to vector<16xf32>
    %400 = vector.shape_cast %399 : vector<16xf32> to vector<16x1xf32>
    %401 = vector.broadcast %400 : vector<16x1xf32> to vector<16x16xf32>
    %402 = arith.subf %398, %401 : vector<16x16xf32>
    %403 = math.exp %402 : vector<16x16xf32>
    %cst_163 = arith.constant dense<0.000000e+00> : vector<16xf32>
    %404 = vector.multi_reduction <add>, %403, %cst_163 [1] : vector<16x16xf32> to vector<16xf32>
    %405 = vector.shape_cast %404 : vector<16xf32> to vector<16x1xf32>
    %406 = arith.truncf %403 : vector<16x16xf32> to vector<16x16xbf16>
    %cst_164 = arith.constant dense<0.000000e+00> : vector<16x32xf32>
    %407 = tpu.matmul %406, %395, %cst_164 {dimension_numbers = #tpu.dot_dimension_numbers<[1], [0], [0], [1], [0, 0, 1, 1], [], []>} : vector<16x16xbf16>, vector<16x32xbf16>, vector<16x32xf32> -> vector<16x32xf32>
    %408 = tpu.reciprocal %405 {approx = true} : vector<16x1xf32> -> vector<16x1xf32>
    %409 = vector.broadcast %408 : vector<16x1xf32> to vector<16x32xf32>
    %410 = arith.mulf %407, %409 : vector<16x32xf32>
    %c64 = arith.constant 64 : index
    %c0_165 = arith.constant 0 : index
    %411 = vector.load %arg3[%c64, %c0_165] : memref<128x128xf32, #tpu.memory_space<vmem>>, vector<32x128xf32>
    %412 = arith.truncf %411 : vector<32x128xf32> to vector<32x128xbf16>
    %413 = arith.truncf %410 : vector<16x32xf32> to vector<16x32xbf16>
    %cst_166 = arith.constant dense<0.000000e+00> : vector<16x128xf32>
    %414 = tpu.matmul %413, %412, %cst_166 {dimension_numbers = #tpu.dot_dimension_numbers<[1], [0], [0], [1], [0, 0, 1, 1], [], []>} : vector<16x32xbf16>, vector<32x128xbf16>, vector<16x128xf32> -> vector<16x128xf32>
    %415 = arith.addf %392, %414 : vector<16x128xf32>
    %416 = arith.truncf %154 : vector<16x32xf32> to vector<16x32xbf16>
    %417 = arith.truncf %216 : vector<16x32xf32> to vector<16x32xbf16>
    %418 = arith.truncf %224 : vector<16x32xf32> to vector<16x32xbf16>
    %cst_167 = arith.constant dense<0.000000e+00> : vector<16x16xf32>
    %419 = tpu.matmul %416, %417, %cst_167 {dimension_numbers = #tpu.dot_dimension_numbers<[1], [1], [0], [0], [0, 0, 1, 0], [], []>} : vector<16x32xbf16>, vector<16x32xbf16>, vector<16x16xf32> -> vector<16x16xf32>
    %cst_168 = arith.constant -1.000000e+30 : f32
    %420 = vector.broadcast %cst_168 : f32 to vector<16x16xf32>
    %421 = arith.select %345, %419, %420 : vector<16x16xi1>, vector<16x16xf32>
    %cst_169 = arith.constant dense<0xFF800000> : vector<16xf32>
    %422 = vector.multi_reduction <maximumf>, %421, %cst_169 [1] : vector<16x16xf32> to vector<16xf32>
    %423 = vector.shape_cast %422 : vector<16xf32> to vector<16x1xf32>
    %424 = vector.broadcast %423 : vector<16x1xf32> to vector<16x16xf32>
    %425 = arith.subf %421, %424 : vector<16x16xf32>
    %426 = math.exp %425 : vector<16x16xf32>
    %cst_170 = arith.constant dense<0.000000e+00> : vector<16xf32>
    %427 = vector.multi_reduction <add>, %426, %cst_170 [1] : vector<16x16xf32> to vector<16xf32>
    %428 = vector.shape_cast %427 : vector<16xf32> to vector<16x1xf32>
    %429 = arith.truncf %426 : vector<16x16xf32> to vector<16x16xbf16>
    %cst_171 = arith.constant dense<0.000000e+00> : vector<16x32xf32>
    %430 = tpu.matmul %429, %418, %cst_171 {dimension_numbers = #tpu.dot_dimension_numbers<[1], [0], [0], [1], [0, 0, 1, 1], [], []>} : vector<16x16xbf16>, vector<16x32xbf16>, vector<16x32xf32> -> vector<16x32xf32>
    %431 = tpu.reciprocal %428 {approx = true} : vector<16x1xf32> -> vector<16x1xf32>
    %432 = vector.broadcast %431 : vector<16x1xf32> to vector<16x32xf32>
    %433 = arith.mulf %430, %432 : vector<16x32xf32>
    %c96 = arith.constant 96 : index
    %c0_172 = arith.constant 0 : index
    %434 = vector.load %arg3[%c96, %c0_172] : memref<128x128xf32, #tpu.memory_space<vmem>>, vector<32x128xf32>
    %435 = arith.truncf %434 : vector<32x128xf32> to vector<32x128xbf16>
    %436 = arith.truncf %433 : vector<16x32xf32> to vector<16x32xbf16>
    %cst_173 = arith.constant dense<0.000000e+00> : vector<16x128xf32>
    %437 = tpu.matmul %436, %435, %cst_173 {dimension_numbers = #tpu.dot_dimension_numbers<[1], [0], [0], [1], [0, 0, 1, 1], [], []>} : vector<16x32xbf16>, vector<32x128xbf16>, vector<16x128xf32> -> vector<16x128xf32>
    %438 = arith.addf %415, %437 : vector<16x128xf32>
    %c0_174 = arith.constant 0 : index
    %c0_175 = arith.constant 0 : index
    %439 = vector.load %arg11[%c0_174, %c0_175] : memref<16x128xf32, #tpu.memory_space<vmem>>, vector<16x128xf32>
    tpu.vector_store %arg11[%c0_174, %c0_175], %438 {strides = array<i32>} : memref<16x128xf32, #tpu.memory_space<vmem>>, vector<16x128xf32>,
    return
  }
  func.func @transform_0(%arg0: i32) -> (i32, i32) {
    %c0_i32 = arith.constant 0 : i32
    %c0_i32_0 = arith.constant 0 : i32
    %c0_i32_1 = arith.constant 0 : i32
    return %c0_i32, %c0_i32_0 : i32, i32
  }
  func.func @transform_1(%arg0: i32) -> (i32, i32, i32) {
    %c0_i32 = arith.constant 0 : i32
    %c0_i32_0 = arith.constant 0 : i32
    %c0_i32_1 = arith.constant 0 : i32
    %c0_i32_2 = arith.constant 0 : i32
    return %c0_i32, %c0_i32_0, %c0_i32_1 : i32, i32, i32
  }
  func.func @transform_2(%arg0: i32) -> (i32, i32) {
    %c0_i32 = arith.constant 0 : i32
    %c0_i32_0 = arith.constant 0 : i32
    %c0_i32_1 = arith.constant 0 : i32
    return %c0_i32, %c0_i32_0 : i32, i32
  }
  func.func @transform_3(%arg0: i32) -> (i32, i32) {
    %c0_i32 = arith.constant 0 : i32
    %c0_i32_0 = arith.constant 0 : i32
    %c0_i32_1 = arith.constant 0 : i32
    return %c0_i32, %c0_i32_0 : i32, i32
  }
  func.func @transform_4(%arg0: i32) -> (i32, i32) {
    %c0_i32 = arith.constant 0 : i32
    %c0_i32_0 = arith.constant 0 : i32
    %c0_i32_1 = arith.constant 0 : i32
    return %c0_i32, %c0_i32_0 : i32, i32
  }
  func.func @transform_5(%arg0: i32) -> (i32, i32) {
    %c0_i32 = arith.constant 0 : i32
    %c0_i32_0 = arith.constant 0 : i32
    %c0_i32_1 = arith.constant 0 : i32
    return %c0_i32, %c0_i32_0 : i32, i32
  }
  func.func @transform_6(%arg0: i32) -> (i32, i32) {
    %c0_i32 = arith.constant 0 : i32
    %c0_i32_0 = arith.constant 0 : i32
    %c0_i32_1 = arith.constant 0 : i32
    return %c0_i32, %c0_i32_0 : i32, i32
  }
  func.func @transform_7(%arg0: i32) -> i32 {
    %c0_i32 = arith.constant 0 : i32
    %c0_i32_0 = arith.constant 0 : i32
    return %c0_i32 : i32
  }
  func.func @transform_8(%arg0: i32) -> (i32, i32) {
    %c0_i32 = arith.constant 0 : i32
    %c0_i32_0 = arith.constant 0 : i32
    %c0_i32_1 = arith.constant 0 : i32
    return %c0_i32, %c0_i32_0 : i32, i32
  }
  func.func @transform_9(%arg0: i32) -> (i32, i32) {
    %c0_i32 = arith.constant 0 : i32
    %c0_i32_0 = arith.constant 0 : i32
    %c0_i32_1 = arith.constant 0 : i32
    return %c0_i32, %c0_i32_0 : i32, i32
  }
  func.func @transform_10(%arg0: i32) -> (i32, i32) {
    %c0_i32 = arith.constant 0 : i32
    %c0_i32_0 = arith.constant 0 : i32
    %c0_i32_1 = arith.constant 0 : i32
    return %c0_i32, %c0_i32_0 : i32, i32
  }
  func.func @transform_11(%arg0: i32) -> (i32, i32) {
    %c0_i32 = arith.constant 0 : i32
    %c0_i32_0 = arith.constant 0 : i32
    %c0_i32_1 = arith.constant 0 : i32
    return %c0_i32, %c0_i32_0 : i32, i32
  }
  func.func @transform_12(%arg0: i32) -> (i32, i32) {
    %c0_i32 = arith.constant 0 : i32
    %c0_i32_0 = arith.constant 0 : i32
    %c0_i32_1 = arith.constant 0 : i32
    return %c0_i32, %c0_i32_0 : i32, i32
  }
}

</mosaic_0001>

<bundles_post_ra>
// kernel: flash_cohere_attention.1
= control target key start
LH: loop header
LB: loop body
LE: loop exit
PB: predicated region body
PF: predicated region fallthrough
CT: control target
= control target key end

     0   :  { %18 = vsyncpa [#allocation4], 0  ;;  %s3956_s0 = inlined_call_operand.vmem [shape: f32[16,128], index: 0, kind: input, shape index: {}]   ;;  %s3957_s1 = inlined_call_operand.vmem [shape: f32[8,128,32], index: 1, kind: input, shape index: {}]   ;;  %s3958_s2 = inlined_call_operand.vmem [shape: f32[128,128], index: 2, kind: input, shape index: {}]   ;;  %s3959_s3 = inlined_call_operand.vmem [shape: f32[4,32], index: 3, kind: input, shape index: {}]   ;;  %s3960_s4 = inlined_call_operand.vmem [shape: f32[2,32], index: 4, kind: input, shape index: {}]   ;;  %s3961_s5 = inlined_call_operand.vmem [shape: f32[16,32], index: 5, kind: input, shape index: {}]   ;;  %s3962_s6 = inlined_call_operand.vmem [shape: f32[16,32], index: 6, kind: input, shape index: {}]   ;;  %s3963_s7 = inlined_call_operand.vmem [shape: s32[16], index: 7, kind: input, shape index: {}]   ;;  %s3964_s8 = inlined_call_operand.vmem [shape: f32[64,64], index: 8, kind: input, shape index: {}, may-alias: {8,11}]   ;;  %s3965_s9 = inlined_call_operand.vmem [shape: f32[64,64], index: 9, kind: input, shape index: {}, may-alias: {9,12}]   ;;  %s3966_s10 = inlined_call_operand.hbm [shape: f32[16,128], index: 10, kind: output, shape index: {0}]   ;;  %s3967_s11 = inlined_call_operand.vmem [shape: f32[64,64], index: 11, kind: output, shape index: {1}, may-alias: {8,11}]   ;;  %s3968_s12 = inlined_call_operand.vmem [shape: f32[64,64], index: 12, kind: output, shape index: {2}, may-alias: {9,12}]  }
   0x1   :  { %19 = vsyncpa [#allocation3], 0  ;;  %s40_s23 = sshll.u32 %s3963_s7, 4  ;;  %s41_s23 = int_to_ptr.vmem [resolvable:$true] %s40_s23 }
   0x2   :  { %s2469_s24 = scalar_lea.vmem %s41_s23, 16  ;;  %p2474_p1 = scmp.lt.s32.totalorder %s41_s23, %s41_s23 }
   0x3   :  { %p2470_p0 = scmp.ne.s32.totalorder %s41_s23, %s2469_s24  ;;  %p2475_p2 = scmp.lt.s32.totalorder %s2469_s24, %s2469_s24 }
   0x5   :  { %p2476_p3 = por %p2475_p2, %p2474_p1 }
   0x7   :  { %p2477_p4 = pnand %p2476_p3, %p2470_p0 }
   0x9   :  { %2480 = shalt.err (!%p2477_p4)
}
   0xa   :  { %s2505_s25 = smov [#allocation2]  }
   0xb   :  { %43 = dma.vmem_to_smem %s41_s23, 16, %s2505_s25, [#allocation4]  }
   0xc   :  { %2501 = dma.done.wait [#allocation4], 16  }
   0xd   :  { %2502 = vsyncadd [#allocation4], 4294967280 }
   0xe   :  { %51 = sfence }
   0xf   :  { %v89_v0 = vld [vmem:[%s3957_s1 + $0x70] sm:$0xff]  ;;  %v90_v1 = vld [vmem:[%s3957_s1 + $0x78] sm:$0xff]  ;;  %v87_v2 = vld [vmem:[%s3957_s1 + $0x60] sm:$0xff]  ;;  %v2506_v3 = vmov 0.0   ;;  %vm2507_vm0 = vmmov 0   ;;  %vm141_vm1 = vcmask 261120  }
  0x10   :  { %2164 = vmatprep.subr.bf16.mxu0 %v2506_v3  ;;  %v98_v4 = vpack.c.bf16 %v90_v1, %v89_v0  ;;  %2184 = vmatprep.subr.bf16.mxu1 %v2506_v3  ;;  %v88_v5 = vld [vmem:[%s3957_s1 + $0x68] sm:$0xff]  ;;  %v1934_v6 = vld [vmem:[%s3957_s1 + $0xf0] sm:$0xff]  ;;  %v1935_v7 = vld [vmem:[%s3957_s1 + $0xf8] sm:$0xff]  ;;  %s2508_s27 = smov 32   ;;  %vm175_vm2 = vcmask 1047808   ;;  %s2509_s25 = smov 97  }
  0x11   :  { %v240_v8 = vpack.c.bf16 %v1935_v7, %v1934_v6  ;;  %v1932_v9 = vld [vmem:[%s3957_s1 + $0xe0] sm:$0xff]  ;;  %2180 = vmatprep.mubr.msk.bf16.mxu0 %vm2507_vm0, %v2506_v3  ;;  %2200 = vmatprep.mubr.msk.bf16.mxu1 %vm2507_vm0, %v2506_v3  ;;  %v97_v10 = vpack.c.bf16 %v88_v5, %v87_v2  ;;  %v1933_v11 = vld [vmem:[%s3957_s1 + $0xe8] sm:$0xff]  ;;  %v85_v12 = vld [vmem:[%s3957_s1 + $0x50] sm:$0xff]  ;;  %s2510_s26 = smov 127   ;;  %vm1237_vm5 = vcmask 130048   ;;  %vm1047_vm7 = vcmask 523264  }
  0x12   :  { %2165 = vmatpush3.bf16.msra.mxu0 %v98_v4  ;;  %v86_v13 = vld [vmem:[%s3957_s1 + $0x58] sm:$0xff]  ;;  %v239_v14 = vpack.c.bf16 %v1933_v11, %v1932_v9  ;;  %v1930_v15 = vld [vmem:[%s3957_s1 + $0xd0] sm:$0xff]  ;;  %v83_v18 = vld [vmem:[%s3957_s1 + $0x40] sm:$0xff]  ;;  %s3741_s14 = sld [smem:[#allocation2 + $0x1]]  ;;  %vm1094_vm8 = vcmask 516096   ;;  %vm1100_vm9 = vcmask 517121  }
  0x13   :  { %2166 = vmatprep.subr.bf16.mxu0 %v2506_v3  ;;  %2185 = vmatpush3.bf16.msra.mxu1 %v240_v8  ;;  %v1931_v16 = vld [vmem:[%s3957_s1 + $0xd8] sm:$0xff]  ;;  %v96_v17 = vpack.c.bf16 %v86_v13, %v85_v12  ;;  %v84_v19 = vld [vmem:[%s3957_s1 + $0x48] sm:$0xff]  ;;  %v1928_v21 = vld [vmem:[%s3957_s1 + $0xc0] sm:$0xff]  ;;  %s3743_s15 = sld [smem:[#allocation2 + $0x2]]  ;;  %vm1106_vm10 = vcmask 518146   ;;  %vm1112_vm11 = vcmask 519171  }
  0x14   :  { %2186 = vmatprep.subr.bf16.mxu1 %v2506_v3  ;;  %v238_v20 = vpack.c.bf16 %v1931_v16, %v1930_v15  ;;  %v1929_v22 = vld [vmem:[%s3957_s1 + $0xc8] sm:$0xff]  ;;  %v95_v23 = vpack.c.bf16 %v84_v19, %v83_v18  ;;  %v81_v24 = vld [vmem:[%s3957_s1 + $0x30] sm:$0xff]  ;;  %v82_v25 = vld [vmem:[%s3957_s1 + $0x38] sm:$0xff]  ;;  %s3745_s16 = sld [smem:[#allocation2 + $0x3]]  ;;  %vm1118_vm12 = vcmask 520196   ;;  %vm1124_vm13 = vcmask 521221  }
  0x15   :  { %v237_v26 = vpack.c.bf16 %v1929_v22, %v1928_v21  ;;  %v1926_v27 = vld [vmem:[%s3957_s1 + $0xb0] sm:$0xff]  ;;  %v1927_v28 = vld [vmem:[%s3957_s1 + $0xb8] sm:$0xff]  ;;  %v94_v29 = vpack.c.bf16 %v82_v25, %v81_v24  ;;  %v79_v30 = vld [vmem:[%s3957_s1 + $0x20] sm:$0xff]  ;;  %s3747_s17 = sld [smem:[#allocation2 + $0x4]]  ;;  %vm1130_vm14 = vcmask 522246   ;;  %vm1136_vm15 = vcmask 523271  }
  0x16   :  { %2167 = vmatpush3.bf16.msra.mxu0 %v97_v10  ;;  %v80_v31 = vld [vmem:[%s3957_s1 + $0x28] sm:$0xff]  ;;  %v236_v32 = vpack.c.bf16 %v1927_v28, %v1926_v27  ;;  %v1924_v33 = vld [vmem:[%s3957_s1 + $0xa0] sm:$0xff]  ;;  %v77_v36 = vld [vmem:[%s3957_s1 + $0x10] sm:$0xff]  ;;  %s3749_s18 = sld [smem:[#allocation2 + $0x5]] }
  0x17   :  { %2168 = vmatprep.subr.bf16.mxu0 %v2506_v3  ;;  %2187 = vmatpush3.bf16.msra.mxu1 %v239_v14  ;;  %v1925_v34 = vld [vmem:[%s3957_s1 + $0xa8] sm:$0xff]  ;;  %v93_v35 = vpack.c.bf16 %v80_v31, %v79_v30  ;;  %v78_v37 = vld [vmem:[%s3957_s1 + $0x18] sm:$0xff]  ;;  %v1922_v39 = vld [vmem:[%s3957_s1 + $0x90] sm:$0xff]  ;;  %s3765_s23 = sld [smem:[#allocation2 + $0x6]] }
  0x18   :  { %2188 = vmatprep.subr.bf16.mxu1 %v2506_v3  ;;  %v235_v38 = vpack.c.bf16 %v1925_v34, %v1924_v33  ;;  %v1923_v40 = vld [vmem:[%s3957_s1 + $0x98] sm:$0xff]  ;;  %v92_v41 = vpack.c.bf16 %v78_v37, %v77_v36  ;;  %v75_v42 = vld [vmem:[%s3957_s1] sm:$0xff]  ;;  %v76_v43 = vld [vmem:[%s3957_s1 + $0x8] sm:$0xff]  ;;  %s3771_s29 = sld [smem:[#allocation2 + $0x7]]  ;;  %s1102_s21 = scalar_lea.vmem %s3968_s12, %s3741_s14 }
  0x19   :  { %v234_v44 = vpack.c.bf16 %v1923_v40, %v1922_v39  ;;  %v1920_v45 = vld [vmem:[%s3957_s1 + $0x80] sm:$0xff]  ;;  %v1921_v46 = vld [vmem:[%s3957_s1 + $0x88] sm:$0xff]  ;;  %v91_v47 = vpack.c.bf16 %v76_v43, %v75_v42  ;;  %v1951_v51 = vld [vmem:[%s3957_s1 + $0x170] sm:$0xff] }
  0x1a   :  { %2169 = vmatpush3.bf16.msra.mxu0 %v96_v17  ;;  %v53_v48 = vld [vmem:[%s3956_s0] sm:$0xff]  ;;  %v54_v49 = vld [vmem:[%s3956_s0 + $0x8] sm:$0xff]  ;;  %v233_v50 = vpack.c.bf16 %v1921_v46, %v1920_v45  ;;  %v1952_v52 = vld [vmem:[%s3957_s1 + $0x178] sm:$0xff]  ;;  %s1111_s28 = scalar_lea.vmem %s3967_s11, %s3745_s16  ;;  %s3793_s0 = sld [smem:[#allocation2 + $0xa]] }
  0x1b   :  { %2170 = vmatprep.subr.bf16.mxu0 %v2506_v3  ;;  %2189 = vmatpush3.bf16.msra.mxu1 %v238_v20  ;;  %v2710_v53 = vpack.c.bf16 %v54_v49, %v53_v48  ;;  %v379_v54 = vpack.c.bf16 %v1952_v52, %v1951_v51  ;;  %v1949_v55 = vld [vmem:[%s3957_s1 + $0x160] sm:$0xff]  ;;  %v1950_v56 = vld [vmem:[%s3957_s1 + $0x168] sm:$0xff]  ;;  %v1947_v58 = vld [vmem:[%s3957_s1 + $0x150] sm:$0xff]  ;;  %s1117_s13 = scalar_lea.vmem %s3967_s11, %s3747_s17 }
  0x1c   :  { %2190 = vmatprep.subr.bf16.mxu1 %v2506_v3  ;;  %v378_v57 = vpack.c.bf16 %v1950_v56, %v1949_v55  ;;  %v1948_v59 = vld [vmem:[%s3957_s1 + $0x158] sm:$0xff]  ;;  %v1945_v61 = vld [vmem:[%s3957_s1 + $0x140] sm:$0xff]  ;;  %v1946_v62 = vld [vmem:[%s3957_s1 + $0x148] sm:$0xff]  ;;  %s1123_s30 = scalar_lea.vmem %s3967_s11, %s3749_s18  ;;  %s1126_s24 = scalar_lea.vmem %s3968_s12, %s3749_s18 }
  0x1d   :  { %v377_v60 = vpack.c.bf16 %v1948_v59, %v1947_v58  ;;  %v376_v63 = vpack.c.bf16 %v1946_v62, %v1945_v61  ;;  %v1943_v0 = vld [vmem:[%s3957_s1 + $0x130] sm:$0xff]  ;;  %v1944_v1 = vld [vmem:[%s3957_s1 + $0x138] sm:$0xff]  ;;  %v1941_v4 = vld [vmem:[%s3957_s1 + $0x120] sm:$0xff]  ;;  %s1129_s22 = scalar_lea.vmem %s3967_s11, %s3765_s23 }
  0x1e   :  { %2171 = vmatpush3.bf16.msra.mxu0 %v95_v23  ;;  %v375_v2 = vpack.c.bf16 %v1944_v1, %v1943_v0  ;;  %v1942_v5 = vld [vmem:[%s3957_s1 + $0x128] sm:$0xff]  ;;  %v1939_v7 = vld [vmem:[%s3957_s1 + $0x110] sm:$0xff]  ;;  %v1940_v8 = vld [vmem:[%s3957_s1 + $0x118] sm:$0xff] }
  0x1f   :  { %2172 = vmatprep.subr.bf16.mxu0 %v2506_v3  ;;  %2191 = vmatpush3.bf16.msra.mxu1 %v237_v26  ;;  %v374_v6 = vpack.c.bf16 %v1942_v5, %v1941_v4  ;;  %v373_v9 = vpack.c.bf16 %v1940_v8, %v1939_v7  ;;  %v1937_v10 = vld [vmem:[%s3957_s1 + $0x100] sm:$0xff]  ;;  %v1938_v11 = vld [vmem:[%s3957_s1 + $0x108] sm:$0xff]  ;;  %v1985_v13 = vld [vmem:[%s3957_s1 + $0x270] sm:$0xff] }
  0x20   :  { %2192 = vmatprep.subr.bf16.mxu1 %v2506_v3  ;;  %v372_v12 = vpack.c.bf16 %v1938_v11, %v1937_v10  ;;  %v1986_v14 = vld [vmem:[%s3957_s1 + $0x278] sm:$0xff]  ;;  %v1983_v16 = vld [vmem:[%s3957_s1 + $0x260] sm:$0xff]  ;;  %v1984_v17 = vld [vmem:[%s3957_s1 + $0x268] sm:$0xff]  ;;  %s1151_s19 = scalar_lea.vmem %s3967_s11, %s3793_s0 }
  0x21   :  { %v657_v15 = vpack.c.bf16 %v1986_v14, %v1985_v13  ;;  %v656_v18 = vpack.c.bf16 %v1984_v17, %v1983_v16  ;;  %v1981_v19 = vld [vmem:[%s3957_s1 + $0x250] sm:$0xff]  ;;  %v1982_v20 = vld [vmem:[%s3957_s1 + $0x258] sm:$0xff]  ;;  %v1979_v22 = vld [vmem:[%s3957_s1 + $0x240] sm:$0xff] }
  0x22   :  { %2173 = vmatpush3.bf16.msra.mxu0 %v94_v29  ;;  %v655_v21 = vpack.c.bf16 %v1982_v20, %v1981_v19  ;;  %v1980_v23 = vld [vmem:[%s3957_s1 + $0x248] sm:$0xff]  ;;  %v1977_v25 = vld [vmem:[%s3957_s1 + $0x230] sm:$0xff]  ;;  %v1978_v26 = vld [vmem:[%s3957_s1 + $0x238] sm:$0xff] }
  0x23   :  { %2174 = vmatprep.subr.bf16.mxu0 %v2506_v3  ;;  %2193 = vmatpush3.bf16.msra.mxu1 %v236_v32  ;;  %v654_v24 = vpack.c.bf16 %v1980_v23, %v1979_v22  ;;  %v653_v27 = vpack.c.bf16 %v1978_v26, %v1977_v25  ;;  %v1975_v28 = vld [vmem:[%s3957_s1 + $0x220] sm:$0xff]  ;;  %v1976_v29 = vld [vmem:[%s3957_s1 + $0x228] sm:$0xff]  ;;  %v1973_v31 = vld [vmem:[%s3957_s1 + $0x210] sm:$0xff] }
  0x24   :  { %2194 = vmatprep.subr.bf16.mxu1 %v2506_v3  ;;  %v652_v30 = vpack.c.bf16 %v1976_v29, %v1975_v28  ;;  %v1974_v32 = vld [vmem:[%s3957_s1 + $0x218] sm:$0xff]  ;;  %v1971_v34 = vld [vmem:[%s3957_s1 + $0x200] sm:$0xff] }
  0x25   :  { %v651_v33 = vpack.c.bf16 %v1974_v32, %v1973_v31  ;;  %v1969_v28 = vld [vmem:[%s3957_s1 + $0x1f8] sm:$0xff]  ;;  %v1966_v29 = vld [vmem:[%s3957_s1 + $0x1e0] sm:$0xff]  ;;  %v1967_v31 = vld [vmem:[%s3957_s1 + $0x1e8] sm:$0xff] }
  0x26   :  { %2175 = vmatpush3.bf16.msra.mxu0 %v93_v35  ;;  %v1972_v35 = vld [vmem:[%s3957_s1 + $0x208] sm:$0xff]  ;;  %v517_v32 = vpack.c.bf16 %v1967_v31, %v1966_v29 }
  0x27   :  { %2176 = vmatprep.subr.bf16.mxu0 %v2506_v3  ;;  %2195 = vmatpush3.bf16.msra.mxu1 %v235_v38  ;;  %v650_v36 = vpack.c.bf16 %v1972_v35, %v1971_v34  ;;  %v1965_v34 = vld [vmem:[%s3957_s1 + $0x1d8] sm:$0xff] }
  0x28   :  { %2196 = vmatprep.subr.bf16.mxu1 %v2506_v3 }
  0x2a   :  { %2177 = vmatpush3.bf16.msra.mxu0 %v92_v41 }
  0x2b   :  { %2178 = vmatprep.subr.bf16.mxu0 %v2506_v3  ;;  %2197 = vmatpush3.bf16.msra.mxu1 %v234_v44 }
  0x2c   :  { %2198 = vmatprep.subr.bf16.mxu1 %v2506_v3 }
  0x2e   :  { %2179 = vmatpush3.bf16.msra.mxu0 %v91_v47 }
  0x2f   :  { %2204 = vmatprep.subr.bf16.mxu0 %v2506_v3  ;;  %2199 = vmatpush3.bf16.msra.mxu1 %v233_v50 }
  0x30   :  { %2224 = vmatprep.subr.bf16.mxu1 %v2506_v3 }
  0x31   :  { %2181 = vmatmul.mubr.bf16.vlgmr.msra.gmra.mxu0 %v2710_v53 }
  0x32   :  { %2205 = vmatpush3.bf16.msra.mxu0 %v379_v54  ;;  %2201 = vmatmul.mubr.bf16.vlgmr.msra.gmra.mxu1 %v2710_v53 }
  0x33   :  { %2206 = vmatprep.subr.bf16.mxu0 %v2506_v3  ;;  %2220 = vmatprep.mubr.msk.bf16.mxu0 %vm2507_vm0, %v2506_v3 }
  0x34   :  { %2240 = vmatprep.mubr.msk.bf16.mxu1 %vm2507_vm0, %v2506_v3 }
  0x36   :  { %2207 = vmatpush3.bf16.msra.mxu0 %v378_v57 }
  0x37   :  { %2208 = vmatprep.subr.bf16.mxu0 %v2506_v3 }
  0x3a   :  { %2209 = vmatpush3.bf16.msra.mxu0 %v377_v60 }
  0x3b   :  { %2210 = vmatprep.subr.bf16.mxu0 %v2506_v3 }
  0x3e   :  { %2211 = vmatpush3.bf16.msra.mxu0 %v376_v63 }
  0x3f   :  { %2212 = vmatprep.subr.bf16.mxu0 %v2506_v3 }
  0x42   :  { %2213 = vmatpush3.bf16.msra.mxu0 %v375_v2 }
  0x43   :  { %2214 = vmatprep.subr.bf16.mxu0 %v2506_v3 }
  0x46   :  { %2215 = vmatpush3.bf16.msra.mxu0 %v374_v6 }
  0x47   :  { %2216 = vmatprep.subr.bf16.mxu0 %v2506_v3 }
  0x4a   :  { %2217 = vmatpush3.bf16.msra.mxu0 %v373_v9 }
  0x4b   :  { %2218 = vmatprep.subr.bf16.mxu0 %v2506_v3 }
  0x4e   :  { %2219 = vmatpush3.bf16.msra.mxu0 %v372_v12 }
  0x4f   :  { %2244 = vmatprep.subr.bf16.mxu0 %v2506_v3 }
  0x51   :  { %2221 = vmatmul.mubr.bf16.vlgmr.msra.gmra.mxu0 %v2710_v53 }
  0x52   :  { %2245 = vmatpush3.bf16.msra.mxu0 %v657_v15  ;;  %2260 = vmatprep.mubr.msk.bf16.mxu0 %vm2507_vm0, %v2506_v3 }
  0x53   :  { %2246 = vmatprep.subr.bf16.mxu0 %v2506_v3 }
  0x56   :  { %2247 = vmatpush3.bf16.msra.mxu0 %v656_v18 }
  0x57   :  { %2248 = vmatprep.subr.bf16.mxu0 %v2506_v3 }
  0x5a   :  { %2249 = vmatpush3.bf16.msra.mxu0 %v655_v21 }
  0x5b   :  { %2250 = vmatprep.subr.bf16.mxu0 %v2506_v3 }
  0x5e   :  { %2251 = vmatpush3.bf16.msra.mxu0 %v654_v24 }
  0x5f   :  { %2252 = vmatprep.subr.bf16.mxu0 %v2506_v3 }
  0x62   :  { %2253 = vmatpush3.bf16.msra.mxu0 %v653_v27  ;;  %v1968_v27 = vld [vmem:[%s3957_s1 + $0x1f0] sm:$0xff] }
  0x63   :  { %2254 = vmatprep.subr.bf16.mxu0 %v2506_v3 }
  0x66   :  { %2255 = vmatpush3.bf16.msra.mxu0 %v652_v30  ;;  %v518_v30 = vpack.c.bf16 %v1969_v28, %v1968_v27 }
  0x67   :  { %2256 = vmatprep.subr.bf16.mxu0 %v2506_v3 }
  0x68   :  { %2225 = vmatpush3.bf16.msra.mxu1 %v518_v30 }
  0x69   :  { %2226 = vmatprep.subr.bf16.mxu1 %v2506_v3 }
  0x6a   :  { %2257 = vmatpush3.bf16.msra.mxu0 %v651_v33  ;;  %v1964_v33 = vld [vmem:[%s3957_s1 + $0x1d0] sm:$0xff] }
  0x6b   :  { %2258 = vmatprep.subr.bf16.mxu0 %v2506_v3  ;;  %v516_v35 = vpack.c.bf16 %v1965_v34, %v1964_v33 }
  0x6c   :  { %2227 = vmatpush3.bf16.msra.mxu1 %v517_v32 }
  0x6d   :  { %2228 = vmatprep.subr.bf16.mxu1 %v2506_v3 }
  0x6e   :  { %2259 = vmatpush3.bf16.msra.mxu0 %v650_v36  ;;  %v1962_v36 = vld [vmem:[%s3957_s1 + $0x1c0] sm:$0xff] }
  0x6f   :  { %2284 = vmatprep.subr.bf16.mxu0 %v2506_v3 }
  0x70   :  { %2229 = vmatpush3.bf16.msra.mxu1 %v516_v35 }
  0x71   :  { %2261 = vmatmul.mubr.bf16.vlgmr.msra.gmra.mxu0 %v2710_v53  ;;  %2230 = vmatprep.subr.bf16.mxu1 %v2506_v3 }
  0x72   :  { %2300 = vmatprep.mubr.msk.bf16.mxu0 %vm2507_vm0, %v2506_v3 }
  0xf1   :  { %v133_v37 = vpop.f32.mrf.mxu0 }
  0xf2   :  { %v142_v38 = vsel %vm141_vm1, %v133_v37, 0.0  ;;  %v275_v39 = vpop.f32.mrf.mxu1 }
  0xf3   :  { %143 = vadd.xlane.f32.xlu1 %v142_v38  ;;  %v2182_v40 = vpop.f32.mrf.mxu0  ;;  %v283_v59 = vsel %vm141_vm1, %v275_v39, 0.0 }
  0xf4   :  { %v2202_v41 = vpop.f32.mrf.mxu1  ;;  %v1961_v40 = vld [vmem:[%s3957_s1 + $0x1b8] sm:$0xff] }
  0xf5   :  { %v136_v42 = vpop.f32.mrf.mxu0 }
  0xf6   :  { %v145_v43 = vsel %vm141_vm1, %v136_v42, 0.0  ;;  %v278_v44 = vpop.f32.mrf.mxu1 }
  0xf7   :  { %146 = vadd.xlane.f32.xlu1 %v145_v43  ;;  %v2183_v45 = vpop.f32.mrf.mxu0  ;;  %v286_v46 = vsel %vm141_vm1, %v278_v44, 0.0  ;;  %v1959_v43 = vld [vmem:[%s3957_s1 + $0x1a8] sm:$0xff] }
  0xf8   :  { %v2203_v47 = vpop.f32.mrf.mxu1  ;;  %v1956_v45 = vld [vmem:[%s3957_s1 + $0x190] sm:$0xff] }
  0xfb   :  { %287 = vadd.xlane.f32.xlu1 %v286_v46  ;;  %v1957_v46 = vld [vmem:[%s3957_s1 + $0x198] sm:$0xff] }
  0xfc   :  { %v512_v47 = vpack.c.bf16 %v1957_v46, %v1956_v45 }
 0x111   :  { %v2835_v48 = vpop.f32.mrf.mxu0 }
 0x113   :  { %v2222_v49 = vpop.f32.mrf.mxu0 }
 0x114   :  { %v1954_v49 = vld [vmem:[%s3957_s1 + $0x180] sm:$0xff] }
 0x115   :  { %v2837_v50 = vpop.f32.mrf.mxu0 }
 0x117   :  { %v2223_v51 = vpop.f32.mrf.mxu0 }
 0x118   :  { %v1955_v51 = vld [vmem:[%s3957_s1 + $0x188] sm:$0xff] }
 0x131   :  { %v692_v52 = vpop.f32.mrf.mxu0 }
 0x132   :  { %v700_v54 = vsel %vm141_vm1, %v692_v52, 0.0 }
 0x133   :  { %701 = vadd.xlane.f32.xlu0 %v700_v54  ;;  %v2262_v55 = vpop.f32.mrf.mxu0  ;;  %v2002_v54 = vld [vmem:[%s3957_s1 + $0x2f0] sm:$0xff] }
 0x134   :  { %v2003_v55 = vld [vmem:[%s3957_s1 + $0x2f8] sm:$0xff] }
 0x135   :  { %v695_v56 = vpop.f32.mrf.mxu0 }
 0x136   :  { %v703_v57 = vsel %vm141_vm1, %v695_v56, 0.0 }
 0x137   :  { %704 = vadd.xlane.f32.xlu0 %v703_v57  ;;  %v2263_v58 = vpop.f32.mrf.mxu0  ;;  %v2000_v57 = vld [vmem:[%s3957_s1 + $0x2e0] sm:$0xff] }
 0x138   :  { %v2001_v58 = vld [vmem:[%s3957_s1 + $0x2e8] sm:$0xff] }
 0x13b   :  { %284 = vadd.xlane.f32.xlu0 %v283_v59  ;;  %v793_v59 = vpack.c.bf16 %v2001_v58, %v2000_v57 }
 0x17c   :  { %v144_v60 = vpop.xlane.xlu1 %143 }
 0x17d   :  { %v149_v61 = vmul.f32 0.03125, %v144_v60  ;;  %v1998_v60 = vld [vmem:[%s3957_s1 + $0x2d0] sm:$0xff] }
 0x17f   :  { %v2842_v1 = vsub.f32 %v133_v37, %v149_v61  ;;  %v1963_v37 = vld [vmem:[%s3957_s1 + $0x1c8] sm:$0xff]  ;;  %v1999_v61 = vld [vmem:[%s3957_s1 + $0x2d8] sm:$0xff] }
 0x180   :  { %v147_v62 = vpop.xlane.xlu1 %146  ;;  %v515_v38 = vpack.c.bf16 %v1963_v37, %v1962_v36 }
 0x181   :  { %v150_v2 = vmul.f32 0.03125, %v147_v62  ;;  %v153_v9 = vmul.f32 %v2842_v1, %v2842_v1  ;;  %v792_v62 = vpack.c.bf16 %v1999_v61, %v1998_v60 }
 0x182   :  { %2231 = vmatpush3.bf16.msra.mxu1 %v515_v38 }
 0x183   :  { %v2850_v10 = vsub.f32 %v136_v42, %v150_v2  ;;  %v155_v17 = vsel %vm141_vm1, %v153_v9, 0.0  ;;  %2232 = vmatprep.subr.bf16.mxu1 %v2506_v3  ;;  %v1958_v42 = vld [vmem:[%s3957_s1 + $0x1a0] sm:$0xff]  ;;  %v1993_v9 = vld [vmem:[%s3957_s1 + $0x2a8] sm:$0xff] }
 0x184   :  { %v288_v5 = vpop.xlane.xlu1 %287 }
 0x185   :  { %v290_v11 = vmul.f32 0.03125, %v288_v5  ;;  %v154_v21 = vmul.f32 %v2850_v10, %v2850_v10  ;;  %v1994_v5 = vld [vmem:[%s3957_s1 + $0x2b0] sm:$0xff] }
 0x187   :  { %v2858_v18 = vsub.f32 %v278_v44, %v290_v11  ;;  %v158_v23 = vsel %vm141_vm1, %v154_v21, 0.0  ;;  %v513_v44 = vpack.c.bf16 %v1959_v43, %v1958_v42 }
 0x189   :  { %v294_v25 = vmul.f32 %v2858_v18, %v2858_v18 }
 0x18b   :  { %v298_v26 = vsel %vm141_vm1, %v294_v25, 0.0 }
 0x1bc   :  { %v702_v63 = vpop.xlane.xlu0 %701 }
 0x1bd   :  { %v706_v0 = vmul.f32 0.03125, %v702_v63  ;;  %v1996_v63 = vld [vmem:[%s3957_s1 + $0x2c0] sm:$0xff] }
 0x1bf   :  { %v2844_v4 = vsub.f32 %v692_v52, %v706_v0  ;;  %v511_v52 = vpack.c.bf16 %v1955_v51, %v1954_v49  ;;  %v1997_v0 = vld [vmem:[%s3957_s1 + $0x2c8] sm:$0xff]  ;;  %v1919_v51 = vld [vmem:[%s3959_s3] ss:$0 sm:$0xff] }
 0x1c0   :  { %v705_v6 = vpop.xlane.xlu0 %704  ;;  %v791_v2 = vpack.c.bf16 %v1997_v0, %v1996_v63 }
 0x1c1   :  { %v707_v7 = vmul.f32 0.03125, %v705_v6  ;;  %v710_v8 = vmul.f32 %v2844_v4, %v2844_v4  ;;  %v1995_v6 = vld [vmem:[%s3957_s1 + $0x2b8] sm:$0xff] }
 0x1c3   :  { %v2852_v12 = vsub.f32 %v695_v56, %v707_v7  ;;  %v712_v13 = vsel %vm141_vm1, %v710_v8, 0.0  ;;  %v794_v56 = vpack.c.bf16 %v2003_v55, %v2002_v54  ;;  %v790_v7 = vpack.c.bf16 %v1995_v6, %v1994_v5  ;;  %v1992_v8 = vld [vmem:[%s3957_s1 + $0x2a0] sm:$0xff] }
 0x1c4   :  { %713 = vadd.xlane.f32.xlu0 %v712_v13  ;;  %v285_v14 = vpop.xlane.xlu0 %284  ;;  %v789_v11 = vpack.c.bf16 %v1993_v9, %v1992_v8  ;;  %v1990_v13 = vld [vmem:[%s3957_s1 + $0x290] sm:$0xff] }
 0x1c5   :  { %v289_v15 = vmul.f32 0.03125, %v285_v14  ;;  %v711_v16 = vmul.f32 %v2852_v12, %v2852_v12  ;;  %v1991_v14 = vld [vmem:[%s3957_s1 + $0x298] sm:$0xff] }
 0x1c7   :  { %v2860_v19 = vsub.f32 %v275_v39, %v289_v15  ;;  %v715_v20 = vsel %vm141_vm1, %v711_v16, 0.0  ;;  %v1960_v39 = vld [vmem:[%s3957_s1 + $0x1b0] sm:$0xff]  ;;  %v788_v15 = vpack.c.bf16 %v1991_v14, %v1990_v13  ;;  %v1988_v16 = vld [vmem:[%s3957_s1 + $0x280] sm:$0xff] }
 0x1c8   :  { %156 = vadd.xlane.f32.xlu0 %v155_v17  ;;  %716 = vadd.xlane.f32.xlu1 %v715_v20  ;;  %v514_v41 = vpack.c.bf16 %v1961_v40, %v1960_v39  ;;  %v1989_v17 = vld [vmem:[%s3957_s1 + $0x288] sm:$0xff]  ;;  %v1987_v40 = vld [vmem:[%s3960_s4] ss:$0 sm:$0xff] }
 0x1c9   :  { %v293_v22 = vmul.f32 %v2860_v19, %v2860_v19  ;;  %v787_v20 = vpack.c.bf16 %v1989_v17, %v1988_v16 }
 0x1ca   :  { %2233 = vmatpush3.bf16.msra.mxu1 %v514_v41 }
 0x1cb   :  { %v295_v24 = vsel %vm141_vm1, %v293_v22, 0.0  ;;  %2234 = vmatprep.subr.bf16.mxu1 %v2506_v3 }
 0x1cc   :  { %159 = vadd.xlane.f32.xlu1 %v158_v23  ;;  %296 = vadd.xlane.f32.xlu0 %v295_v24 }
 0x1ce   :  { %2235 = vmatpush3.bf16.msra.mxu1 %v513_v44 }
 0x1cf   :  { %2236 = vmatprep.subr.bf16.mxu1 %v2506_v3 }
 0x1d0   :  { %299 = vadd.xlane.f32.xlu1 %v298_v26 }
 0x1d2   :  { %2237 = vmatpush3.bf16.msra.mxu1 %v512_v47 }
 0x1d3   :  { %2238 = vmatprep.subr.bf16.mxu1 %v2506_v3 }
 0x1d6   :  { %2239 = vmatpush3.bf16.msra.mxu1 %v511_v52  ;;  %v1936_v52 = vld [vmem:[%s3959_s3 + $0x1] ss:$0 sm:$0xff] }
 0x1d7   :  { %2264 = vmatprep.subr.bf16.mxu1 %v2506_v3 }
 0x1d9   :  { %2241 = vmatmul.mubr.bf16.vlgmr.msra.gmra.mxu1 %v2710_v53 }
 0x1da   :  { %2265 = vmatpush3.bf16.msra.mxu1 %v794_v56  ;;  %2280 = vmatprep.mubr.msk.bf16.mxu1 %vm2507_vm0, %v2506_v3 }
 0x1db   :  { %2266 = vmatprep.subr.bf16.mxu1 %v2506_v3 }
 0x1de   :  { %2267 = vmatpush3.bf16.msra.mxu1 %v793_v59 }
 0x1df   :  { %2268 = vmatprep.subr.bf16.mxu1 %v2506_v3 }
 0x1e2   :  { %2269 = vmatpush3.bf16.msra.mxu1 %v792_v62 }
 0x1e3   :  { %2270 = vmatprep.subr.bf16.mxu1 %v2506_v3 }
 0x1e6   :  { %2271 = vmatpush3.bf16.msra.mxu1 %v791_v2 }
 0x1e7   :  { %2272 = vmatprep.subr.bf16.mxu1 %v2506_v3 }
 0x1ea   :  { %2273 = vmatpush3.bf16.msra.mxu1 %v790_v7 }
 0x1eb   :  { %2274 = vmatprep.subr.bf16.mxu1 %v2506_v3 }
 0x1ee   :  { %2275 = vmatpush3.bf16.msra.mxu1 %v789_v11 }
 0x1ef   :  { %2276 = vmatprep.subr.bf16.mxu1 %v2506_v3 }
 0x1f2   :  { %2277 = vmatpush3.bf16.msra.mxu1 %v788_v15 }
 0x1f3   :  { %2278 = vmatprep.subr.bf16.mxu1 %v2506_v3 }
 0x1f6   :  { %2279 = vmatpush3.bf16.msra.mxu1 %v787_v20  ;;  %v2019_v20 = vld [vmem:[%s3957_s1 + $0x370] sm:$0xff] }
 0x1f7   :  { %2304 = vmatprep.subr.bf16.mxu1 %v2506_v3 }
 0x1f9   :  { %2281 = vmatmul.mubr.bf16.vlgmr.msra.gmra.mxu1 %v2710_v53 }
 0x1fa   :  { %2320 = vmatprep.mubr.msk.bf16.mxu1 %vm2507_vm0, %v2506_v3 }
 0x24d   :  { %v714_v21 = vpop.xlane.xlu0 %713 }
 0x24e   :  { %v718_v22 = vmul.f32 0.03125, %v714_v21  ;;  %v2020_v21 = vld [vmem:[%s3957_s1 + $0x378] sm:$0xff] }
 0x250   :  { %v720_v23 = vadd.f32 1e-05, %v718_v22  ;;  %v2017_v22 = vld [vmem:[%s3957_s1 + $0x360] sm:$0xff] }
 0x251   :  { %v717_v24 = vpop.xlane.xlu1 %716  ;;  %v157_v25 = vpop.xlane.xlu0 %156 }
 0x252   :  { %2413 = vrsqrt.f32 %v720_v23  ;;  %v719_v26 = vmul.f32 0.03125, %v717_v24  ;;  %v161_v27 = vmul.f32 0.03125, %v157_v25  ;;  %v931_v23 = vpack.c.bf16 %v2020_v21, %v2019_v20  ;;  %v2018_v24 = vld [vmem:[%s3957_s1 + $0x368] sm:$0xff] }
 0x253   :  { %v930_v25 = vpack.c.bf16 %v2018_v24, %v2017_v22  ;;  %v2034_v20 = vld [vmem:[%s3957_s1 + $0x3e8] sm:$0xff]  ;;  %v2031_v22 = vld [vmem:[%s3957_s1 + $0x3d0] sm:$0xff] }
 0x254   :  { %v721_v28 = vadd.f32 1e-05, %v719_v26  ;;  %v163_v29 = vadd.f32 1e-05, %v161_v27  ;;  %2285 = vmatpush3.bf16.msra.mxu0 %v931_v23  ;;  %v2015_v26 = vld [vmem:[%s3957_s1 + $0x350] sm:$0xff]  ;;  %v2016_v27 = vld [vmem:[%s3957_s1 + $0x358] sm:$0xff] }
 0x255   :  { %v160_v30 = vpop.xlane.xlu1 %159  ;;  %v297_v31 = vpop.xlane.xlu0 %296  ;;  %2286 = vmatprep.subr.bf16.mxu0 %v2506_v3  ;;  %v2032_v23 = vld [vmem:[%s3957_s1 + $0x3d8] sm:$0xff] }
 0x256   :  { %2415 = vrsqrt.f32 %v721_v28  ;;  %v162_v32 = vmul.f32 0.03125, %v160_v30  ;;  %v301_v33 = vmul.f32 0.03125, %v297_v31  ;;  %v929_v28 = vpack.c.bf16 %v2016_v27, %v2015_v26  ;;  %v2014_v30 = vld [vmem:[%s3957_s1 + $0x348] sm:$0xff] }
 0x257   :  { %2417 = vrsqrt.f32 %v163_v29  ;;  %v2013_v29 = vld [vmem:[%s3957_s1 + $0x340] sm:$0xff]  ;;  %v995_v24 = vpack.c.bf16 %v2032_v23, %v2031_v22  ;;  %v2030_v26 = vld [vmem:[%s3957_s1 + $0x3c8] sm:$0xff] }
 0x258   :  { %v164_v34 = vadd.f32 1e-05, %v162_v32  ;;  %v303_v35 = vadd.f32 1e-05, %v301_v33  ;;  %2287 = vmatpush3.bf16.msra.mxu0 %v930_v25  ;;  %v928_v31 = vpack.c.bf16 %v2014_v30, %v2013_v29  ;;  %v2011_v32 = vld [vmem:[%s3957_s1 + $0x330] sm:$0xff]  ;;  %v2012_v33 = vld [vmem:[%s3957_s1 + $0x338] sm:$0xff] }
 0x259   :  { %v300_v36 = vpop.xlane.xlu1 %299  ;;  %2288 = vmatprep.subr.bf16.mxu0 %v2506_v3  ;;  %v2029_v25 = vld [vmem:[%s3957_s1 + $0x3c0] sm:$0xff]  ;;  %v2028_v29 = vld [vmem:[%s3957_s1 + $0x3b8] sm:$0xff] }
 0x25a   :  { %2419 = vrsqrt.f32 %v164_v34  ;;  %v302_v37 = vmul.f32 0.03125, %v300_v36  ;;  %v927_v34 = vpack.c.bf16 %v2012_v33, %v2011_v32  ;;  %v2010_v36 = vld [vmem:[%s3957_s1 + $0x328] sm:$0xff]  ;;  %v994_v27 = vpack.c.bf16 %v2030_v26, %v2029_v25 }
 0x25b   :  { %2421 = vrsqrt.f32 %v303_v35  ;;  %v2009_v35 = vld [vmem:[%s3957_s1 + $0x320] sm:$0xff]  ;;  %v2026_v32 = vld [vmem:[%s3957_s1 + $0x3a8] sm:$0xff] }
 0x25c   :  { %v304_v38 = vadd.f32 1e-05, %v302_v37  ;;  %2289 = vmatpush3.bf16.msra.mxu0 %v929_v28  ;;  %v926_v37 = vpack.c.bf16 %v2010_v36, %v2009_v35  ;;  %v2027_v28 = vld [vmem:[%s3957_s1 + $0x3b0] sm:$0xff]  ;;  %v2024_v35 = vld [vmem:[%s3957_s1 + $0x398] sm:$0xff] }
 0x25d   :  { %2290 = vmatprep.subr.bf16.mxu0 %v2506_v3  ;;  %v993_v30 = vpack.c.bf16 %v2028_v29, %v2027_v28 }
 0x25e   :  { %2423 = vrsqrt.f32 %v304_v38  ;;  %v2007_v38 = vld [vmem:[%s3957_s1 + $0x310] sm:$0xff] }
 0x25f   :  { %v2414_v39 = vpop.eup %2413 }
 0x260   :  { %v724_v41 = vmul.f32 %v2414_v39, %v2844_v4  ;;  %2291 = vmatpush3.bf16.msra.mxu0 %v928_v31  ;;  %v2008_v39 = vld [vmem:[%s3957_s1 + $0x318] sm:$0xff]  ;;  %v2025_v31 = vld [vmem:[%s3957_s1 + $0x3a0] sm:$0xff] }
 0x261   :  { %2292 = vmatprep.subr.bf16.mxu0 %v2506_v3  ;;  %v992_v33 = vpack.c.bf16 %v2026_v32, %v2025_v31 }
 0x262   :  { %v2994_v42 = vmul.f32 %v1987_v40, %v724_v41  ;;  %v2005_v41 = vld [vmem:[%s3957_s1 + $0x300] sm:$0xff] }
 0x263   :  { %v2416_v43 = vpop.eup %2415 }
 0x264   :  { %v2418_v44 = vpop.eup %2417  ;;  %732 = vrot.lane.b32.xlu0 %v2994_v42, %s2508_s27  ;;  %v725_v45 = vmul.f32 %v2416_v43, %v2852_v12  ;;  %2293 = vmatpush3.bf16.msra.mxu0 %v927_v34  ;;  %v2006_v43 = vld [vmem:[%s3957_s1 + $0x308] sm:$0xff]  ;;  %v2023_v34 = vld [vmem:[%s3957_s1 + $0x390] sm:$0xff] }
 0x265   :  { %v167_v47 = vmul.f32 %v2418_v44, %v2842_v1  ;;  %2294 = vmatprep.subr.bf16.mxu0 %v2506_v3  ;;  %v924_v44 = vpack.c.bf16 %v2006_v43, %v2005_v41  ;;  %v991_v36 = vpack.c.bf16 %v2024_v35, %v2023_v34 }
 0x266   :  { %v2999_v46 = vmul.f32 %v1987_v40, %v725_v45  ;;  %v925_v40 = vpack.c.bf16 %v2008_v39, %v2007_v38  ;;  %v2022_v38 = vld [vmem:[%s3957_s1 + $0x388] sm:$0xff] }
 0x267   :  { %v2420_v49 = vpop.eup %2419  ;;  %v3011_v12 = vmul.f32 %v1919_v51, %v167_v47 }
 0x268   :  { %v2422_v4 = vpop.eup %2421  ;;  %735 = vrot.lane.b32.xlu1 %v2999_v46, %s2508_s27  ;;  %v168_v55 = vmul.f32 %v2420_v49, %v2850_v10  ;;  %2295 = vmatpush3.bf16.msra.mxu0 %v926_v37  ;;  %v2021_v37 = vld [vmem:[%s3957_s1 + $0x380] sm:$0xff] }
 0x269   :  { %v307_v54 = vmul.f32 %v2422_v4, %v2860_v19  ;;  %2296 = vmatprep.subr.bf16.mxu0 %v2506_v3  ;;  %v990_v39 = vpack.c.bf16 %v2022_v38, %v2021_v37 }
 0x26a   :  { %v3020_v57 = vmul.f32 %v1919_v51, %v168_v55 }
 0x26b   :  { %v2424_v1 = vpop.eup %2423  ;;  %v3014_v56 = vmul.f32 %v1936_v52, %v307_v54 }
 0x26c   :  { %176 = vrot.lane.b32.xlu1 %v3011_v12, %s2508_s27  ;;  %v308_v58 = vmul.f32 %v2424_v1, %v2858_v18  ;;  %2297 = vmatpush3.bf16.msra.mxu0 %v925_v40  ;;  %v60_v40 = vlaneseq }
 0x26d   :  { %315 = vrot.lane.b32.xlu0 %v3014_v56, %s2508_s27  ;;  %2298 = vmatprep.subr.bf16.mxu0 %v2506_v3 }
 0x26e   :  { %v3025_v19 = vmul.f32 %v1936_v52, %v308_v58  ;;  %v3203_v41 = vand.u32 127, %v60_v40 }
 0x270   :  { %179 = vrot.lane.b32.xlu1 %v3020_v57, %s2508_s27  ;;  %2299 = vmatpush3.bf16.msra.mxu0 %v924_v44  ;;  %v66_v43 = vand.u32 1, %v3203_v41 }
 0x271   :  { %2324 = vmatprep.subr.bf16.mxu0 %v2506_v3 }
 0x272   :  { %vm3209_vm3 = vcmp.eq.s32.totalorder %v66_v43, 0  ;;  %v3289_v43 = vshrl.u32 %v60_v40, 7 }
 0x273   :  { %2301 = vmatmul.mubr.bf16.vlgmr.msra.gmra.mxu0 %v2710_v53 }
 0x274   :  { %318 = vrot.lane.b32.xlu1 %v3025_v19, %s2508_s27  ;;  %2326 = vmatprep.mubr.msk.bf16.mxu0 %vm2507_vm0, %v2506_v3  ;;  %vm1183_vm4 = vcmp.le.s32.totalorder %v3203_v41, %v3289_v43 }
 0x299   :  { %v3044_v7 = vpop.f32.mrf.mxu1 }
 0x29b   :  { %v2242_v9 = vpop.f32.mrf.mxu1 }
 0x29c   :  { %v2035_v9 = vld [vmem:[%s3957_s1 + $0x3f0] sm:$0xff] }
 0x29d   :  { %v3049_v11 = vpop.f32.mrf.mxu1 }
 0x29f   :  { %v2243_v13 = vpop.f32.mrf.mxu1 }
 0x2a0   :  { %v2036_v13 = vld [vmem:[%s3957_s1 + $0x3f8] sm:$0xff] }
 0x2b9   :  { %v3051_v14 = vpop.f32.mrf.mxu1 }
 0x2bb   :  { %v2282_v15 = vpop.f32.mrf.mxu1 }
 0x2bc   :  { %v2033_v15 = vld [vmem:[%s3957_s1 + $0x3e0] sm:$0xff]  ;;  %s1135_s1 = scalar_lea.vmem %s3967_s11, %s3771_s29 }
 0x2bd   :  { %v3053_v16 = vpop.f32.mrf.mxu1  ;;  %v996_v21 = vpack.c.bf16 %v2034_v20, %v2033_v15 }
 0x2bf   :  { %v2283_v17 = vpop.f32.mrf.mxu1 }
 0x2c0   :  { %v997_v17 = vpack.c.bf16 %v2036_v13, %v2035_v9 }
 0x2c2   :  { %2305 = vmatpush3.bf16.msra.mxu1 %v997_v17 }
 0x2c3   :  { %2306 = vmatprep.subr.bf16.mxu1 %v2506_v3 }
 0x2c6   :  { %2307 = vmatpush3.bf16.msra.mxu1 %v996_v21 }
 0x2c7   :  { %2308 = vmatprep.subr.bf16.mxu1 %v2506_v3 }
 0x2ca   :  { %2309 = vmatpush3.bf16.msra.mxu1 %v995_v24 }
 0x2cb   :  { %2310 = vmatprep.subr.bf16.mxu1 %v2506_v3 }
 0x2ce   :  { %2311 = vmatpush3.bf16.msra.mxu1 %v994_v27 }
 0x2cf   :  { %2312 = vmatprep.subr.bf16.mxu1 %v2506_v3 }
 0x2d2   :  { %2313 = vmatpush3.bf16.msra.mxu1 %v993_v30 }
 0x2d3   :  { %2314 = vmatprep.subr.bf16.mxu1 %v2506_v3 }
 0x2d6   :  { %v733_v10 = vpop.permute.xlu0 %732  ;;  %2315 = vmatpush3.bf16.msra.mxu1 %v992_v33 }
 0x2d7   :  { %v734_v59 = vsel %vm175_vm2, %v733_v10, %v2994_v42  ;;  %2316 = vmatprep.subr.bf16.mxu1 %v2506_v3 }
 0x2d8   :  { %738 = vrot.lane.b32.xlu0 %v734_v59, %s2508_s27 }
 0x2da   :  { %v736_v60 = vpop.permute.xlu1 %735  ;;  %2317 = vmatpush3.bf16.msra.mxu1 %v991_v36 }
 0x2db   :  { %v737_v61 = vsel %vm175_vm2, %v736_v60, %v2999_v46  ;;  %2318 = vmatprep.subr.bf16.mxu1 %v2506_v3 }
 0x2dc   :  { %740 = vrot.lane.b32.xlu1 %v737_v61, %s2508_s27 }
 0x2de   :  { %v177_v18 = vpop.permute.xlu1 %176  ;;  %2319 = vmatpush3.bf16.msra.mxu1 %v990_v39 }
 0x2df   :  { %v178_v62 = vsel %vm175_vm2, %v177_v18, %v3011_v12  ;;  %v316_v63 = vpop.permute.xlu0 %315  ;;  %2330 = vmatprep.subr.bf16.mxu1 %v2506_v3 }
 0x2e0   :  { %182 = vrot.lane.b32.xlu0 %v178_v62, %s2508_s27  ;;  %v317_v5 = vsel %vm175_vm2, %v316_v63, %v3014_v56 }
 0x2e1   :  { %2321 = vmatmul.mubr.bf16.vlgmr.msra.gmra.mxu1 %v2710_v53 }
 0x2e2   :  { %v180_v0 = vpop.permute.xlu1 %179  ;;  %2332 = vmatprep.mubr.msk.bf16.mxu1 %vm2507_vm0, %v2506_v3 }
 0x2e3   :  { %v181_v2 = vsel %vm175_vm2, %v180_v0, %v3020_v57 }
 0x2e4   :  { %184 = vrot.lane.b32.xlu1 %v181_v2, %s2508_s27  ;;  %321 = vrot.lane.b32.xlu0 %v317_v5, %s2508_s27  ;;  %v837_v2 = vsel %vm141_vm1, %v3051_v14, 0.0  ;;  %v422_v5 = vsel %vm141_vm1, %v2835_v48, 0.0 }
 0x2e6   :  { %v319_v6 = vpop.permute.xlu1 %318 }
 0x2e7   :  { %v320_v8 = vsel %vm175_vm2, %v319_v6, %v3025_v19  ;;  %v840_v6 = vsel %vm141_vm1, %v3053_v16, 0.0 }
 0x2e8   :  { %323 = vrot.lane.b32.xlu1 %v320_v8, %s2508_s27  ;;  %v425_v8 = vsel %vm141_vm1, %v2837_v50, 0.0 }
 0x34a   :  { %v739_v45 = vpop.permute.xlu0 %738 }
 0x34b   :  { %v742_v47 = vsel %vm175_vm2, %v739_v45, %v2994_v42  ;;  %v1642_v45 = vld [vmem:[%s3958_s2 + $0x50] sm:$0xff] }
 0x34c   :  { %756 = vrot.lane.b32.xlu0 %v742_v47, %s2509_s25  ;;  %v744_v49 = vsub.f32 0.0, %v742_v47 }
 0x34e   :  { %v741_v51 = vpop.permute.xlu1 %740 }
 0x34f   :  { %v743_v4 = vsel %vm175_vm2, %v741_v51, %v2999_v46  ;;  %v3216_v51 = vld [vmem:[%s3962_s6] sm:$0xff] }
 0x350   :  { %758 = vrot.lane.b32.xlu1 %v743_v4, %s2509_s25  ;;  %748 = vrot.lane.b32.xlu0 %v744_v49, %s2510_s26  ;;  %v745_v52 = vsub.f32 0.0, %v743_v4  ;;  %v3223_v4 = vld [vmem:[%s3961_s5] sm:$0xff] }
 0x351   :  { %v347_v28 = vmul.f32 %v3014_v56, %v3223_v4 }
 0x352   :  { %v183_v54 = vpop.permute.xlu0 %182 }
 0x353   :  { %v186_v55 = vsel %vm175_vm2, %v183_v54, %v3011_v12  ;;  %v3233_v54 = vld [vmem:[%s3962_s6 + $0x8] sm:$0xff] }
 0x354   :  { %v188_v1 = vsub.f32 0.0, %v186_v55  ;;  %750 = vrot.lane.b32.xlu1 %v745_v52, %s2510_s26  ;;  %v3228_v52 = vld [vmem:[%s3961_s5 + $0x8] sm:$0xff]  ;;  %s3814_s5 = sld [smem:[#allocation2 + $0xd]] }
 0x355   :  { %v209_v17 = vmul.f32 %v3020_v57, %v3228_v52  ;;  %v348_v31 = vmul.f32 %v3025_v19, %v3228_v52 }
 0x356   :  { %v185_v58 = vpop.permute.xlu1 %184  ;;  %192 = vrot.lane.b32.xlu0 %v188_v1, %s2510_s26  ;;  %v322_v10 = vpop.permute.xlu0 %321 }
 0x357   :  { %v187_v59 = vsel %vm175_vm2, %v185_v58, %v3020_v57  ;;  %v325_v61 = vsel %vm175_vm2, %v322_v10, %v3014_v56  ;;  %v764_v10 = vmul.f32 %v2994_v42, %v3223_v4 }
 0x358   :  { %v189_v60 = vsub.f32 0.0, %v187_v59  ;;  %v327_v62 = vsub.f32 0.0, %v325_v61 }
 0x35a   :  { %194 = vrot.lane.b32.xlu1 %v189_v60, %s2510_s26  ;;  %v324_v18 = vpop.permute.xlu1 %323  ;;  %200 = vrot.lane.b32.xlu0 %v186_v55, %s2509_s25 }
 0x35b   :  { %v326_v63 = vsel %vm175_vm2, %v324_v18, %v3025_v19  ;;  %v3278_v19 = vpop.f32.mrf.mxu0 }
 0x35c   :  { %v328_v0 = vsub.f32 0.0, %v326_v63 }
 0x35d   :  { %v2302_v36 = vpop.f32.mrf.mxu0 }
 0x35e   :  { %202 = vrot.lane.b32.xlu1 %v187_v59, %s2509_s25  ;;  %331 = vrot.lane.b32.xlu0 %v327_v62, %s2510_s26  ;;  %v765_v59 = vmul.f32 %v2999_v46, %v3228_v52  ;;  %v208_v46 = vmul.f32 %v3011_v12, %v3223_v4 }
 0x35f   :  { %v3280_v37 = vpop.f32.mrf.mxu0 }
 0x360   :  { %v3284_v38 = vpack.c.bf16 %v3280_v37, %v3278_v19 }
 0x361   :  { %v2303_v39 = vpop.f32.mrf.mxu0 }
 0x362   :  { %333 = vrot.lane.b32.xlu1 %v328_v0, %s2510_s26  ;;  %339 = vrot.lane.b32.xlu0 %v325_v61, %s2509_s25 }
 0x363   :  { %2331 = vmatpush3.bf16.msra.mxu1 %v3284_v38 }
 0x364   :  { %2342 = vmatprep.subr.bf16.mxu1 %v2506_v3 }
 0x366   :  { %341 = vrot.lane.b32.xlu1 %v326_v63, %s2509_s25 }
 0x381   :  { %838 = vadd.xlane.f32.xlu0 %v837_v2 }
 0x385   :  { %423 = vadd.xlane.f32.xlu0 %v422_v5 }
 0x389   :  { %426 = vadd.xlane.f32.xlu0 %v425_v8 }
 0x38a   :  { %841 = vadd.xlane.f32.xlu1 %v840_v6 }
 0x3be   :  { %v757_v44 = vpop.permute.xlu0 %756 }
 0x3c2   :  { %v759_v47 = vpop.permute.xlu1 %758  ;;  %v749_v49 = vpop.permute.xlu0 %748 }
 0x3c3   :  { %v762_v53 = vsel %vm3209_vm3, %v749_v49, %v757_v44 }
 0x3c4   :  { %v766_v55 = vmul.f32 %v762_v53, %v3216_v51 }
 0x3c6   :  { %v751_v1 = vpop.permute.xlu1 %750  ;;  %v3243_v18 = vadd.f32 %v766_v55, %v764_v10 }
 0x3c7   :  { %v763_v58 = vsel %vm3209_vm3, %v751_v1, %v759_v47  ;;  %v3294_v47 = vadd.s32 8, %v3289_v43 }
 0x3c8   :  { %v767_v60 = vmul.f32 %v763_v58, %v3233_v54  ;;  %v193_v61 = vpop.permute.xlu0 %192 }
 0x3c9   :  { %vm1184_vm6 = vcmp.le.s32.totalorder %v3203_v41, %v3294_v47 }
 0x3ca   :  { %v3245_v62 = vadd.f32 %v767_v60, %v765_v59 }
 0x3cc   :  { %v195_v63 = vpop.permute.xlu1 %194  ;;  %v201_v0 = vpop.permute.xlu0 %200  ;;  %v1186_v2 = vpack.c.bf16 %v3245_v62, %v3243_v18 }
 0x3cd   :  { %v206_v5 = vsel %vm3209_vm3, %v193_v61, %v201_v0 }
 0x3ce   :  { %v210_v42 = vmul.f32 %v206_v5, %v3216_v51  ;;  %v1192_v6 = vsel %vm141_vm1, %v1186_v2, 0 }
 0x3cf   :  { %2325 = vmatpush3.bf16.xpose.msra.mxu0 %v1192_v6 }
 0x3d0   :  { %v203_v8 = vpop.permute.xlu1 %202  ;;  %v332_v9 = vpop.permute.xlu0 %331  ;;  %2336 = vmatprep.subr.bf16.mxu0 %v2506_v3  ;;  %v212_v15 = vadd.f32 %v210_v42, %v208_v46 }
 0x3d1   :  { %v207_v13 = vsel %vm3209_vm3, %v195_v63, %v203_v8 }
 0x3d2   :  { %v211_v20 = vmul.f32 %v207_v13, %v3233_v54  ;;  %v214_v12 = vmul.f32 0.17677669, %v212_v15 }
 0x3d4   :  { %v213_v21 = vadd.f32 %v211_v20, %v209_v17  ;;  %v334_v22 = vpop.permute.xlu1 %333  ;;  %v340_v23 = vpop.permute.xlu0 %339 }
 0x3d5   :  { %v345_v24 = vsel %vm3209_vm3, %v332_v9, %v340_v23 }
 0x3d6   :  { %v215_v25 = vmul.f32 0.17677669, %v213_v21  ;;  %v349_v26 = vmul.f32 %v345_v24, %v3216_v51 }
 0x3d8   :  { %v1185_v27 = vpack.c.bf16 %v215_v25, %v214_v12  ;;  %v342_v29 = vpop.permute.xlu1 %341  ;;  %v351_v30 = vadd.f32 %v349_v26, %v347_v28 }
 0x3d9   :  { %v346_v57 = vsel %vm3209_vm3, %v334_v22, %v342_v29 }
 0x3da   :  { %v350_v32 = vmul.f32 %v346_v57, %v3233_v54  ;;  %2327 = vmatmul.mubr.msk.bf16.vlgmr.msra.gmra.mxu0 %vm141_vm1, %v1185_v27  ;;  %v353_v56 = vmul.f32 0.17677669, %v351_v30 }
 0x3db   :  { %2337 = vmatpush3.bf16.xpose.msra.mxu0 %v1192_v6  ;;  %2338 = vmatprep.mubr.msk.bf16.mxu0 %vm2507_vm0, %v2506_v3 }
 0x3dc   :  { %v352_v33 = vadd.f32 %v350_v32, %v348_v31  ;;  %2348 = vmatprep.subr.bf16.mxu0 %v2506_v3 }
 0x3de   :  { %v354_v34 = vmul.f32 0.17677669, %v352_v33 }
 0x3e0   :  { %v1312_v35 = vpack.c.bf16 %v354_v34, %v353_v56 }
 0x3e2   :  { %2339 = vmatmul.mubr.msk.bf16.vlgmr.msra.gmra.mxu0 %vm141_vm1, %v1312_v35 }
 0x3e3   :  { %2352 = vmatprep.mubr.msk.bf16.mxu0 %vm2507_vm0, %v2506_v3 }
 0x40a   :  { %v839_v44 = vpop.xlane.xlu0 %838 }
 0x40b   :  { %v843_v53 = vmul.f32 0.03125, %v839_v44 }
 0x40d   :  { %v3303_v60 = vsub.f32 %v3051_v14, %v843_v53 }
 0x40e   :  { %v424_v55 = vpop.xlane.xlu0 %423 }
 0x40f   :  { %v428_v63 = vmul.f32 0.03125, %v424_v55  ;;  %v847_v14 = vmul.f32 %v3303_v60, %v3303_v60 }
 0x411   :  { %v3315_v8 = vsub.f32 %v2835_v48, %v428_v63  ;;  %v849_v22 = vsel %vm141_vm1, %v847_v14, 0.0  ;;  %v2004_v14 = vld [vmem:[%s3960_s4 + $0x1] ss:$0 sm:$0xff]  ;;  %s3785_s4 = sld [smem:[#allocation2 + $0x9]] }
 0x412   :  { %v427_v42 = vpop.xlane.xlu0 %426 }
 0x413   :  { %v842_v40 = vpop.xlane.xlu1 %841  ;;  %v429_v9 = vmul.f32 0.03125, %v427_v42 }
 0x414   :  { %v844_v0 = vmul.f32 0.03125, %v842_v40 }
 0x415   :  { %v3326_v23 = vsub.f32 %v2837_v50, %v429_v9 }
 0x416   :  { %v3318_v13 = vsub.f32 %v3053_v16, %v844_v0  ;;  %v432_v16 = vmul.f32 %v3315_v8, %v3315_v8 }
 0x417   :  { %v433_v27 = vmul.f32 %v3326_v23, %v3326_v23 }
 0x418   :  { %v848_v12 = vmul.f32 %v3318_v13, %v3318_v13  ;;  %v434_v25 = vsel %vm141_vm1, %v432_v16, 0.0 }
 0x419   :  { %v437_v50 = vsel %vm141_vm1, %v433_v27, 0.0 }
 0x41a   :  { %v852_v26 = vsel %vm141_vm1, %v848_v12, 0.0 }
 0x49a   :  { %v1228_v49 = vpop.f32.mrf.mxu0 }
 0x49b   :  { %v1235_v1 = vsel %vm1183_vm4, %v1228_v49, -1e+30 }
 0x49c   :  { %v2328_v58 = vpop.f32.mrf.mxu0  ;;  %v1238_v10 = vsel %vm1237_vm5, %v1235_v1, -inf }
 0x49d   :  { %1239 = vmax.xlane.f32.xlu0 %v1238_v10 }
 0x49e   :  { %v1231_v59 = vpop.f32.mrf.mxu0 }
 0x49f   :  { %v1236_v61 = vsel %vm1184_vm6, %v1231_v59, -1e+30 }
 0x4a0   :  { %v2329_v2 = vpop.f32.mrf.mxu0  ;;  %v1241_v5 = vsel %vm1237_vm5, %v1236_v61, -inf }
 0x4a1   :  { %1242 = vmax.xlane.f32.xlu1 %v1241_v5 }
 0x4a2   :  { %v1350_v6 = vpop.f32.mrf.mxu0 }
 0x4a3   :  { %v1357_v46 = vsel %vm1183_vm4, %v1350_v6, -1e+30 }
 0x4a4   :  { %v2340_v15 = vpop.f32.mrf.mxu0  ;;  %v1359_v17 = vsel %vm1237_vm5, %v1357_v46, -inf }
 0x4a5   :  { %1360 = vmax.xlane.f32.xlu0 %v1359_v17 }
 0x4a6   :  { %v1353_v20 = vpop.f32.mrf.mxu0 }
 0x4a7   :  { %v1358_v21 = vsel %vm1184_vm6, %v1353_v20, -1e+30 }
 0x4a8   :  { %v2341_v48 = vpop.f32.mrf.mxu0  ;;  %v1362_v24 = vsel %vm1237_vm5, %v1358_v21, -inf }
 0x4a9   :  { %850 = vadd.xlane.f32.xlu0 %v849_v22  ;;  %1363 = vmax.xlane.f32.xlu1 %v1362_v24  ;;  %v3367_v48 = vpop.f32.mrf.mxu1 }
 0x4ab   :  { %v2322_v16 = vpop.f32.mrf.mxu1 }
 0x4ac   :  { %v561_v16 = vsel %vm141_vm1, %v3044_v7, 0.0 }
 0x4ad   :  { %435 = vadd.xlane.f32.xlu0 %v434_v25  ;;  %853 = vadd.xlane.f32.xlu1 %v852_v26  ;;  %v1953_v25 = vld [vmem:[%s3959_s3 + $0x2] ss:$0 sm:$0xff]  ;;  %v3377_v26 = vpop.f32.mrf.mxu1 }
 0x4b1   :  { %438 = vadd.xlane.f32.xlu1 %v437_v50  ;;  %v2323_v50 = vpop.f32.mrf.mxu1 }
 0x526   :  { %v1240_v28 = vpop.xlane.xlu0 %1239 }
 0x527   :  { %v1244_v29 = vsub.f32 %v1235_v1, %v1240_v28 }
 0x529   :  { %v1246_v57 = vmul.f32 1.442695, %v1244_v29 }
 0x52a   :  { %v1243_v30 = vpop.xlane.xlu1 %1242 }
 0x52b   :  { %v1245_v31 = vsub.f32 %v1236_v61, %v1243_v30  ;;  %2425 = vpow2.f32 %v1246_v57 }
 0x52d   :  { %v1248_v32 = vmul.f32 1.442695, %v1245_v31 }
 0x52e   :  { %v1361_v33 = vpop.xlane.xlu0 %1360 }
 0x52f   :  { %2427 = vpow2.f32 %v1248_v32  ;;  %v1365_v56 = vsub.f32 %v1357_v46, %v1361_v33 }
 0x531   :  { %v1367_v34 = vmul.f32 1.442695, %v1365_v56 }
 0x532   :  { %v851_v35 = vpop.xlane.xlu0 %850  ;;  %v1364_v36 = vpop.xlane.xlu1 %1363 }
 0x533   :  { %v855_v39 = vmul.f32 0.03125, %v851_v35  ;;  %v1366_v44 = vsub.f32 %v1358_v21, %v1364_v36  ;;  %2429 = vpow2.f32 %v1367_v34 }
 0x535   :  { %v857_v49 = vadd.f32 1e-05, %v855_v39  ;;  %v1369_v53 = vmul.f32 1.442695, %v1366_v44 }
 0x536   :  { %v436_v55 = vpop.xlane.xlu0 %435  ;;  %v854_v58 = vpop.xlane.xlu1 %853 }
 0x537   :  { %2431 = vrsqrt.f32 %v857_v49  ;;  %v440_v1 = vmul.f32 0.03125, %v436_v55  ;;  %v856_v10 = vmul.f32 0.03125, %v854_v58 }
 0x538   :  { %2433 = vpow2.f32 %v1369_v53  ;;  %v3338_v63 = vpop.eup %2425 }
 0x539   :  { %v442_v40 = vadd.f32 1e-05, %v440_v1  ;;  %v858_v59 = vadd.f32 1e-05, %v856_v10 }
 0x53a   :  { %v439_v61 = vpop.xlane.xlu1 %438 }
 0x53b   :  { %2435 = vrsqrt.f32 %v442_v40  ;;  %v441_v0 = vmul.f32 0.03125, %v439_v61 }
 0x53c   :  { %v3340_v2 = vpop.eup %2427  ;;  %2437 = vrsqrt.f32 %v858_v59 }
 0x53d   :  { %v443_v5 = vadd.f32 1e-05, %v441_v0  ;;  %v1256_v42 = vpack.c.bf16 %v3340_v2, %v3338_v63 }
 0x53f   :  { %2333 = vmatmul.mubr.msk.bf16.vlgmr.msra.gmra.mxu1 %vm1237_vm5, %v1256_v42  ;;  %2439 = vrsqrt.f32 %v443_v5 }
 0x540   :  { %2343 = vmatpush3.bf16.msra.mxu1 %v3284_v38  ;;  %2344 = vmatprep.mubr.msk.bf16.mxu1 %vm2507_vm0, %v2506_v3  ;;  %v3349_v6 = vpop.eup %2429 }
 0x541   :  { %2356 = vmatprep.subr.bf16.mxu1 %v2506_v3 }
 0x544   :  { %v2432_v46 = vpop.eup %2431 }
 0x545   :  { %v3354_v9 = vpop.eup %2433  ;;  %v861_v15 = vmul.f32 %v2432_v46, %v3303_v60 }
 0x546   :  { %v1377_v17 = vpack.c.bf16 %v3354_v9, %v3349_v6 }
 0x547   :  { %v3359_v38 = vmul.f32 %v2004_v14, %v861_v15  ;;  %v1371_v15 = vsel %vm1237_vm5, %v3349_v6, 0.0  ;;  %v1426_v6 = vld [vmem:[%s3958_s2 + $0x20] sm:$0xff] }
 0x548   :  { %v2436_v20 = vpop.eup %2435  ;;  %2345 = vmatmul.mubr.msk.bf16.vlgmr.msra.gmra.mxu1 %vm1237_vm5, %v1377_v17  ;;  %v1374_v17 = vsel %vm1237_vm5, %v3354_v9, 0.0  ;;  %v1427_v9 = vld [vmem:[%s3958_s2 + $0x28] sm:$0xff] }
 0x549   :  { %v2438_v21 = vpop.eup %2437  ;;  %869 = vrot.lane.b32.xlu0 %v3359_v38, %s2508_s27  ;;  %2360 = vmatprep.mubr.msk.bf16.mxu1 %vm2507_vm0, %v2506_v3  ;;  %v446_v24 = vmul.f32 %v2436_v20, %v3315_v8  ;;  %v1428_v20 = vld [vmem:[%s3958_s2 + $0x30] sm:$0xff] }
 0x54a   :  { %v862_v22 = vmul.f32 %v2438_v21, %v3318_v13  ;;  %v1429_v21 = vld [vmem:[%s3958_s2 + $0x38] sm:$0xff] }
 0x54b   :  { %v3379_v27 = vmul.f32 %v1953_v25, %v446_v24  ;;  %v1430_v24 = vpack.c.bf16 %v1427_v9, %v1426_v6 }
 0x54c   :  { %v3369_v60 = vmul.f32 %v2004_v14, %v862_v22  ;;  %v2440_v12 = vpop.eup %2439  ;;  %v1431_v22 = vpack.c.bf16 %v1429_v21, %v1428_v20 }
 0x54d   :  { %v447_v13 = vmul.f32 %v2440_v12, %v3326_v23  ;;  %v564_v12 = vsel %vm141_vm1, %v3049_v11, 0.0 }
 0x54e   :  { %872 = vrot.lane.b32.xlu1 %v3369_v60, %s2508_s27  ;;  %2349 = vmatpush3.bf16.msra.mxu0 %v1431_v22 }
 0x54f   :  { %v3384_v8 = vmul.f32 %v1953_v25, %v447_v13  ;;  %2350 = vmatprep.subr.bf16.mxu0 %v2506_v3 }
 0x552   :  { %454 = vrot.lane.b32.xlu1 %v3379_v27, %s2508_s27  ;;  %2351 = vmatpush3.bf16.msra.mxu0 %v1430_v24 }
 0x553   :  { %2364 = vmatprep.subr.bf16.mxu0 %v2506_v3 }
 0x556   :  { %457 = vrot.lane.b32.xlu1 %v3384_v8, %s2508_s27 }
 0x5bb   :  { %v870_v28 = vpop.permute.xlu0 %869 }
 0x5bc   :  { %v871_v29 = vsel %vm175_vm2, %v870_v28, %v3359_v38 }
 0x5bd   :  { %875 = vrot.lane.b32.xlu0 %v871_v29, %s2508_s27 }
 0x5c0   :  { %v873_v57 = vpop.permute.xlu1 %872 }
 0x5c1   :  { %v874_v30 = vsel %vm175_vm2, %v873_v57, %v3369_v60 }
 0x5c2   :  { %877 = vrot.lane.b32.xlu1 %v874_v30, %s2508_s27 }
 0x5c4   :  { %v455_v23 = vpop.permute.xlu1 %454 }
 0x5c5   :  { %v456_v31 = vsel %vm175_vm2, %v455_v23, %v3379_v27 }
 0x5c6   :  { %460 = vrot.lane.b32.xlu0 %v456_v31, %s2508_s27 }
 0x5c8   :  { %v458_v32 = vpop.permute.xlu1 %457 }
 0x5c9   :  { %v459_v33 = vsel %vm175_vm2, %v458_v32, %v3384_v8 }
 0x5ca   :  { %462 = vrot.lane.b32.xlu1 %v459_v33, %s2508_s27 }
 0x5ff   :  { %v3400_v56 = vpop.f32.mrf.mxu1 }
 0x601   :  { %v2334_v34 = vpop.f32.mrf.mxu1 }
 0x603   :  { %v3402_v35 = vpop.f32.mrf.mxu1 }
 0x605   :  { %v2335_v36 = vpop.f32.mrf.mxu1 }
 0x608   :  { %v3404_v39 = vpop.f32.mrf.mxu1 }
 0x60a   :  { %v2346_v44 = vpop.f32.mrf.mxu1 }
 0x60b   :  { %v902_v44 = vmul.f32 %v3369_v60, %v3228_v52 }
 0x60c   :  { %v3406_v49 = vpop.f32.mrf.mxu1 }
 0x60e   :  { %v2347_v53 = vpop.f32.mrf.mxu1 }
 0x62f   :  { %v876_v55 = vpop.permute.xlu0 %875 }
 0x630   :  { %v879_v58 = vsel %vm175_vm2, %v876_v55, %v3359_v38 }
 0x631   :  { %v881_v1 = vsub.f32 0.0, %v879_v58 }
 0x633   :  { %885 = vrot.lane.b32.xlu0 %v881_v1, %s2510_s26 }
 0x634   :  { %v878_v10 = vpop.permute.xlu1 %877 }
 0x635   :  { %v880_v40 = vsel %vm175_vm2, %v878_v10, %v3369_v60  ;;  %v487_v60 = vmul.f32 %v3384_v8, %v3228_v52 }
 0x636   :  { %v882_v59 = vsub.f32 0.0, %v880_v40 }
 0x637   :  { %893 = vrot.lane.b32.xlu0 %v879_v58, %s2509_s25  ;;  %v901_v58 = vmul.f32 %v3359_v38, %v3223_v4 }
 0x638   :  { %v461_v61 = vpop.permute.xlu0 %460  ;;  %887 = vrot.lane.b32.xlu1 %v882_v59, %s2510_s26 }
 0x639   :  { %v464_v0 = vsel %vm175_vm2, %v461_v61, %v3379_v27 }
 0x63a   :  { %v466_v5 = vsub.f32 0.0, %v464_v0 }
 0x63c   :  { %470 = vrot.lane.b32.xlu0 %v466_v5, %s2510_s26  ;;  %895 = vrot.lane.b32.xlu1 %v880_v40, %s2509_s25  ;;  %v463_v42 = vpop.permute.xlu1 %462 }
 0x63d   :  { %v465_v46 = vsel %vm175_vm2, %v463_v42, %v3384_v8 }
 0x63e   :  { %v467_v14 = vsub.f32 0.0, %v465_v46 }
 0x640   :  { %472 = vrot.lane.b32.xlu1 %v467_v14, %s2510_s26  ;;  %v486_v14 = vmul.f32 %v3379_v27, %v3223_v4 }
 0x65b   :  { %1372 = vadd.xlane.f32.xlu0 %v1371_v15 }
 0x664   :  { %1375 = vadd.xlane.f32.xlu1 %v1374_v17 }
 0x671   :  { %478 = vrot.lane.b32.xlu0 %v464_v0, %s2509_s25 }
 0x675   :  { %480 = vrot.lane.b32.xlu1 %v465_v46, %s2509_s25 }
 0x690   :  { %562 = vadd.xlane.f32.xlu0 %v561_v16 }
 0x699   :  { %565 = vadd.xlane.f32.xlu1 %v564_v12 }
 0x6a5   :  { %v886_v25 = vpop.permute.xlu0 %885 }
 0x6a9   :  { %v894_v50 = vpop.permute.xlu0 %893 }
 0x6aa   :  { %v888_v13 = vpop.permute.xlu1 %887  ;;  %v899_v32 = vsel %vm3209_vm3, %v886_v25, %v894_v50 }
 0x6ab   :  { %v903_v36 = vmul.f32 %v899_v32, %v3216_v51  ;;  %v1970_v32 = vld [vmem:[%s3959_s3 + $0x3] ss:$0 sm:$0xff]  ;;  %s1105_s3 = scalar_lea.vmem %s3967_s11, %s3743_s15 }
 0x6ad   :  { %v3462_v59 = vadd.f32 %v903_v36, %v901_v58 }
 0x6ae   :  { %v896_v28 = vpop.permute.xlu1 %895  ;;  %v471_v29 = vpop.permute.xlu0 %470 }
 0x6af   :  { %v900_v31 = vsel %vm3209_vm3, %v888_v13, %v896_v28 }
 0x6b0   :  { %v904_v33 = vmul.f32 %v900_v31, %v3233_v54 }
 0x6b2   :  { %v473_v57 = vpop.permute.xlu1 %472  ;;  %v3458_v1 = vadd.f32 %v904_v33, %v902_v44 }
 0x6b4   :  { %v1522_v46 = vpack.c.bf16 %v3458_v1, %v3462_v59 }
 0x6b6   :  { %v3476_v21 = vsel %vm141_vm1, %v1522_v46, 0 }
 0x6e4   :  { %v1373_v30 = vpop.xlane.xlu0 %1372 }
 0x6e5   :  { %2441 = vrcp.f32 %v1373_v30 }
 0x6e8   :  { %v479_v53 = vpop.permute.xlu0 %478 }
 0x6e9   :  { %v484_v40 = vsel %vm3209_vm3, %v471_v29, %v479_v53 }
 0x6ea   :  { %v488_v5 = vmul.f32 %v484_v40, %v3216_v51 }
 0x6ec   :  { %v490_v20 = vadd.f32 %v488_v5, %v486_v14  ;;  %v1250_v5 = vsel %vm1237_vm5, %v3338_v63, 0.0 }
 0x6ed   :  { %v1376_v23 = vpop.xlane.xlu1 %1375 }
 0x6ee   :  { %2443 = vrcp.f32 %v1376_v23 }
 0x6f1   :  { %v481_v34 = vpop.permute.xlu1 %480 }
 0x6f2   :  { %v485_v55 = vsel %vm3209_vm3, %v473_v57, %v481_v34  ;;  %v2442_v10 = vpop.eup %2441 }
 0x6f3   :  { %v489_v61 = vmul.f32 %v485_v55, %v3233_v54  ;;  %v1424_v42 = vmul.f32 %v2442_v10, %v3404_v39  ;;  %v492_v39 = vmul.f32 0.17677669, %v490_v20 }
 0x6f5   :  { %v491_v15 = vadd.f32 %v489_v61, %v487_v60 }
 0x6f7   :  { %v493_v8 = vmul.f32 0.17677669, %v491_v15 }
 0x6fb   :  { %v2444_v0 = vpop.eup %2443 }
 0x6fc   :  { %v1425_v38 = vmul.f32 %v2444_v0, %v3406_v49  ;;  %v1521_v49 = vpack.c.bf16 %v493_v8, %v492_v39  ;;  %v1253_v8 = vsel %vm1237_vm5, %v3340_v2, 0.0  ;;  %v1307_v39 = vld [vmem:[%s3958_s2 + $0x10] sm:$0xff] }
 0x6fe   :  { %v1432_v17 = vpack.c.bf16 %v1425_v38, %v1424_v42 }
 0x700   :  { %2353 = vmatmul.mubr.msk.bf16.vlgmr.msra.gmra.mxu0 %vm141_vm1, %v1432_v17 }
 0x701   :  { %2365 = vmatpush3.bf16.xpose.msra.mxu0 %v3476_v21  ;;  %2366 = vmatprep.mubr.msk.bf16.mxu0 %vm2507_vm0, %v2506_v3 }
 0x702   :  { %2376 = vmatprep.subr.bf16.mxu0 %v2506_v3 }
 0x708   :  { %2367 = vmatmul.mubr.msk.bf16.vlgmr.msra.gmra.mxu0 %vm141_vm1, %v1521_v49  ;;  %v1308_v49 = vld [vmem:[%s3958_s2 + $0x18] sm:$0xff] }
 0x709   :  { %2380 = vmatprep.mubr.msk.bf16.mxu0 %vm2507_vm0, %v2506_v3 }
 0x719   :  { %v563_v27 = vpop.xlane.xlu0 %562 }
 0x71a   :  { %v567_v22 = vmul.f32 0.03125, %v563_v27  ;;  %v1305_v27 = vld [vmem:[%s3958_s2] sm:$0xff] }
 0x71c   :  { %v569_v6 = vsub.f32 %v3044_v7, %v567_v22  ;;  %v1310_v22 = vpack.c.bf16 %v1308_v49, %v1307_v39 }
 0x71e   :  { %v571_v9 = vmul.f32 %v569_v6, %v569_v6  ;;  %2357 = vmatpush3.bf16.msra.mxu1 %v1310_v22 }
 0x71f   :  { %2358 = vmatprep.subr.bf16.mxu1 %v2506_v3 }
 0x720   :  { %v573_v24 = vsel %vm141_vm1, %v571_v9, 0.0 }
 0x721   :  { %574 = vadd.xlane.f32.xlu0 %v573_v24 }
 0x722   :  { %v566_v16 = vpop.xlane.xlu1 %565 }
 0x723   :  { %v568_v12 = vmul.f32 0.03125, %v566_v16 }
 0x725   :  { %v570_v25 = vsub.f32 %v3049_v11, %v568_v12 }
 0x727   :  { %v572_v13 = vmul.f32 %v570_v25, %v570_v25 }
 0x729   :  { %v576_v50 = vsel %vm141_vm1, %v572_v13, 0.0 }
 0x72a   :  { %577 = vadd.xlane.f32.xlu0 %v576_v50 }
 0x7aa   :  { %v575_v28 = vpop.xlane.xlu0 %574 }
 0x7ab   :  { %v579_v29 = vmul.f32 0.03125, %v575_v28 }
 0x7ad   :  { %v581_v57 = vadd.f32 1e-05, %v579_v29 }
 0x7af   :  { %2445 = vrsqrt.f32 %v581_v57 }
 0x7b3   :  { %v578_v30 = vpop.xlane.xlu0 %577 }
 0x7b4   :  { %v580_v23 = vmul.f32 0.03125, %v578_v30 }
 0x7b6   :  { %v582_v31 = vadd.f32 1e-05, %v580_v23 }
 0x7b8   :  { %2447 = vrsqrt.f32 %v582_v31 }
 0x7bc   :  { %v2446_v7 = vpop.eup %2445 }
 0x7bd   :  { %v585_v33 = vmul.f32 %v2446_v7, %v569_v6  ;;  %v1306_v6 = vld [vmem:[%s3958_s2 + $0x8] sm:$0xff] }
 0x7be   :  { %v1309_v2 = vpack.c.bf16 %v1306_v6, %v1305_v27 }
 0x7bf   :  { %v3492_v34 = vmul.f32 %v1970_v32, %v585_v33 }
 0x7c0   :  { %v3494_v11 = vpop.f32.mrf.mxu0  ;;  %2359 = vmatpush3.bf16.msra.mxu1 %v1309_v2 }
 0x7c1   :  { %593 = vrot.lane.b32.xlu0 %v3492_v34, %s2508_s27  ;;  %2370 = vmatprep.subr.bf16.mxu1 %v2506_v3 }
 0x7c2   :  { %v2354_v36 = vpop.f32.mrf.mxu0 }
 0x7c4   :  { %v3498_v44 = vpop.f32.mrf.mxu0 }
 0x7c5   :  { %v2448_v53 = vpop.eup %2447 }
 0x7c6   :  { %v2355_v55 = vpop.f32.mrf.mxu0  ;;  %v586_v58 = vmul.f32 %v2448_v53, %v570_v25 }
 0x7c8   :  { %v1564_v10 = vpop.f32.mrf.mxu0  ;;  %v3500_v40 = vmul.f32 %v1970_v32, %v586_v58 }
 0x7c9   :  { %v1571_v42 = vsel %vm1183_vm4, %v1564_v10, -1e+30 }
 0x7ca   :  { %596 = vrot.lane.b32.xlu1 %v3500_v40, %s2508_s27  ;;  %v2368_v61 = vpop.f32.mrf.mxu0  ;;  %v1573_v38 = vsel %vm1237_vm5, %v1571_v42, -inf }
 0x7cc   :  { %v1567_v0 = vpop.f32.mrf.mxu0 }
 0x7cd   :  { %v1572_v46 = vsel %vm1184_vm6, %v1567_v0, -1e+30 }
 0x7ce   :  { %v2369_v60 = vpop.f32.mrf.mxu0  ;;  %v1576_v14 = vsel %vm1237_vm5, %v1572_v46, -inf }
 0x7cf   :  { %v1523_v60 = vpack.c.bf16 %v3377_v26, %v3367_v48 }
 0x7e0   :  { %1251 = vadd.xlane.f32.xlu0 %v1250_v5 }
 0x7e4   :  { %1574 = vmax.xlane.f32.xlu0 %v1573_v38 }
 0x7e8   :  { %1577 = vmax.xlane.f32.xlu0 %v1576_v14  ;;  %v625_v14 = vmul.f32 %v3492_v34, %v3223_v4 }
 0x833   :  { %v594_v15 = vpop.permute.xlu0 %593 }
 0x834   :  { %v595_v17 = vsel %vm175_vm2, %v594_v15, %v3492_v34 }
 0x835   :  { %599 = vrot.lane.b32.xlu1 %v595_v17, %s2508_s27 }
 0x83c   :  { %v597_v63 = vpop.permute.xlu1 %596 }
 0x83d   :  { %v598_v20 = vsel %vm175_vm2, %v597_v63, %v3500_v40  ;;  %v626_v63 = vmul.f32 %v3500_v40, %v3228_v52  ;;  %v1640_v52 = vld [vmem:[%s3958_s2 + $0x40] sm:$0xff] }
 0x83e   :  { %601 = vrot.lane.b32.xlu1 %v598_v20, %s2508_s27 }
 0x862   :  { %1254 = vadd.xlane.f32.xlu1 %v1253_v8 }
 0x869   :  { %v1252_v24 = vpop.xlane.xlu0 %1251 }
 0x86d   :  { %v1575_v25 = vpop.xlane.xlu0 %1574 }
 0x86e   :  { %v1579_v50 = vsub.f32 %v1571_v42, %v1575_v25 }
 0x870   :  { %v1581_v57 = vmul.f32 1.442695, %v1579_v50 }
 0x871   :  { %v1578_v30 = vpop.xlane.xlu0 %1577 }
 0x872   :  { %2449 = vpow2.f32 %v1581_v57  ;;  %v1580_v31 = vsub.f32 %v1572_v46, %v1578_v30 }
 0x874   :  { %v1583_v32 = vmul.f32 1.442695, %v1580_v31 }
 0x876   :  { %2451 = vpow2.f32 %v1583_v32 }
 0x877   :  { %2453 = vrcp.f32 %v1252_v24 }
 0x87f   :  { %v2450_v23 = vpop.eup %2449 }
 0x880   :  { %v1585_v7 = vsel %vm1237_vm5, %v2450_v23, 0.0 }
 0x883   :  { %v2452_v33 = vpop.eup %2451 }
 0x884   :  { %v1588_v36 = vsel %vm1237_vm5, %v2452_v33, 0.0  ;;  %v2454_v55 = vpop.eup %2453  ;;  %v1591_v5 = vpack.c.bf16 %v2452_v33, %v2450_v23 }
 0x885   :  { %v1303_v10 = vmul.f32 %v2454_v55, %v3400_v56 }
 0x8a7   :  { %v600_v9 = vpop.permute.xlu1 %599 }
 0x8a8   :  { %v603_v16 = vsel %vm175_vm2, %v600_v9, %v3492_v34 }
 0x8a9   :  { %v605_v12 = vsub.f32 0.0, %v603_v16 }
 0x8ab   :  { %609 = vrot.lane.b32.xlu0 %v605_v12, %s2510_s26 }
 0x8b0   :  { %v602_v13 = vpop.permute.xlu1 %601 }
 0x8b1   :  { %v604_v28 = vsel %vm175_vm2, %v602_v13, %v3500_v40 }
 0x8b2   :  { %v606_v29 = vsub.f32 0.0, %v604_v28 }
 0x8b4   :  { %611 = vrot.lane.b32.xlu1 %v606_v29, %s2510_s26 }
 0x8b8   :  { %617 = vrot.lane.b32.xlu1 %v603_v16, %s2509_s25 }
 0x8bc   :  { %619 = vrot.lane.b32.xlu1 %v604_v28, %s2509_s25  ;;  %s3777_s25 = sld [smem:[#allocation2 + $0x8]] }
 0x8ca   :  { %1586 = vadd.xlane.f32.xlu0 %v1585_v7 }
 0x8e0   :  { %1589 = vadd.xlane.f32.xlu1 %v1588_v36 }
 0x8eb   :  { %v1255_v53 = vpop.xlane.xlu1 %1254 }
 0x8ec   :  { %2455 = vrcp.f32 %v1255_v53 }
 0x8f9   :  { %v2456_v58 = vpop.eup %2455 }
 0x8fa   :  { %v1304_v61 = vmul.f32 %v2456_v58, %v3402_v35 }
 0x8fc   :  { %v1311_v0 = vpack.c.bf16 %v1304_v61, %v1303_v10 }
 0x8fe   :  { %2361 = vmatmul.mubr.msk.bf16.vlgmr.msra.gmra.mxu1 %vm141_vm1, %v1311_v0 }
 0x8ff   :  { %2371 = vmatpush3.bf16.msra.mxu1 %v1523_v60  ;;  %2372 = vmatprep.mubr.msk.bf16.mxu1 %vm2507_vm0, %v2506_v3 }
 0x900   :  { %2384 = vmatprep.subr.bf16.mxu1 %v2506_v3 }
 0x906   :  { %2373 = vmatmul.mubr.msk.bf16.vlgmr.msra.gmra.mxu1 %vm1237_vm5, %v1591_v5 }
 0x907   :  { %2385 = vmatpush3.bf16.xpose.msra.mxu1 %v3476_v21  ;;  %2386 = vmatprep.mubr.msk.bf16.mxu1 %vm2507_vm0, %v2506_v3 }
 0x908   :  { %2396 = vmatprep.subr.bf16.mxu1 %v2506_v3 }
 0x91d   :  { %v610_v35 = vpop.permute.xlu0 %609 }
 0x926   :  { %v612_v56 = vpop.permute.xlu1 %611 }
 0x92a   :  { %v618_v42 = vpop.permute.xlu1 %617 }
 0x92b   :  { %v623_v38 = vsel %vm3209_vm3, %v610_v35, %v618_v42 }
 0x92c   :  { %v627_v46 = vmul.f32 %v623_v38, %v3216_v51  ;;  %v1643_v51 = vld [vmem:[%s3958_s2 + $0x58] sm:$0xff] }
 0x92d   :  { %v1645_v4 = vpack.c.bf16 %v1643_v51, %v1642_v45  ;;  %v1056_v51 = vld [vmem:[%s3965_s9] sm:$0xff] }
 0x92e   :  { %v620_v15 = vpop.permute.xlu1 %619  ;;  %v629_v17 = vadd.f32 %v627_v46, %v625_v14 }
 0x92f   :  { %v624_v21 = vsel %vm3209_vm3, %v612_v56, %v620_v15  ;;  %2377 = vmatpush3.bf16.msra.mxu0 %v1645_v4  ;;  %v1057_v4 = vld [vmem:[%s3965_s9 + $0x8] sm:$0xff] }
 0x930   :  { %v628_v20 = vmul.f32 %v624_v21, %v3233_v54  ;;  %v631_v39 = vmul.f32 0.17677669, %v629_v17  ;;  %2378 = vmatprep.subr.bf16.mxu0 %v2506_v3  ;;  %v1641_v54 = vld [vmem:[%s3958_s2 + $0x48] sm:$0xff] }
 0x931   :  { %v1644_v34 = vpack.c.bf16 %v1641_v54, %v1640_v52  ;;  %v1058_v52 = vld [vmem:[%s3965_s9 + $0x10] sm:$0xff]  ;;  %v1059_v54 = vld [vmem:[%s3965_s9 + $0x18] sm:$0xff] }
 0x932   :  { %v630_v8 = vadd.f32 %v628_v20, %v626_v63  ;;  %v1041_v20 = vld [vmem:[%s3964_s8 + $0x10] sm:$0xff] }
 0x933   :  { %2379 = vmatpush3.bf16.msra.mxu0 %v1644_v34  ;;  %v1060_v34 = vld [vmem:[%s3965_s9 + $0x20] sm:$0xff] }
 0x934   :  { %v632_v49 = vmul.f32 0.17677669, %v630_v8  ;;  %2390 = vmatprep.subr.bf16.mxu0 %v2506_v3  ;;  %v1042_v8 = vld [vmem:[%s3964_s8 + $0x18] sm:$0xff] }
 0x936   :  { %v1693_v27 = vpack.c.bf16 %v632_v49, %v631_v39  ;;  %v1043_v39 = vld [vmem:[%s3964_s8 + $0x20] sm:$0xff]  ;;  %v1044_v49 = vld [vmem:[%s3964_s8 + $0x28] sm:$0xff] }
 0x938   :  { %2387 = vmatmul.mubr.msk.bf16.vlgmr.msra.gmra.mxu1 %vm141_vm1, %v1693_v27 }
 0x939   :  { %2400 = vmatprep.mubr.msk.bf16.mxu1 %vm2507_vm0, %v2506_v3 }
 0x953   :  { %v1587_v40 = vpop.xlane.xlu0 %1586 }
 0x954   :  { %2457 = vrcp.f32 %v1587_v40  ;;  %v1061_v40 = vld [vmem:[%s3965_s9 + $0x28] sm:$0xff] }
 0x955   :  { %1064 = vst.msk [vmem:[%s3968_s12] sm:$0xff] %vm1047_vm7, %v1056_v51  ;;  %1065 = vst.msk [vmem:[%s3968_s12 + $0x8] sm:$0xff] %vm1047_vm7, %v1057_v4 }
 0x956   :  { %1066 = vst.msk [vmem:[%s3968_s12 + $0x10] sm:$0xff] %vm1047_vm7, %v1058_v52 }
 0x961   :  { %v2458_v25 = vpop.eup %2457 }
 0x969   :  { %v1590_v22 = vpop.xlane.xlu1 %1589 }
 0x96a   :  { %2459 = vrcp.f32 %v1590_v22  ;;  %v1062_v22 = vld [vmem:[%s3965_s9 + $0x30] sm:$0xff] }
 0x977   :  { %v2460_v13 = vpop.eup %2459 }
 0x9be   :  { %v1514_v6 = vpop.f32.mrf.mxu1 }
 0x9bf   :  { %v1515_v5 = vadd.f32 %v1514_v6, %v3494_v11  ;;  %v1039_v11 = vld [vmem:[%s3964_s8] sm:$0xff]  ;;  %v1063_v6 = vld [vmem:[%s3965_s9 + $0x38] sm:$0xff]  ;;  %s3800_s9 = sld [smem:[#allocation2 + $0xb]] }
 0x9c0   :  { %v2362_v2 = vpop.f32.mrf.mxu1  ;;  %1067 = vst.msk [vmem:[%s3968_s12 + $0x18] sm:$0xff] %vm1047_vm7, %v1059_v54  ;;  %1068 = vst.msk [vmem:[%s3968_s12 + $0x20] sm:$0xff] %vm1047_vm7, %v1060_v34 }
 0x9c1   :  { %1069 = vst.msk [vmem:[%s3968_s12 + $0x28] sm:$0xff] %vm1047_vm7, %v1061_v40  ;;  %1070 = vst.msk [vmem:[%s3968_s12 + $0x30] sm:$0xff] %vm1047_vm7, %v1062_v22  ;;  %v1810_v2 = vld [vmem:[%s3958_s2 + $0x78] sm:$0xff] }
 0x9c2   :  { %v1517_v9 = vpop.f32.mrf.mxu1  ;;  %1071 = vst.msk [vmem:[%s3968_s12 + $0x38] sm:$0xff] %vm1047_vm7, %v1063_v6 }
 0x9c3   :  { %v1518_v41 = vadd.f32 %v1517_v9, %v3498_v44  ;;  %v1040_v44 = vld [vmem:[%s3964_s8 + $0x8] sm:$0xff] }
 0x9c4   :  { %v2363_v24 = vpop.f32.mrf.mxu1  ;;  %1048 = vst.msk [vmem:[%s3967_s11] sm:$0xff] %vm1047_vm7, %v1039_v11  ;;  %1049 = vst.msk [vmem:[%s3967_s11 + $0x8] sm:$0xff] %vm1047_vm7, %v1040_v44 }
 0x9c5   :  { %1050 = vst.msk [vmem:[%s3967_s11 + $0x10] sm:$0xff] %vm1047_vm7, %v1041_v20 }
 0x9c6   :  { %v1629_v16 = vpop.f32.mrf.mxu1 }
 0x9c7   :  { %v1638_v28 = vmul.f32 %v2458_v25, %v1629_v16 }
 0x9c8   :  { %v2374_v12 = vpop.f32.mrf.mxu1 }
 0x9ca   :  { %v1632_v50 = vpop.f32.mrf.mxu1 }
 0x9cb   :  { %v1639_v29 = vmul.f32 %v2460_v13, %v1632_v50 }
 0x9cc   :  { %v2375_v57 = vpop.f32.mrf.mxu1  ;;  %v1045_v27 = vld [vmem:[%s3964_s8 + $0x30] sm:$0xff]  ;;  %v1046_v45 = vld [vmem:[%s3964_s8 + $0x38] sm:$0xff]  ;;  %s1099_s8 = scalar_lea.vmem %s3967_s11, %s3741_s14  ;;  %s3807_s14 = sld [smem:[#allocation2 + $0xc]] }
 0x9cd   :  { %v1646_v30 = vpack.c.bf16 %v1639_v29, %v1638_v28  ;;  %1051 = vst.msk [vmem:[%s3967_s11 + $0x18] sm:$0xff] %vm1047_vm7, %v1042_v8  ;;  %1052 = vst.msk [vmem:[%s3967_s11 + $0x20] sm:$0xff] %vm1047_vm7, %v1043_v39 }
 0x9ce   :  { %1053 = vst.msk [vmem:[%s3967_s11 + $0x28] sm:$0xff] %vm1047_vm7, %v1044_v49  ;;  %1054 = vst.msk [vmem:[%s3967_s11 + $0x30] sm:$0xff] %vm1047_vm7, %v1045_v27 }
 0x9cf   :  { %2381 = vmatmul.mubr.msk.bf16.vlgmr.msra.gmra.mxu0 %vm141_vm1, %v1646_v30  ;;  %1055 = vst.msk [vmem:[%s3967_s11 + $0x38] sm:$0xff] %vm1047_vm7, %v1046_v45 }
 0x9d0   :  { %2391 = vmatpush3.bf16.msra.mxu0 %v1523_v60  ;;  %2392 = vmatprep.mubr.msk.bf16.mxu0 %vm2507_vm0, %v2506_v3 }
 0x9d2   :  { %s1161_s7 = scalar_lea.vmem %s3967_s11, %s3807_s14 }
 0x9f8   :  { %v1731_v23 = vpop.f32.mrf.mxu1 }
 0x9f9   :  { %v1738_v31 = vsel %vm1183_vm4, %v1731_v23, -1e+30 }
 0x9fa   :  { %v2388_v7 = vpop.f32.mrf.mxu1  ;;  %v1740_v32 = vsel %vm1237_vm5, %v1738_v31, -inf }
 0x9fb   :  { %1741 = vmax.xlane.f32.xlu0 %v1740_v32 }
 0x9fc   :  { %v1734_v33 = vpop.f32.mrf.mxu1 }
 0x9fd   :  { %v1739_v36 = vsel %vm1184_vm6, %v1734_v33, -1e+30 }
 0x9fe   :  { %v2389_v53 = vpop.f32.mrf.mxu1  ;;  %v1743_v55 = vsel %vm1237_vm5, %v1739_v36, -inf }
 0x9ff   :  { %1744 = vmax.xlane.f32.xlu0 %v1743_v55 }
 0xa84   :  { %v1742_v58 = vpop.xlane.xlu0 %1741 }
 0xa85   :  { %v1746_v10 = vsub.f32 %v1738_v31, %v1742_v58 }
 0xa87   :  { %v1748_v61 = vmul.f32 1.442695, %v1746_v10 }
 0xa88   :  { %v1745_v0 = vpop.xlane.xlu0 %1744 }
 0xa89   :  { %2461 = vpow2.f32 %v1748_v61  ;;  %v1747_v43 = vsub.f32 %v1739_v36, %v1745_v0 }
 0xa8b   :  { %v1750_v60 = vmul.f32 1.442695, %v1747_v43 }
 0xa8d   :  { %2463 = vpow2.f32 %v1750_v60 }
 0xa8f   :  { %v1684_v56 = vpop.f32.mrf.mxu0 }
 0xa90   :  { %v3598_v35 = vadd.f32 %v1684_v56, %v1515_v5 }
 0xa91   :  { %v2382_v42 = vpop.f32.mrf.mxu0 }
 0xa93   :  { %v1687_v47 = vpop.f32.mrf.mxu0 }
 0xa94   :  { %v3601_v38 = vadd.f32 %v1687_v47, %v1518_v41 }
 0xa95   :  { %v2383_v46 = vpop.f32.mrf.mxu0 }
 0xa96   :  { %v2462_v14 = vpop.eup %2461 }
 0xa97   :  { %v1752_v15 = vsel %vm1237_vm5, %v2462_v14, 0.0 }
 0xa98   :  { %1753 = vadd.xlane.f32.xlu0 %v1752_v15 }
 0xa9a   :  { %v2464_v21 = vpop.eup %2463 }
 0xa9b   :  { %v1755_v17 = vsel %vm1237_vm5, %v2464_v21, 0.0  ;;  %v1758_v63 = vpack.c.bf16 %v2464_v21, %v2462_v14 }
 0xa9c   :  { %1756 = vadd.xlane.f32.xlu1 %v1755_v17 }
 0xa9d   :  { %2393 = vmatmul.mubr.msk.bf16.vlgmr.msra.gmra.mxu0 %vm1237_vm5, %v1758_v63 }
 0xaad   :  { %1084 = vrot.lane.b32.xlu1 %v3367_v48, %s2508_s27  ;;  %v1809_v48 = vld [vmem:[%s3958_s2 + $0x70] sm:$0xff] }
 0xaae   :  { %1074 = vrot.lane.b32.xlu0 %v3462_v59, %s2508_s27  ;;  %v1812_v9 = vpack.c.bf16 %v1810_v2, %v1809_v48  ;;  %v1807_v59 = vld [vmem:[%s3958_s2 + $0x60] sm:$0xff] }
 0xab0   :  { %2397 = vmatpush3.bf16.msra.mxu1 %v1812_v9 }
 0xab1   :  { %1076 = vrot.lane.b32.xlu1 %v3458_v1, %s2508_s27  ;;  %2398 = vmatprep.subr.bf16.mxu1 %v2506_v3 }
 0xab5   :  { %1086 = vrot.lane.b32.xlu1 %v3377_v26, %s2508_s27  ;;  %v1808_v26 = vld [vmem:[%s3958_s2 + $0x68] sm:$0xff]  ;;  %s3739_s27 = sld [smem:[#allocation2]]  ;;  %s1120_s2 = scalar_lea.vmem %s3968_s12, %s3747_s17 }
 0xab6   :  { %v1811_v1 = vpack.c.bf16 %v1808_v26, %v1807_v59  ;;  %s1146_s17 = scalar_lea.vmem %s3967_s11, %s3785_s4 }
 0xab8   :  { %2399 = vmatpush3.bf16.msra.mxu1 %v1811_v1 }
 0xabb   :  { %s1093_s20 = scalar_lea.vmem %s3967_s11, %s3739_s27  ;;  %s1096_s6 = scalar_lea.vmem %s3968_s12, %s3739_s27 }
 0xabc   :  { %s1108_s27 = scalar_lea.vmem %s3968_s12, %s3743_s15  ;;  %s1114_s15 = scalar_lea.vmem %s3968_s12, %s3745_s16 }
 0xabd   :  { %s1141_s16 = scalar_lea.vmem %s3967_s11, %s3777_s25 }
 0xb21   :  { %v3751_v3 = vpop.xlane.xlu0 %1753 }
 0xb22   :  { %2465 = vrcp.f32 %v3751_v3 }
 0xb25   :  { %v3779_v24 = vpop.xlane.xlu1 %1756  ;;  %v1075_v16 = vpop.permute.xlu0 %1074 }
 0xb26   :  { %v1080_v12 = vsel %vm141_vm1, %v3243_v18, %v1075_v16  ;;  %2467 = vrcp.f32 %v3779_v24 }
 0xb27   :  { %1095 = vst.msk [vmem:[%s1093_s20] sm:$0x1] %vm1094_vm8, %v1080_v12 }
 0xb28   :  { %1101 = vst.msk [vmem:[%s1099_s8 - $0x1] sm:$0x2] %vm1100_vm9, %v1080_v12  ;;  %s3823_s8 = sld [smem:[#allocation2 + $0xe]] }
 0xb29   :  { %1107 = vst.msk [vmem:[%s1105_s3 - $0x2] sm:$0x4] %vm1106_vm10, %v1080_v12  ;;  %v1085_v18 = vpop.permute.xlu1 %1084 }
 0xb2a   :  { %1113 = vst.msk [vmem:[%s1111_s28 - $0x3] sm:$0x8] %vm1112_vm11, %v1080_v12  ;;  %v1090_v25 = vsel %vm141_vm1, %v3278_v19, %v1085_v18  ;;  %s3836_s28 = sld [smem:[#allocation2 + $0xf]] }
 0xb2b   :  { %1119 = vst.msk [vmem:[%s1117_s13 - $0x4] sm:$0x10] %vm1118_vm12, %v1080_v12  ;;  %s1138_s13 = scalar_lea.vmem %s3968_s12, %s3771_s29  ;;  %s1158_s29 = scalar_lea.vmem %s3968_s12, %s3800_s9 }
 0xb2c   :  { %1097 = vst.msk [vmem:[%s1096_s6] sm:$0x1] %vm1094_vm8, %v1090_v25 }
 0xb2d   :  { %1125 = vst.msk [vmem:[%s1123_s30 - $0x5] sm:$0x20] %vm1124_vm13, %v1080_v12  ;;  %v1077_v19 = vpop.permute.xlu1 %1076 }
 0xb2e   :  { %1103 = vst.msk [vmem:[%s1102_s21 - $0x1] sm:$0x2] %vm1100_vm9, %v1090_v25  ;;  %v1081_v13 = vsel %vm141_vm1, %v3245_v62, %v1077_v19  ;;  %s1173_s26 = scalar_lea.vmem %s3968_s12, %s3823_s8 }
 0xb2f   :  { %1131 = vst.msk [vmem:[%s1129_s22 - $0x6] sm:$0x40] %vm1130_vm14, %v1080_v12  ;;  %s1132_s22 = scalar_lea.vmem %s3968_s12, %s3765_s23  ;;  %s1156_s23 = scalar_lea.vmem %s3967_s11, %s3800_s9  ;;  %v2466_v29 = vpop.eup %2465 }
 0xb30   :  { %1109 = vst.msk [vmem:[%s1108_s27 - $0x2] sm:$0x4] %vm1106_vm10, %v1090_v25  ;;  %s1148_s27 = scalar_lea.vmem %s3968_s12, %s3785_s4 }
 0xb31   :  { %1137 = vst.msk [vmem:[%s1135_s1 - $0x7] sm:$0x80] %vm1136_vm15, %v1080_v12  ;;  %v1087_v62 = vpop.permute.xlu1 %1086 }
 0xb32   :  { %1115 = vst.msk [vmem:[%s1114_s15 - $0x3] sm:$0x8] %vm1112_vm11, %v1090_v25  ;;  %v1091_v50 = vsel %vm141_vm1, %v3280_v37, %v1087_v62  ;;  %s1176_s15 = scalar_lea.vmem %s3967_s11, %s3836_s28 }
 0xb33   :  { %1121 = vst.msk [vmem:[%s1120_s2 - $0x4] sm:$0x10] %vm1118_vm12, %v1090_v25  ;;  %s1143_s2 = scalar_lea.vmem %s3968_s12, %s3777_s25  ;;  %s1171_s25 = scalar_lea.vmem %s3967_s11, %s3823_s8  ;;  %v2468_v57 = vpop.eup %2467 }
 0xb34   :  { %1142 = vst.msk [vmem:[%s1141_s16] sm:$0x1] %vm1094_vm8, %v1081_v13  ;;  %s1166_s16 = scalar_lea.vmem %s3967_s11, %s3814_s5 }
 0xb35   :  { %1127 = vst.msk [vmem:[%s1126_s24 - $0x5] sm:$0x20] %vm1124_vm13, %v1090_v25  ;;  %s1178_s24 = scalar_lea.vmem %s3968_s12, %s3836_s28 }
 0xb36   :  { %1147 = vst.msk [vmem:[%s1146_s17 - $0x1] sm:$0x2] %vm1100_vm9, %v1081_v13 }
 0xb37   :  { %1133 = vst.msk [vmem:[%s1132_s22 - $0x6] sm:$0x40] %vm1130_vm14, %v1090_v25 }
 0xb38   :  { %1152 = vst.msk [vmem:[%s1151_s19 - $0x2] sm:$0x4] %vm1106_vm10, %v1081_v13  ;;  %s1153_s19 = scalar_lea.vmem %s3968_s12, %s3793_s0  ;;  %s1163_s0 = scalar_lea.vmem %s3968_s12, %s3807_s14 }
 0xb39   :  { %1139 = vst.msk [vmem:[%s1138_s13 - $0x7] sm:$0x80] %vm1136_vm15, %v1090_v25 }
 0xb3a   :  { %1157 = vst.msk [vmem:[%s1156_s23 - $0x3] sm:$0x8] %vm1112_vm11, %v1081_v13 }
 0xb3b   :  { %1162 = vst.msk [vmem:[%s1161_s7 - $0x4] sm:$0x10] %vm1118_vm12, %v1081_v13  ;;  %s1168_s7 = scalar_lea.vmem %s3968_s12, %s3814_s5  ;;  %s2511_s12 = smov [#allocation5]  }
 0xb3c   :  { %1144 = vst.msk [vmem:[%s1143_s2] sm:$0x1] %vm1094_vm8, %v1091_v50  ;;  %s1867_s5 = sshll.u32 %s2511_s12, 4  ;;  %s1868_s5 = int_to_ptr.vmem [resolvable:$true] %s1867_s5 }
 0xb3d   :  { %1167 = vst.msk [vmem:[%s1166_s16 - $0x5] sm:$0x20] %vm1124_vm13, %v1081_v13  ;;  %s2481_s8 = scalar_lea.vmem %s1868_s5, 256  ;;  %p2486_p6 = scmp.lt.s32.totalorder %s1868_s5, %s1868_s5 }
 0xb3e   :  { %1149 = vst.msk [vmem:[%s1148_s27 - $0x1] sm:$0x2] %vm1100_vm9, %v1091_v50  ;;  %p2482_p5 = scmp.ne.s32.totalorder %s1868_s5, %s2481_s8  ;;  %p2487_p7 = scmp.lt.s32.totalorder %s2481_s8, %s2481_s8 }
 0xb3f   :  { %1172 = vst.msk [vmem:[%s1171_s25 - $0x6] sm:$0x40] %vm1130_vm14, %v1081_v13 }
 0xb40   :  { %1154 = vst.msk [vmem:[%s1153_s19 - $0x2] sm:$0x4] %vm1106_vm10, %v1091_v50  ;;  %p2488_p8 = por %p2487_p7, %p2486_p6 }
 0xb41   :  { %1177 = vst.msk [vmem:[%s1176_s15 - $0x7] sm:$0x80] %vm1136_vm15, %v1081_v13 }
 0xb42   :  { %1159 = vst.msk [vmem:[%s1158_s29 - $0x3] sm:$0x8] %vm1112_vm11, %v1091_v50  ;;  %p2489_p9 = pnand %p2488_p8, %p2482_p5 }
 0xb43   :  { %1164 = vst.msk [vmem:[%s1163_s0 - $0x4] sm:$0x10] %vm1118_vm12, %v1091_v50 }
 0xb44   :  { %1169 = vst.msk [vmem:[%s1168_s7 - $0x5] sm:$0x20] %vm1124_vm13, %v1091_v50 }
 0xb45   :  { %1174 = vst.msk [vmem:[%s1173_s26 - $0x6] sm:$0x40] %vm1130_vm14, %v1091_v50 }
 0xb46   :  { %1179 = vst.msk [vmem:[%s1178_s24 - $0x7] sm:$0x80] %vm1136_vm15, %v1091_v50 }
 0xb5d   :  { %v1796_v37 = vpop.f32.mrf.mxu0 }
 0xb5e   :  { %v1805_v23 = vmul.f32 %v2466_v29, %v1796_v37 }
 0xb5f   :  { %v2394_v28 = vpop.f32.mrf.mxu0 }
 0xb61   :  { %v1799_v30 = vpop.f32.mrf.mxu0 }
 0xb62   :  { %v1806_v31 = vmul.f32 %v2468_v57, %v1799_v30 }
 0xb63   :  { %v2395_v7 = vpop.f32.mrf.mxu0 }
 0xb64   :  { %v1813_v32 = vpack.c.bf16 %v1806_v31, %v1805_v23 }
 0xb66   :  { %2401 = vmatmul.mubr.msk.bf16.vlgmr.msra.gmra.mxu1 %vm141_vm1, %v1813_v32 }
 0xc26   :  { %v1851_v33 = vpop.f32.mrf.mxu1 }
 0xc27   :  { %v1858_v36 = vadd.f32 %v1851_v33, %v3598_v35 }
 0xc28   :  { %v2402_v53 = vpop.f32.mrf.mxu1 }
 0xc29   :  { %1860 = vst [vmem:[#allocation5] sm:$0xff] %v1858_v36 }
 0xc2a   :  { %v1854_v55 = vpop.f32.mrf.mxu1 }
 0xc2b   :  { %v1859_v58 = vadd.f32 %v1854_v55, %v3601_v38 }
 0xc2c   :  { %v2403_v10 = vpop.f32.mrf.mxu1 }
 0xc2d   :  { %1861 = vst [vmem:[#allocation5 + $0x8] sm:$0xff] %v1859_v58 }
 0xc2e   :  { %2492 = shalt.err (!%p2489_p9)
}
 0xc2f   :  { %s2512_s28 = smov 128   ;;  %s2513_s18 = smov 8  }
 0xc30   :  { %1873 = dma.vmem_to_hbm [thread:$0]  %s1868_s5, 256, %s3966_s10, [#allocation3], %s2512_s28, %s2512_s28, %s2513_s18  }
 0xc31   :  { %2503 = dma.done.wait [#allocation3], 256  }
 0xc32   :  { %2504 = vsyncadd [#allocation3], 4294967040 }
 0xc33   :  { %1885 = vsyncpa [#allocation3], 1 }
 0xc34   :  { %1886 = vsyncpa [#allocation4], 1 }

</bundles_post_ra>
